<compile_context>
chip_gen: v7x
topology: tpu7x:2x2x1
jax: 0.10.0
libtpu: 0.0.40
codegen_flags: <defaults>
</compile_context>

<pallas_src>
import jax
import jax.numpy as jnp
from jax import lax
from jax.experimental import pallas as pl
from jax.experimental.pallas import tpu as pltpu

HIDDEN = 50      # PyTorch hidden size
HP = 128         # per-gate padded width (lane aligned)
TIME_CHUNK = 256 # max timesteps per grid step (keeps pipelined VMEM ~6 MiB)


def _lin_lstm_kernel(xg1_ref,    # (TC, BP, 4*HP) bf16: x@Wih1^T + b1 (padded)
                     whh1_ref,   # (HP, 4*HP)     bf16: lstm1 W_hh^T (padded)
                     w2_ref,     # (2*HP, 4*HP)   bf16: [lstm2 W_ih^T; W_hh^T]
                     b2_ref,     # (1, 4*HP)      f32 : lstm2 b_ih + b_hh
                     s_ref,      # (TC, BP, HP)   f32 : output h1 + h2 per step
                     state_ref): # (4, BP, HP)    f32 scratch: h1, c1, h2, c2
    TC, BP, _ = xg1_ref.shape

    @pl.when(pl.program_id(0) == 0)
    def _():
        state_ref[...] = jnp.zeros_like(state_ref)

    # Hoist weight / bias loads out of the step loop (frees vld slots).
    whh1 = whh1_ref[...]
    w2 = w2_ref[...]
    b2 = b2_ref[...]

    def cell(gates, c):
        # Gate order matches PyTorch nn.LSTM: [i, f, g, o]; 128-lane slabs so
        # gate slicing is pure vreg selection.  All elementwise math in f32.
        i = jax.nn.sigmoid(gates[:, 0 * HP:1 * HP])
        f = jax.nn.sigmoid(gates[:, 1 * HP:2 * HP])
        g = jnp.tanh(gates[:, 2 * HP:3 * HP])
        o = jax.nn.sigmoid(gates[:, 3 * HP:4 * HP])
        c_new = f * c + i * g
        h_new = o * jnp.tanh(c_new)
        return h_new, c_new

    def step(t, carry):
        h1, c1, h2, c2 = carry
        # Layer 1: only the HxH recurrence matmul sits on the serial path
        # (input projection + bias precomputed in the wrapper, streamed bf16).
        g1 = xg1_ref[t].astype(jnp.float32) + jnp.dot(
            h1.astype(jnp.bfloat16), whh1, preferred_element_type=jnp.float32)
        h1n, c1n = cell(g1, c1)
        # Layer 2: fused input+recurrence matmul, K=256 fills the MXU.
        hcat = jnp.concatenate([h1n, h2], axis=-1).astype(jnp.bfloat16)
        g2 = jnp.dot(hcat, w2, preferred_element_type=jnp.float32) + b2
        h2n, c2n = cell(g2, c2)
        # Residual add; lane-dense (BP, 128) slab, pipelined writeback per chunk.
        s_ref[t] = h1n + h2n
        return (h1n, c1n, h2n, c2n)

    carry0 = (state_ref[0], state_ref[1], state_ref[2], state_ref[3])
    h1, c1, h2, c2 = lax.fori_loop(0, TC, step, carry0, unroll=min(8, TC))
    state_ref[0] = h1
    state_ref[1] = c1
    state_ref[2] = h2
    state_ref[3] = c2


# ----------------------------- wrapper --------------------------------------
def _pad_gate_cols(mat, H):
    """mat: (rows, 4H) -> (rows, 4*HP); each gate zero-padded to HP lanes."""
    rows = mat.shape[0]
    out = jnp.zeros((rows, 4 * HP), jnp.float32)
    for g in range(4):
        out = out.at[:, g * HP:g * HP + H].set(mat[:, g * H:(g + 1) * H])
    return out


def _pad_hidden_weight(w, H):
    """w: (4H, H) PyTorch layout -> (HP, 4*HP) padded transposed weight."""
    wt = _pad_gate_cols(w.T.astype(jnp.float32), H)          # (H, 4*HP)
    return jnp.pad(wt, ((0, HP - H), (0, 0)))                # (HP, 4*HP)


def lin_lstm_forward(x_btf, params):
    """x_btf: (B, T, 1) float32. Returns (B, T, 1) matching LinLSTMModel."""
    (wih1, whh1, bih1, bhh1,
     wih2, whh2, bih2, bhh2,
     wlin, blin) = params
    B, T, _ = x_btf.shape
    H = HIDDEN

    BP = max(8, ((B + 7) // 8) * 8)          # batch padded to full sublanes
    TC = min(TIME_CHUNK, T)                  # timesteps per grid step
    n_chunks = pl.cdiv(T, TC)
    T_pad = n_chunks * TC

    x_tb = jnp.transpose(x_btf, (1, 0, 2)).astype(jnp.float32)     # (T, B, 1)
    x_tb = jnp.pad(x_tb, ((0, T_pad - T), (0, BP - B), (0, 0)))    # (T_pad, BP, 1)

    # Hoist the K=1 layer-1 input projection + combined bias off the
    # recurrence (one XLA op); store bf16 to halve streamed HBM/VMEM bytes.
    wih1_row = _pad_gate_cols(wih1.T.astype(jnp.float32), H)       # (1, 4*HP)
    b1_row = _pad_gate_cols((bih1 + bhh1).reshape(1, 4 * H), H)    # (1, 4*HP)
    xg1 = (x_tb @ wih1_row + b1_row).astype(jnp.bfloat16)          # (T_pad, BP, 4*HP)

    whh1_p = _pad_hidden_weight(whh1, H).astype(jnp.bfloat16)      # (HP, 4*HP)
    w2_fused = jnp.concatenate(
        [_pad_hidden_weight(wih2, H), _pad_hidden_weight(whh2, H)],
        axis=0).astype(jnp.bfloat16)                               # (2*HP, 4*HP)
    b2_p = _pad_gate_cols((bih2 + bhh2).reshape(1, 4 * H), H)      # (1, 4*HP) f32

    s = pl.pallas_call(
        _lin_lstm_kernel,
        out_shape=jax.ShapeDtypeStruct((T_pad, BP, HP), jnp.float32),
        grid_spec=pltpu.PrefetchScalarGridSpec(
            num_scalar_prefetch=0,
            grid=(n_chunks,),
            in_specs=[
                pl.BlockSpec((TC, BP, 4 * HP), lambda t: (t, 0, 0)),
                pl.BlockSpec((HP, 4 * HP), lambda t: (0, 0)),
                pl.BlockSpec((2 * HP, 4 * HP), lambda t: (0, 0)),
                pl.BlockSpec((1, 4 * HP), lambda t: (0, 0)),
            ],
            out_specs=pl.BlockSpec((TC, BP, HP), lambda t: (t, 0, 0)),
            scratch_shapes=[pltpu.VMEM((4, BP, HP), jnp.float32)],
        ),
        compiler_params=pltpu.CompilerParams(
            # Time chunks carry state in scratch -> must run in order.
            dimension_semantics=("arbitrary",),
            # Explicit budget; total footprint ~7 MiB, safe on v5e/v6e/v7x.
            vmem_limit_bytes=32 * 1024 * 1024,
        ),
    )(xg1, whh1_p, w2_fused, b2_p)

    # Batched final projection: one well-shaped matmul, off the serial path.
    y = s[:T, :B, :H] @ wlin.T.astype(jnp.float32) + blin          # (T, B, 1)
    return jnp.transpose(y, (1, 0, 2))                             # (B, T, 1)


# ---------------- pure-JAX reference (for correctness check) ----------------
def _ref_lstm_layer(x, wih, whh, bih, bhh):
    B, T, _ = x.shape
    H = whh.shape[1]

    def step(carry, x_t):
        h, c = carry
        g = x_t @ wih.T + h @ whh.T + bih + bhh
        i, f, gg, o = jnp.split(g, 4, axis=-1)
        i = jax.nn.sigmoid(i)
        f = jax.nn.sigmoid(f)
        gg = jnp.tanh(gg)
        o = jax.nn.sigmoid(o)
        c = f * c + i * gg
        h = o * jnp.tanh(c)
        return (h, c), h

    init = (jnp.zeros((B, H), jnp.float32), jnp.zeros((B, H), jnp.float32))
    _, ys = jax.lax.scan(step, init, jnp.transpose(x, (1, 0, 2)))
    return jnp.transpose(ys, (1, 0, 2))


def _ref_forward(x, params):
    (wih1, whh1, bih1, bhh1, wih2, whh2, bih2, bhh2, wlin, blin) = params
    h1 = _ref_lstm_layer(x, wih1, whh1, bih1, bhh1)
    h2 = _ref_lstm_layer(h1, wih2, whh2, bih2, bhh2)
    s = h1 + h2
    return s @ wlin.T + blin


def _init_params(key):
    H = HIDDEN
    bound = 1.0 / jnp.sqrt(jnp.float32(H))
    ks = jax.random.split(key, 10)
    u = lambda k, shape: jax.random.uniform(k, shape, jnp.float32, -bound, bound)
    wih1 = u(ks[0], (4 * H, 1))
    whh1 = u(ks[1], (4 * H, H))
    bih1 = u(ks[2], (4 * H,))
    bhh1 = u(ks[3], (4 * H,))
    wih2 = u(ks[4], (4 * H, H))
    whh2 = u(ks[5], (4 * H, H))
    bih2 = u(ks[6], (4 * H,))
    bhh2 = u(ks[7], (4 * H,))
    wlin = u(ks[8], (1, H))
    blin = u(ks[9], (1,))
    return (wih1, whh1, bih1, bhh1, wih2, whh2, bih2, bhh2, wlin, blin)


if __name__ == "__main__":
    key = jax.random.PRNGKey(0)
    kx, kp = jax.random.split(key)
    B, T = 2, 8
    x = jax.random.normal(kx, (B, T, 1), jnp.float32)
    params = _init_params(kp)

    fwd = jax.jit(lin_lstm_forward)
    out = jax.block_until_ready(fwd(x, params))

    ref = _ref_forward(x, params)
    assert out.shape == (B, T, 1)
    # Matmul operands are bf16 on the MXU (per perf review) with f32
    # accumulation / elementwise math; tolerance reflects bf16 recurrence
    # rounding vs the pure-f32 reference (observed error << 1e-3 at T=8).
    max_err = jnp.max(jnp.abs(out - ref))
    assert jnp.allclose(out, ref, atol=5e-3, rtol=5e-3), f"max err {max_err}"
    print("KERNEL_OK")
</pallas_src>

<mosaic_0001>
module attributes {stable_mosaic.version = 11 : i64} {
  func.func @_lin_lstm_kernel(%arg0: i32, %arg1: memref<8x8x512xbf16, #tpu.memory_space<vmem>>, %arg2: memref<128x512xbf16, #tpu.memory_space<vmem>>, %arg3: memref<256x512xbf16, #tpu.memory_space<vmem>>, %arg4: memref<1x512xf32, #tpu.memory_space<vmem>>, %arg5: memref<8x8x128xf32, #tpu.memory_space<vmem>>, %arg6: memref<4x8x128xf32, #tpu.memory_space<vmem>>) attributes {dimension_semantics = [#tpu.dimension_semantics<arbitrary>], iteration_bounds = array<i64: 1>, scalar_prefetch = 0 : i64, scratch_operands = 1 : i64, tpu.core_type = #tpu.core_type<tc>, window_params = [{transform_indices = @transform_0, window_bounds = array<i64: 8, 8, 512>}, {pipeline_mode = #tpu.pipeline_mode<synchronous>, transform_indices = @transform_1, window_bounds = array<i64: 128, 512>}, {pipeline_mode = #tpu.pipeline_mode<synchronous>, transform_indices = @transform_2, window_bounds = array<i64: 256, 512>}, {pipeline_mode = #tpu.pipeline_mode<synchronous>, transform_indices = @transform_3, window_bounds = array<i64: 1, 512>}, {transform_indices = @transform_4, window_bounds = array<i64: 8, 8, 128>}]} {
    %c0_i32 = arith.constant 0 : i32
    %0 = arith.cmpi eq, %arg0, %c0_i32 : i32
    %1 = arith.extui %0 : i1 to i32
    %c0_i32_0 = arith.constant 0 : i32
    %2 = arith.cmpi ne, %1, %c0_i32_0 : i32
    scf.if %2 {
      %cst_123 = arith.constant 0.000000e+00 : f32
      %562 = vector.broadcast %cst_123 : f32 to vector<4x8x128xf32>
      %c0_124 = arith.constant 0 : index
      %c0_125 = arith.constant 0 : index
      %c0_126 = arith.constant 0 : index
      %563 = vector.load %arg6[%c0_124, %c0_125, %c0_126] : memref<4x8x128xf32, #tpu.memory_space<vmem>>, vector<4x8x128xf32>
      tpu.vector_store %arg6[%c0_124, %c0_125, %c0_126], %562 {strides = array<i32>} : memref<4x8x128xf32, #tpu.memory_space<vmem>>, vector<4x8x128xf32>,
    } else {
    }
    %c0 = arith.constant 0 : index
    %c0_1 = arith.constant 0 : index
    %3 = vector.load %arg2[%c0, %c0_1] : memref<128x512xbf16, #tpu.memory_space<vmem>>, vector<128x512xbf16>
    %c0_2 = arith.constant 0 : index
    %c0_3 = arith.constant 0 : index
    %4 = vector.load %arg3[%c0_2, %c0_3] : memref<256x512xbf16, #tpu.memory_space<vmem>>, vector<256x512xbf16>
    %c0_4 = arith.constant 0 : index
    %c0_5 = arith.constant 0 : index
    %5 = vector.load %arg4[%c0_4, %c0_5] : memref<1x512xf32, #tpu.memory_space<vmem>>, vector<1x512xf32>
    %c0_6 = arith.constant 0 : index
    %c0_7 = arith.constant 0 : index
    %c0_8 = arith.constant 0 : index
    %6 = vector.load %arg6[%c0_6, %c0_7, %c0_8] : memref<4x8x128xf32, #tpu.memory_space<vmem>>, vector<1x8x128xf32>
    %7 = vector.shape_cast %6 : vector<1x8x128xf32> to vector<8x128xf32>
    %c1 = arith.constant 1 : index
    %c0_9 = arith.constant 0 : index
    %c0_10 = arith.constant 0 : index
    %8 = vector.load %arg6[%c1, %c0_9, %c0_10] : memref<4x8x128xf32, #tpu.memory_space<vmem>>, vector<1x8x128xf32>
    %9 = vector.shape_cast %8 : vector<1x8x128xf32> to vector<8x128xf32>
    %c2 = arith.constant 2 : index
    %c0_11 = arith.constant 0 : index
    %c0_12 = arith.constant 0 : index
    %10 = vector.load %arg6[%c2, %c0_11, %c0_12] : memref<4x8x128xf32, #tpu.memory_space<vmem>>, vector<1x8x128xf32>
    %11 = vector.shape_cast %10 : vector<1x8x128xf32> to vector<8x128xf32>
    %c3 = arith.constant 3 : index
    %c0_13 = arith.constant 0 : index
    %c0_14 = arith.constant 0 : index
    %12 = vector.load %arg6[%c3, %c0_13, %c0_14] : memref<4x8x128xf32, #tpu.memory_space<vmem>>, vector<1x8x128xf32>
    %13 = vector.shape_cast %12 : vector<1x8x128xf32> to vector<8x128xf32>
    %c0_i32_15 = arith.constant 0 : i32
    %14 = arith.index_cast %c0_i32_15 : i32 to index
    %c0_16 = arith.constant 0 : index
    %c0_17 = arith.constant 0 : index
    %15 = vector.load %arg1[%14, %c0_16, %c0_17] : memref<8x8x512xbf16, #tpu.memory_space<vmem>>, vector<1x8x512xbf16>
    %16 = vector.shape_cast %15 : vector<1x8x512xbf16> to vector<8x512xbf16>
    %17 = arith.extf %16 : vector<8x512xbf16> to vector<8x512xf32>
    %18 = arith.truncf %7 : vector<8x128xf32> to vector<8x128xbf16>
    %cst = arith.constant dense<0.000000e+00> : vector<8x512xf32>
    %19 = tpu.matmul %18, %3, %cst {dimension_numbers = #tpu.dot_dimension_numbers<[1], [0], [0], [1], [0, 0, 1, 1], [], []>} : vector<8x128xbf16>, vector<128x512xbf16>, vector<8x512xf32> -> vector<8x512xf32>
    %20 = arith.addf %17, %19 : vector<8x512xf32>
    %21 = vector.extract_strided_slice %20 {offsets = [0, 0], sizes = [8, 128], strides = [1, 1]} : vector<8x512xf32> to vector<8x128xf32>
    %22 = arith.negf %21 : vector<8x128xf32>
    %23 = math.exp %22 : vector<8x128xf32>
    %cst_18 = arith.constant 1.000000e+00 : f32
    %24 = vector.broadcast %cst_18 : f32 to vector<8x128xf32>
    %25 = arith.addf %24, %23 : vector<8x128xf32>
    %26 = arith.divf %24, %25 : vector<8x128xf32>
    %27 = vector.extract_strided_slice %20 {offsets = [0, 128], sizes = [8, 128], strides = [1, 1]} : vector<8x512xf32> to vector<8x128xf32>
    %28 = arith.negf %27 : vector<8x128xf32>
    %29 = math.exp %28 : vector<8x128xf32>
    %cst_19 = arith.constant 1.000000e+00 : f32
    %30 = vector.broadcast %cst_19 : f32 to vector<8x128xf32>
    %31 = arith.addf %30, %29 : vector<8x128xf32>
    %32 = arith.divf %30, %31 : vector<8x128xf32>
    %33 = vector.extract_strided_slice %20 {offsets = [0, 256], sizes = [8, 128], strides = [1, 1]} : vector<8x512xf32> to vector<8x128xf32>
    %34 = math.tanh %33 : vector<8x128xf32>
    %35 = vector.extract_strided_slice %20 {offsets = [0, 384], sizes = [8, 128], strides = [1, 1]} : vector<8x512xf32> to vector<8x128xf32>
    %36 = arith.negf %35 : vector<8x128xf32>
    %37 = math.exp %36 : vector<8x128xf32>
    %cst_20 = arith.constant 1.000000e+00 : f32
    %38 = vector.broadcast %cst_20 : f32 to vector<8x128xf32>
    %39 = arith.addf %38, %37 : vector<8x128xf32>
    %40 = arith.divf %38, %39 : vector<8x128xf32>
    %41 = arith.mulf %32, %9 : vector<8x128xf32>
    %42 = arith.mulf %26, %34 : vector<8x128xf32>
    %43 = arith.addf %41, %42 : vector<8x128xf32>
    %44 = math.tanh %43 : vector<8x128xf32>
    %45 = arith.mulf %40, %44 : vector<8x128xf32>
    %46 = tpu.concatenate %45, %11 in 1 : vector<8x128xf32>, vector<8x128xf32> -> vector<8x256xf32>
    %47 = arith.truncf %46 : vector<8x256xf32> to vector<8x256xbf16>
    %cst_21 = arith.constant dense<0.000000e+00> : vector<8x512xf32>
    %48 = tpu.matmul %47, %4, %cst_21 {dimension_numbers = #tpu.dot_dimension_numbers<[1], [0], [0], [1], [0, 0, 1, 1], [], []>} : vector<8x256xbf16>, vector<256x512xbf16>, vector<8x512xf32> -> vector<8x512xf32>
    %49 = vector.broadcast %5 : vector<1x512xf32> to vector<8x512xf32>
    %50 = arith.addf %48, %49 : vector<8x512xf32>
    %51 = vector.extract_strided_slice %50 {offsets = [0, 0], sizes = [8, 128], strides = [1, 1]} : vector<8x512xf32> to vector<8x128xf32>
    %52 = arith.negf %51 : vector<8x128xf32>
    %53 = math.exp %52 : vector<8x128xf32>
    %cst_22 = arith.constant 1.000000e+00 : f32
    %54 = vector.broadcast %cst_22 : f32 to vector<8x128xf32>
    %55 = arith.addf %54, %53 : vector<8x128xf32>
    %56 = arith.divf %54, %55 : vector<8x128xf32>
    %57 = vector.extract_strided_slice %50 {offsets = [0, 128], sizes = [8, 128], strides = [1, 1]} : vector<8x512xf32> to vector<8x128xf32>
    %58 = arith.negf %57 : vector<8x128xf32>
    %59 = math.exp %58 : vector<8x128xf32>
    %cst_23 = arith.constant 1.000000e+00 : f32
    %60 = vector.broadcast %cst_23 : f32 to vector<8x128xf32>
    %61 = arith.addf %60, %59 : vector<8x128xf32>
    %62 = arith.divf %60, %61 : vector<8x128xf32>
    %63 = vector.extract_strided_slice %50 {offsets = [0, 256], sizes = [8, 128], strides = [1, 1]} : vector<8x512xf32> to vector<8x128xf32>
    %64 = math.tanh %63 : vector<8x128xf32>
    %65 = vector.extract_strided_slice %50 {offsets = [0, 384], sizes = [8, 128], strides = [1, 1]} : vector<8x512xf32> to vector<8x128xf32>
    %66 = arith.negf %65 : vector<8x128xf32>
    %67 = math.exp %66 : vector<8x128xf32>
    %cst_24 = arith.constant 1.000000e+00 : f32
    %68 = vector.broadcast %cst_24 : f32 to vector<8x128xf32>
    %69 = arith.addf %68, %67 : vector<8x128xf32>
    %70 = arith.divf %68, %69 : vector<8x128xf32>
    %71 = arith.mulf %62, %13 : vector<8x128xf32>
    %72 = arith.mulf %56, %64 : vector<8x128xf32>
    %73 = arith.addf %71, %72 : vector<8x128xf32>
    %74 = math.tanh %73 : vector<8x128xf32>
    %75 = arith.mulf %70, %74 : vector<8x128xf32>
    %76 = arith.addf %45, %75 : vector<8x128xf32>
    %77 = arith.index_cast %c0_i32_15 : i32 to index
    %c0_25 = arith.constant 0 : index
    %c0_26 = arith.constant 0 : index
    %78 = vector.load %arg5[%77, %c0_25, %c0_26] : memref<8x8x128xf32, #tpu.memory_space<vmem>>, vector<1x8x128xf32>
    %79 = vector.shape_cast %78 : vector<1x8x128xf32> to vector<8x128xf32>
    %80 = vector.shape_cast %76 : vector<8x128xf32> to vector<1x8x128xf32>
    tpu.vector_store %arg5[%77, %c0_25, %c0_26], %80 {strides = array<i32>} : memref<8x8x128xf32, #tpu.memory_space<vmem>>, vector<1x8x128xf32>,
    %c1_i32 = arith.constant 1 : i32
    %81 = arith.index_cast %c1_i32 : i32 to index
    %c0_27 = arith.constant 0 : index
    %c0_28 = arith.constant 0 : index
    %82 = vector.load %arg1[%81, %c0_27, %c0_28] : memref<8x8x512xbf16, #tpu.memory_space<vmem>>, vector<1x8x512xbf16>
    %83 = vector.shape_cast %82 : vector<1x8x512xbf16> to vector<8x512xbf16>
    %84 = arith.extf %83 : vector<8x512xbf16> to vector<8x512xf32>
    %85 = arith.truncf %45 : vector<8x128xf32> to vector<8x128xbf16>
    %cst_29 = arith.constant dense<0.000000e+00> : vector<8x512xf32>
    %86 = tpu.matmul %85, %3, %cst_29 {dimension_numbers = #tpu.dot_dimension_numbers<[1], [0], [0], [1], [0, 0, 1, 1], [], []>} : vector<8x128xbf16>, vector<128x512xbf16>, vector<8x512xf32> -> vector<8x512xf32>
    %87 = arith.addf %84, %86 : vector<8x512xf32>
    %88 = vector.extract_strided_slice %87 {offsets = [0, 0], sizes = [8, 128], strides = [1, 1]} : vector<8x512xf32> to vector<8x128xf32>
    %89 = arith.negf %88 : vector<8x128xf32>
    %90 = math.exp %89 : vector<8x128xf32>
    %cst_30 = arith.constant 1.000000e+00 : f32
    %91 = vector.broadcast %cst_30 : f32 to vector<8x128xf32>
    %92 = arith.addf %91, %90 : vector<8x128xf32>
    %93 = arith.divf %91, %92 : vector<8x128xf32>
    %94 = vector.extract_strided_slice %87 {offsets = [0, 128], sizes = [8, 128], strides = [1, 1]} : vector<8x512xf32> to vector<8x128xf32>
    %95 = arith.negf %94 : vector<8x128xf32>
    %96 = math.exp %95 : vector<8x128xf32>
    %cst_31 = arith.constant 1.000000e+00 : f32
    %97 = vector.broadcast %cst_31 : f32 to vector<8x128xf32>
    %98 = arith.addf %97, %96 : vector<8x128xf32>
    %99 = arith.divf %97, %98 : vector<8x128xf32>
    %100 = vector.extract_strided_slice %87 {offsets = [0, 256], sizes = [8, 128], strides = [1, 1]} : vector<8x512xf32> to vector<8x128xf32>
    %101 = math.tanh %100 : vector<8x128xf32>
    %102 = vector.extract_strided_slice %87 {offsets = [0, 384], sizes = [8, 128], strides = [1, 1]} : vector<8x512xf32> to vector<8x128xf32>
    %103 = arith.negf %102 : vector<8x128xf32>
    %104 = math.exp %103 : vector<8x128xf32>
    %cst_32 = arith.constant 1.000000e+00 : f32
    %105 = vector.broadcast %cst_32 : f32 to vector<8x128xf32>
    %106 = arith.addf %105, %104 : vector<8x128xf32>
    %107 = arith.divf %105, %106 : vector<8x128xf32>
    %108 = arith.mulf %99, %43 : vector<8x128xf32>
    %109 = arith.mulf %93, %101 : vector<8x128xf32>
    %110 = arith.addf %108, %109 : vector<8x128xf32>
    %111 = math.tanh %110 : vector<8x128xf32>
    %112 = arith.mulf %107, %111 : vector<8x128xf32>
    %113 = tpu.concatenate %112, %75 in 1 : vector<8x128xf32>, vector<8x128xf32> -> vector<8x256xf32>
    %114 = arith.truncf %113 : vector<8x256xf32> to vector<8x256xbf16>
    %cst_33 = arith.constant dense<0.000000e+00> : vector<8x512xf32>
    %115 = tpu.matmul %114, %4, %cst_33 {dimension_numbers = #tpu.dot_dimension_numbers<[1], [0], [0], [1], [0, 0, 1, 1], [], []>} : vector<8x256xbf16>, vector<256x512xbf16>, vector<8x512xf32> -> vector<8x512xf32>
    %116 = vector.broadcast %5 : vector<1x512xf32> to vector<8x512xf32>
    %117 = arith.addf %115, %116 : vector<8x512xf32>
    %118 = vector.extract_strided_slice %117 {offsets = [0, 0], sizes = [8, 128], strides = [1, 1]} : vector<8x512xf32> to vector<8x128xf32>
    %119 = arith.negf %118 : vector<8x128xf32>
    %120 = math.exp %119 : vector<8x128xf32>
    %cst_34 = arith.constant 1.000000e+00 : f32
    %121 = vector.broadcast %cst_34 : f32 to vector<8x128xf32>
    %122 = arith.addf %121, %120 : vector<8x128xf32>
    %123 = arith.divf %121, %122 : vector<8x128xf32>
    %124 = vector.extract_strided_slice %117 {offsets = [0, 128], sizes = [8, 128], strides = [1, 1]} : vector<8x512xf32> to vector<8x128xf32>
    %125 = arith.negf %124 : vector<8x128xf32>
    %126 = math.exp %125 : vector<8x128xf32>
    %cst_35 = arith.constant 1.000000e+00 : f32
    %127 = vector.broadcast %cst_35 : f32 to vector<8x128xf32>
    %128 = arith.addf %127, %126 : vector<8x128xf32>
    %129 = arith.divf %127, %128 : vector<8x128xf32>
    %130 = vector.extract_strided_slice %117 {offsets = [0, 256], sizes = [8, 128], strides = [1, 1]} : vector<8x512xf32> to vector<8x128xf32>
    %131 = math.tanh %130 : vector<8x128xf32>
    %132 = vector.extract_strided_slice %117 {offsets = [0, 384], sizes = [8, 128], strides = [1, 1]} : vector<8x512xf32> to vector<8x128xf32>
    %133 = arith.negf %132 : vector<8x128xf32>
    %134 = math.exp %133 : vector<8x128xf32>
    %cst_36 = arith.constant 1.000000e+00 : f32
    %135 = vector.broadcast %cst_36 : f32 to vector<8x128xf32>
    %136 = arith.addf %135, %134 : vector<8x128xf32>
    %137 = arith.divf %135, %136 : vector<8x128xf32>
    %138 = arith.mulf %129, %73 : vector<8x128xf32>
    %139 = arith.mulf %123, %131 : vector<8x128xf32>
    %140 = arith.addf %138, %139 : vector<8x128xf32>
    %141 = math.tanh %140 : vector<8x128xf32>
    %142 = arith.mulf %137, %141 : vector<8x128xf32>
    %143 = arith.addf %112, %142 : vector<8x128xf32>
    %144 = arith.index_cast %c1_i32 : i32 to index
    %c0_37 = arith.constant 0 : index
    %c0_38 = arith.constant 0 : index
    %145 = vector.load %arg5[%144, %c0_37, %c0_38] : memref<8x8x128xf32, #tpu.memory_space<vmem>>, vector<1x8x128xf32>
    %146 = vector.shape_cast %145 : vector<1x8x128xf32> to vector<8x128xf32>
    %147 = vector.shape_cast %143 : vector<8x128xf32> to vector<1x8x128xf32>
    tpu.vector_store %arg5[%144, %c0_37, %c0_38], %147 {strides = array<i32>} : memref<8x8x128xf32, #tpu.memory_space<vmem>>, vector<1x8x128xf32>,
    %c2_i32 = arith.constant 2 : i32
    %148 = arith.index_cast %c2_i32 : i32 to index
    %c0_39 = arith.constant 0 : index
    %c0_40 = arith.constant 0 : index
    %149 = vector.load %arg1[%148, %c0_39, %c0_40] : memref<8x8x512xbf16, #tpu.memory_space<vmem>>, vector<1x8x512xbf16>
    %150 = vector.shape_cast %149 : vector<1x8x512xbf16> to vector<8x512xbf16>
    %151 = arith.extf %150 : vector<8x512xbf16> to vector<8x512xf32>
    %152 = arith.truncf %112 : vector<8x128xf32> to vector<8x128xbf16>
    %cst_41 = arith.constant dense<0.000000e+00> : vector<8x512xf32>
    %153 = tpu.matmul %152, %3, %cst_41 {dimension_numbers = #tpu.dot_dimension_numbers<[1], [0], [0], [1], [0, 0, 1, 1], [], []>} : vector<8x128xbf16>, vector<128x512xbf16>, vector<8x512xf32> -> vector<8x512xf32>
    %154 = arith.addf %151, %153 : vector<8x512xf32>
    %155 = vector.extract_strided_slice %154 {offsets = [0, 0], sizes = [8, 128], strides = [1, 1]} : vector<8x512xf32> to vector<8x128xf32>
    %156 = arith.negf %155 : vector<8x128xf32>
    %157 = math.exp %156 : vector<8x128xf32>
    %cst_42 = arith.constant 1.000000e+00 : f32
    %158 = vector.broadcast %cst_42 : f32 to vector<8x128xf32>
    %159 = arith.addf %158, %157 : vector<8x128xf32>
    %160 = arith.divf %158, %159 : vector<8x128xf32>
    %161 = vector.extract_strided_slice %154 {offsets = [0, 128], sizes = [8, 128], strides = [1, 1]} : vector<8x512xf32> to vector<8x128xf32>
    %162 = arith.negf %161 : vector<8x128xf32>
    %163 = math.exp %162 : vector<8x128xf32>
    %cst_43 = arith.constant 1.000000e+00 : f32
    %164 = vector.broadcast %cst_43 : f32 to vector<8x128xf32>
    %165 = arith.addf %164, %163 : vector<8x128xf32>
    %166 = arith.divf %164, %165 : vector<8x128xf32>
    %167 = vector.extract_strided_slice %154 {offsets = [0, 256], sizes = [8, 128], strides = [1, 1]} : vector<8x512xf32> to vector<8x128xf32>
    %168 = math.tanh %167 : vector<8x128xf32>
    %169 = vector.extract_strided_slice %154 {offsets = [0, 384], sizes = [8, 128], strides = [1, 1]} : vector<8x512xf32> to vector<8x128xf32>
    %170 = arith.negf %169 : vector<8x128xf32>
    %171 = math.exp %170 : vector<8x128xf32>
    %cst_44 = arith.constant 1.000000e+00 : f32
    %172 = vector.broadcast %cst_44 : f32 to vector<8x128xf32>
    %173 = arith.addf %172, %171 : vector<8x128xf32>
    %174 = arith.divf %172, %173 : vector<8x128xf32>
    %175 = arith.mulf %166, %110 : vector<8x128xf32>
    %176 = arith.mulf %160, %168 : vector<8x128xf32>
    %177 = arith.addf %175, %176 : vector<8x128xf32>
    %178 = math.tanh %177 : vector<8x128xf32>
    %179 = arith.mulf %174, %178 : vector<8x128xf32>
    %180 = tpu.concatenate %179, %142 in 1 : vector<8x128xf32>, vector<8x128xf32> -> vector<8x256xf32>
    %181 = arith.truncf %180 : vector<8x256xf32> to vector<8x256xbf16>
    %cst_45 = arith.constant dense<0.000000e+00> : vector<8x512xf32>
    %182 = tpu.matmul %181, %4, %cst_45 {dimension_numbers = #tpu.dot_dimension_numbers<[1], [0], [0], [1], [0, 0, 1, 1], [], []>} : vector<8x256xbf16>, vector<256x512xbf16>, vector<8x512xf32> -> vector<8x512xf32>
    %183 = vector.broadcast %5 : vector<1x512xf32> to vector<8x512xf32>
    %184 = arith.addf %182, %183 : vector<8x512xf32>
    %185 = vector.extract_strided_slice %184 {offsets = [0, 0], sizes = [8, 128], strides = [1, 1]} : vector<8x512xf32> to vector<8x128xf32>
    %186 = arith.negf %185 : vector<8x128xf32>
    %187 = math.exp %186 : vector<8x128xf32>
    %cst_46 = arith.constant 1.000000e+00 : f32
    %188 = vector.broadcast %cst_46 : f32 to vector<8x128xf32>
    %189 = arith.addf %188, %187 : vector<8x128xf32>
    %190 = arith.divf %188, %189 : vector<8x128xf32>
    %191 = vector.extract_strided_slice %184 {offsets = [0, 128], sizes = [8, 128], strides = [1, 1]} : vector<8x512xf32> to vector<8x128xf32>
    %192 = arith.negf %191 : vector<8x128xf32>
    %193 = math.exp %192 : vector<8x128xf32>
    %cst_47 = arith.constant 1.000000e+00 : f32
    %194 = vector.broadcast %cst_47 : f32 to vector<8x128xf32>
    %195 = arith.addf %194, %193 : vector<8x128xf32>
    %196 = arith.divf %194, %195 : vector<8x128xf32>
    %197 = vector.extract_strided_slice %184 {offsets = [0, 256], sizes = [8, 128], strides = [1, 1]} : vector<8x512xf32> to vector<8x128xf32>
    %198 = math.tanh %197 : vector<8x128xf32>
    %199 = vector.extract_strided_slice %184 {offsets = [0, 384], sizes = [8, 128], strides = [1, 1]} : vector<8x512xf32> to vector<8x128xf32>
    %200 = arith.negf %199 : vector<8x128xf32>
    %201 = math.exp %200 : vector<8x128xf32>
    %cst_48 = arith.constant 1.000000e+00 : f32
    %202 = vector.broadcast %cst_48 : f32 to vector<8x128xf32>
    %203 = arith.addf %202, %201 : vector<8x128xf32>
    %204 = arith.divf %202, %203 : vector<8x128xf32>
    %205 = arith.mulf %196, %140 : vector<8x128xf32>
    %206 = arith.mulf %190, %198 : vector<8x128xf32>
    %207 = arith.addf %205, %206 : vector<8x128xf32>
    %208 = math.tanh %207 : vector<8x128xf32>
    %209 = arith.mulf %204, %208 : vector<8x128xf32>
    %210 = arith.addf %179, %209 : vector<8x128xf32>
    %211 = arith.index_cast %c2_i32 : i32 to index
    %c0_49 = arith.constant 0 : index
    %c0_50 = arith.constant 0 : index
    %212 = vector.load %arg5[%211, %c0_49, %c0_50] : memref<8x8x128xf32, #tpu.memory_space<vmem>>, vector<1x8x128xf32>
    %213 = vector.shape_cast %212 : vector<1x8x128xf32> to vector<8x128xf32>
    %214 = vector.shape_cast %210 : vector<8x128xf32> to vector<1x8x128xf32>
    tpu.vector_store %arg5[%211, %c0_49, %c0_50], %214 {strides = array<i32>} : memref<8x8x128xf32, #tpu.memory_space<vmem>>, vector<1x8x128xf32>,
    %c3_i32 = arith.constant 3 : i32
    %215 = arith.index_cast %c3_i32 : i32 to index
    %c0_51 = arith.constant 0 : index
    %c0_52 = arith.constant 0 : index
    %216 = vector.load %arg1[%215, %c0_51, %c0_52] : memref<8x8x512xbf16, #tpu.memory_space<vmem>>, vector<1x8x512xbf16>
    %217 = vector.shape_cast %216 : vector<1x8x512xbf16> to vector<8x512xbf16>
    %218 = arith.extf %217 : vector<8x512xbf16> to vector<8x512xf32>
    %219 = arith.truncf %179 : vector<8x128xf32> to vector<8x128xbf16>
    %cst_53 = arith.constant dense<0.000000e+00> : vector<8x512xf32>
    %220 = tpu.matmul %219, %3, %cst_53 {dimension_numbers = #tpu.dot_dimension_numbers<[1], [0], [0], [1], [0, 0, 1, 1], [], []>} : vector<8x128xbf16>, vector<128x512xbf16>, vector<8x512xf32> -> vector<8x512xf32>
    %221 = arith.addf %218, %220 : vector<8x512xf32>
    %222 = vector.extract_strided_slice %221 {offsets = [0, 0], sizes = [8, 128], strides = [1, 1]} : vector<8x512xf32> to vector<8x128xf32>
    %223 = arith.negf %222 : vector<8x128xf32>
    %224 = math.exp %223 : vector<8x128xf32>
    %cst_54 = arith.constant 1.000000e+00 : f32
    %225 = vector.broadcast %cst_54 : f32 to vector<8x128xf32>
    %226 = arith.addf %225, %224 : vector<8x128xf32>
    %227 = arith.divf %225, %226 : vector<8x128xf32>
    %228 = vector.extract_strided_slice %221 {offsets = [0, 128], sizes = [8, 128], strides = [1, 1]} : vector<8x512xf32> to vector<8x128xf32>
    %229 = arith.negf %228 : vector<8x128xf32>
    %230 = math.exp %229 : vector<8x128xf32>
    %cst_55 = arith.constant 1.000000e+00 : f32
    %231 = vector.broadcast %cst_55 : f32 to vector<8x128xf32>
    %232 = arith.addf %231, %230 : vector<8x128xf32>
    %233 = arith.divf %231, %232 : vector<8x128xf32>
    %234 = vector.extract_strided_slice %221 {offsets = [0, 256], sizes = [8, 128], strides = [1, 1]} : vector<8x512xf32> to vector<8x128xf32>
    %235 = math.tanh %234 : vector<8x128xf32>
    %236 = vector.extract_strided_slice %221 {offsets = [0, 384], sizes = [8, 128], strides = [1, 1]} : vector<8x512xf32> to vector<8x128xf32>
    %237 = arith.negf %236 : vector<8x128xf32>
    %238 = math.exp %237 : vector<8x128xf32>
    %cst_56 = arith.constant 1.000000e+00 : f32
    %239 = vector.broadcast %cst_56 : f32 to vector<8x128xf32>
    %240 = arith.addf %239, %238 : vector<8x128xf32>
    %241 = arith.divf %239, %240 : vector<8x128xf32>
    %242 = arith.mulf %233, %177 : vector<8x128xf32>
    %243 = arith.mulf %227, %235 : vector<8x128xf32>
    %244 = arith.addf %242, %243 : vector<8x128xf32>
    %245 = math.tanh %244 : vector<8x128xf32>
    %246 = arith.mulf %241, %245 : vector<8x128xf32>
    %247 = tpu.concatenate %246, %209 in 1 : vector<8x128xf32>, vector<8x128xf32> -> vector<8x256xf32>
    %248 = arith.truncf %247 : vector<8x256xf32> to vector<8x256xbf16>
    %cst_57 = arith.constant dense<0.000000e+00> : vector<8x512xf32>
    %249 = tpu.matmul %248, %4, %cst_57 {dimension_numbers = #tpu.dot_dimension_numbers<[1], [0], [0], [1], [0, 0, 1, 1], [], []>} : vector<8x256xbf16>, vector<256x512xbf16>, vector<8x512xf32> -> vector<8x512xf32>
    %250 = vector.broadcast %5 : vector<1x512xf32> to vector<8x512xf32>
    %251 = arith.addf %249, %250 : vector<8x512xf32>
    %252 = vector.extract_strided_slice %251 {offsets = [0, 0], sizes = [8, 128], strides = [1, 1]} : vector<8x512xf32> to vector<8x128xf32>
    %253 = arith.negf %252 : vector<8x128xf32>
    %254 = math.exp %253 : vector<8x128xf32>
    %cst_58 = arith.constant 1.000000e+00 : f32
    %255 = vector.broadcast %cst_58 : f32 to vector<8x128xf32>
    %256 = arith.addf %255, %254 : vector<8x128xf32>
    %257 = arith.divf %255, %256 : vector<8x128xf32>
    %258 = vector.extract_strided_slice %251 {offsets = [0, 128], sizes = [8, 128], strides = [1, 1]} : vector<8x512xf32> to vector<8x128xf32>
    %259 = arith.negf %258 : vector<8x128xf32>
    %260 = math.exp %259 : vector<8x128xf32>
    %cst_59 = arith.constant 1.000000e+00 : f32
    %261 = vector.broadcast %cst_59 : f32 to vector<8x128xf32>
    %262 = arith.addf %261, %260 : vector<8x128xf32>
    %263 = arith.divf %261, %262 : vector<8x128xf32>
    %264 = vector.extract_strided_slice %251 {offsets = [0, 256], sizes = [8, 128], strides = [1, 1]} : vector<8x512xf32> to vector<8x128xf32>
    %265 = math.tanh %264 : vector<8x128xf32>
    %266 = vector.extract_strided_slice %251 {offsets = [0, 384], sizes = [8, 128], strides = [1, 1]} : vector<8x512xf32> to vector<8x128xf32>
    %267 = arith.negf %266 : vector<8x128xf32>
    %268 = math.exp %267 : vector<8x128xf32>
    %cst_60 = arith.constant 1.000000e+00 : f32
    %269 = vector.broadcast %cst_60 : f32 to vector<8x128xf32>
    %270 = arith.addf %269, %268 : vector<8x128xf32>
    %271 = arith.divf %269, %270 : vector<8x128xf32>
    %272 = arith.mulf %263, %207 : vector<8x128xf32>
    %273 = arith.mulf %257, %265 : vector<8x128xf32>
    %274 = arith.addf %272, %273 : vector<8x128xf32>
    %275 = math.tanh %274 : vector<8x128xf32>
    %276 = arith.mulf %271, %275 : vector<8x128xf32>
    %277 = arith.addf %246, %276 : vector<8x128xf32>
    %278 = arith.index_cast %c3_i32 : i32 to index
    %c0_61 = arith.constant 0 : index
    %c0_62 = arith.constant 0 : index
    %279 = vector.load %arg5[%278, %c0_61, %c0_62] : memref<8x8x128xf32, #tpu.memory_space<vmem>>, vector<1x8x128xf32>
    %280 = vector.shape_cast %279 : vector<1x8x128xf32> to vector<8x128xf32>
    %281 = vector.shape_cast %277 : vector<8x128xf32> to vector<1x8x128xf32>
    tpu.vector_store %arg5[%278, %c0_61, %c0_62], %281 {strides = array<i32>} : memref<8x8x128xf32, #tpu.memory_space<vmem>>, vector<1x8x128xf32>,
    %c4_i32 = arith.constant 4 : i32
    %282 = arith.index_cast %c4_i32 : i32 to index
    %c0_63 = arith.constant 0 : index
    %c0_64 = arith.constant 0 : index
    %283 = vector.load %arg1[%282, %c0_63, %c0_64] : memref<8x8x512xbf16, #tpu.memory_space<vmem>>, vector<1x8x512xbf16>
    %284 = vector.shape_cast %283 : vector<1x8x512xbf16> to vector<8x512xbf16>
    %285 = arith.extf %284 : vector<8x512xbf16> to vector<8x512xf32>
    %286 = arith.truncf %246 : vector<8x128xf32> to vector<8x128xbf16>
    %cst_65 = arith.constant dense<0.000000e+00> : vector<8x512xf32>
    %287 = tpu.matmul %286, %3, %cst_65 {dimension_numbers = #tpu.dot_dimension_numbers<[1], [0], [0], [1], [0, 0, 1, 1], [], []>} : vector<8x128xbf16>, vector<128x512xbf16>, vector<8x512xf32> -> vector<8x512xf32>
    %288 = arith.addf %285, %287 : vector<8x512xf32>
    %289 = vector.extract_strided_slice %288 {offsets = [0, 0], sizes = [8, 128], strides = [1, 1]} : vector<8x512xf32> to vector<8x128xf32>
    %290 = arith.negf %289 : vector<8x128xf32>
    %291 = math.exp %290 : vector<8x128xf32>
    %cst_66 = arith.constant 1.000000e+00 : f32
    %292 = vector.broadcast %cst_66 : f32 to vector<8x128xf32>
    %293 = arith.addf %292, %291 : vector<8x128xf32>
    %294 = arith.divf %292, %293 : vector<8x128xf32>
    %295 = vector.extract_strided_slice %288 {offsets = [0, 128], sizes = [8, 128], strides = [1, 1]} : vector<8x512xf32> to vector<8x128xf32>
    %296 = arith.negf %295 : vector<8x128xf32>
    %297 = math.exp %296 : vector<8x128xf32>
    %cst_67 = arith.constant 1.000000e+00 : f32
    %298 = vector.broadcast %cst_67 : f32 to vector<8x128xf32>
    %299 = arith.addf %298, %297 : vector<8x128xf32>
    %300 = arith.divf %298, %299 : vector<8x128xf32>
    %301 = vector.extract_strided_slice %288 {offsets = [0, 256], sizes = [8, 128], strides = [1, 1]} : vector<8x512xf32> to vector<8x128xf32>
    %302 = math.tanh %301 : vector<8x128xf32>
    %303 = vector.extract_strided_slice %288 {offsets = [0, 384], sizes = [8, 128], strides = [1, 1]} : vector<8x512xf32> to vector<8x128xf32>
    %304 = arith.negf %303 : vector<8x128xf32>
    %305 = math.exp %304 : vector<8x128xf32>
    %cst_68 = arith.constant 1.000000e+00 : f32
    %306 = vector.broadcast %cst_68 : f32 to vector<8x128xf32>
    %307 = arith.addf %306, %305 : vector<8x128xf32>
    %308 = arith.divf %306, %307 : vector<8x128xf32>
    %309 = arith.mulf %300, %244 : vector<8x128xf32>
    %310 = arith.mulf %294, %302 : vector<8x128xf32>
    %311 = arith.addf %309, %310 : vector<8x128xf32>
    %312 = math.tanh %311 : vector<8x128xf32>
    %313 = arith.mulf %308, %312 : vector<8x128xf32>
    %314 = tpu.concatenate %313, %276 in 1 : vector<8x128xf32>, vector<8x128xf32> -> vector<8x256xf32>
    %315 = arith.truncf %314 : vector<8x256xf32> to vector<8x256xbf16>
    %cst_69 = arith.constant dense<0.000000e+00> : vector<8x512xf32>
    %316 = tpu.matmul %315, %4, %cst_69 {dimension_numbers = #tpu.dot_dimension_numbers<[1], [0], [0], [1], [0, 0, 1, 1], [], []>} : vector<8x256xbf16>, vector<256x512xbf16>, vector<8x512xf32> -> vector<8x512xf32>
    %317 = vector.broadcast %5 : vector<1x512xf32> to vector<8x512xf32>
    %318 = arith.addf %316, %317 : vector<8x512xf32>
    %319 = vector.extract_strided_slice %318 {offsets = [0, 0], sizes = [8, 128], strides = [1, 1]} : vector<8x512xf32> to vector<8x128xf32>
    %320 = arith.negf %319 : vector<8x128xf32>
    %321 = math.exp %320 : vector<8x128xf32>
    %cst_70 = arith.constant 1.000000e+00 : f32
    %322 = vector.broadcast %cst_70 : f32 to vector<8x128xf32>
    %323 = arith.addf %322, %321 : vector<8x128xf32>
    %324 = arith.divf %322, %323 : vector<8x128xf32>
    %325 = vector.extract_strided_slice %318 {offsets = [0, 128], sizes = [8, 128], strides = [1, 1]} : vector<8x512xf32> to vector<8x128xf32>
    %326 = arith.negf %325 : vector<8x128xf32>
    %327 = math.exp %326 : vector<8x128xf32>
    %cst_71 = arith.constant 1.000000e+00 : f32
    %328 = vector.broadcast %cst_71 : f32 to vector<8x128xf32>
    %329 = arith.addf %328, %327 : vector<8x128xf32>
    %330 = arith.divf %328, %329 : vector<8x128xf32>
    %331 = vector.extract_strided_slice %318 {offsets = [0, 256], sizes = [8, 128], strides = [1, 1]} : vector<8x512xf32> to vector<8x128xf32>
    %332 = math.tanh %331 : vector<8x128xf32>
    %333 = vector.extract_strided_slice %318 {offsets = [0, 384], sizes = [8, 128], strides = [1, 1]} : vector<8x512xf32> to vector<8x128xf32>
    %334 = arith.negf %333 : vector<8x128xf32>
    %335 = math.exp %334 : vector<8x128xf32>
    %cst_72 = arith.constant 1.000000e+00 : f32
    %336 = vector.broadcast %cst_72 : f32 to vector<8x128xf32>
    %337 = arith.addf %336, %335 : vector<8x128xf32>
    %338 = arith.divf %336, %337 : vector<8x128xf32>
    %339 = arith.mulf %330, %274 : vector<8x128xf32>
    %340 = arith.mulf %324, %332 : vector<8x128xf32>
    %341 = arith.addf %339, %340 : vector<8x128xf32>
    %342 = math.tanh %341 : vector<8x128xf32>
    %343 = arith.mulf %338, %342 : vector<8x128xf32>
    %344 = arith.addf %313, %343 : vector<8x128xf32>
    %345 = arith.index_cast %c4_i32 : i32 to index
    %c0_73 = arith.constant 0 : index
    %c0_74 = arith.constant 0 : index
    %346 = vector.load %arg5[%345, %c0_73, %c0_74] : memref<8x8x128xf32, #tpu.memory_space<vmem>>, vector<1x8x128xf32>
    %347 = vector.shape_cast %346 : vector<1x8x128xf32> to vector<8x128xf32>
    %348 = vector.shape_cast %344 : vector<8x128xf32> to vector<1x8x128xf32>
    tpu.vector_store %arg5[%345, %c0_73, %c0_74], %348 {strides = array<i32>} : memref<8x8x128xf32, #tpu.memory_space<vmem>>, vector<1x8x128xf32>,
    %c5_i32 = arith.constant 5 : i32
    %349 = arith.index_cast %c5_i32 : i32 to index
    %c0_75 = arith.constant 0 : index
    %c0_76 = arith.constant 0 : index
    %350 = vector.load %arg1[%349, %c0_75, %c0_76] : memref<8x8x512xbf16, #tpu.memory_space<vmem>>, vector<1x8x512xbf16>
    %351 = vector.shape_cast %350 : vector<1x8x512xbf16> to vector<8x512xbf16>
    %352 = arith.extf %351 : vector<8x512xbf16> to vector<8x512xf32>
    %353 = arith.truncf %313 : vector<8x128xf32> to vector<8x128xbf16>
    %cst_77 = arith.constant dense<0.000000e+00> : vector<8x512xf32>
    %354 = tpu.matmul %353, %3, %cst_77 {dimension_numbers = #tpu.dot_dimension_numbers<[1], [0], [0], [1], [0, 0, 1, 1], [], []>} : vector<8x128xbf16>, vector<128x512xbf16>, vector<8x512xf32> -> vector<8x512xf32>
    %355 = arith.addf %352, %354 : vector<8x512xf32>
    %356 = vector.extract_strided_slice %355 {offsets = [0, 0], sizes = [8, 128], strides = [1, 1]} : vector<8x512xf32> to vector<8x128xf32>
    %357 = arith.negf %356 : vector<8x128xf32>
    %358 = math.exp %357 : vector<8x128xf32>
    %cst_78 = arith.constant 1.000000e+00 : f32
    %359 = vector.broadcast %cst_78 : f32 to vector<8x128xf32>
    %360 = arith.addf %359, %358 : vector<8x128xf32>
    %361 = arith.divf %359, %360 : vector<8x128xf32>
    %362 = vector.extract_strided_slice %355 {offsets = [0, 128], sizes = [8, 128], strides = [1, 1]} : vector<8x512xf32> to vector<8x128xf32>
    %363 = arith.negf %362 : vector<8x128xf32>
    %364 = math.exp %363 : vector<8x128xf32>
    %cst_79 = arith.constant 1.000000e+00 : f32
    %365 = vector.broadcast %cst_79 : f32 to vector<8x128xf32>
    %366 = arith.addf %365, %364 : vector<8x128xf32>
    %367 = arith.divf %365, %366 : vector<8x128xf32>
    %368 = vector.extract_strided_slice %355 {offsets = [0, 256], sizes = [8, 128], strides = [1, 1]} : vector<8x512xf32> to vector<8x128xf32>
    %369 = math.tanh %368 : vector<8x128xf32>
    %370 = vector.extract_strided_slice %355 {offsets = [0, 384], sizes = [8, 128], strides = [1, 1]} : vector<8x512xf32> to vector<8x128xf32>
    %371 = arith.negf %370 : vector<8x128xf32>
    %372 = math.exp %371 : vector<8x128xf32>
    %cst_80 = arith.constant 1.000000e+00 : f32
    %373 = vector.broadcast %cst_80 : f32 to vector<8x128xf32>
    %374 = arith.addf %373, %372 : vector<8x128xf32>
    %375 = arith.divf %373, %374 : vector<8x128xf32>
    %376 = arith.mulf %367, %311 : vector<8x128xf32>
    %377 = arith.mulf %361, %369 : vector<8x128xf32>
    %378 = arith.addf %376, %377 : vector<8x128xf32>
    %379 = math.tanh %378 : vector<8x128xf32>
    %380 = arith.mulf %375, %379 : vector<8x128xf32>
    %381 = tpu.concatenate %380, %343 in 1 : vector<8x128xf32>, vector<8x128xf32> -> vector<8x256xf32>
    %382 = arith.truncf %381 : vector<8x256xf32> to vector<8x256xbf16>
    %cst_81 = arith.constant dense<0.000000e+00> : vector<8x512xf32>
    %383 = tpu.matmul %382, %4, %cst_81 {dimension_numbers = #tpu.dot_dimension_numbers<[1], [0], [0], [1], [0, 0, 1, 1], [], []>} : vector<8x256xbf16>, vector<256x512xbf16>, vector<8x512xf32> -> vector<8x512xf32>
    %384 = vector.broadcast %5 : vector<1x512xf32> to vector<8x512xf32>
    %385 = arith.addf %383, %384 : vector<8x512xf32>
    %386 = vector.extract_strided_slice %385 {offsets = [0, 0], sizes = [8, 128], strides = [1, 1]} : vector<8x512xf32> to vector<8x128xf32>
    %387 = arith.negf %386 : vector<8x128xf32>
    %388 = math.exp %387 : vector<8x128xf32>
    %cst_82 = arith.constant 1.000000e+00 : f32
    %389 = vector.broadcast %cst_82 : f32 to vector<8x128xf32>
    %390 = arith.addf %389, %388 : vector<8x128xf32>
    %391 = arith.divf %389, %390 : vector<8x128xf32>
    %392 = vector.extract_strided_slice %385 {offsets = [0, 128], sizes = [8, 128], strides = [1, 1]} : vector<8x512xf32> to vector<8x128xf32>
    %393 = arith.negf %392 : vector<8x128xf32>
    %394 = math.exp %393 : vector<8x128xf32>
    %cst_83 = arith.constant 1.000000e+00 : f32
    %395 = vector.broadcast %cst_83 : f32 to vector<8x128xf32>
    %396 = arith.addf %395, %394 : vector<8x128xf32>
    %397 = arith.divf %395, %396 : vector<8x128xf32>
    %398 = vector.extract_strided_slice %385 {offsets = [0, 256], sizes = [8, 128], strides = [1, 1]} : vector<8x512xf32> to vector<8x128xf32>
    %399 = math.tanh %398 : vector<8x128xf32>
    %400 = vector.extract_strided_slice %385 {offsets = [0, 384], sizes = [8, 128], strides = [1, 1]} : vector<8x512xf32> to vector<8x128xf32>
    %401 = arith.negf %400 : vector<8x128xf32>
    %402 = math.exp %401 : vector<8x128xf32>
    %cst_84 = arith.constant 1.000000e+00 : f32
    %403 = vector.broadcast %cst_84 : f32 to vector<8x128xf32>
    %404 = arith.addf %403, %402 : vector<8x128xf32>
    %405 = arith.divf %403, %404 : vector<8x128xf32>
    %406 = arith.mulf %397, %341 : vector<8x128xf32>
    %407 = arith.mulf %391, %399 : vector<8x128xf32>
    %408 = arith.addf %406, %407 : vector<8x128xf32>
    %409 = math.tanh %408 : vector<8x128xf32>
    %410 = arith.mulf %405, %409 : vector<8x128xf32>
    %411 = arith.addf %380, %410 : vector<8x128xf32>
    %412 = arith.index_cast %c5_i32 : i32 to index
    %c0_85 = arith.constant 0 : index
    %c0_86 = arith.constant 0 : index
    %413 = vector.load %arg5[%412, %c0_85, %c0_86] : memref<8x8x128xf32, #tpu.memory_space<vmem>>, vector<1x8x128xf32>
    %414 = vector.shape_cast %413 : vector<1x8x128xf32> to vector<8x128xf32>
    %415 = vector.shape_cast %411 : vector<8x128xf32> to vector<1x8x128xf32>
    tpu.vector_store %arg5[%412, %c0_85, %c0_86], %415 {strides = array<i32>} : memref<8x8x128xf32, #tpu.memory_space<vmem>>, vector<1x8x128xf32>,
    %c6_i32 = arith.constant 6 : i32
    %416 = arith.index_cast %c6_i32 : i32 to index
    %c0_87 = arith.constant 0 : index
    %c0_88 = arith.constant 0 : index
    %417 = vector.load %arg1[%416, %c0_87, %c0_88] : memref<8x8x512xbf16, #tpu.memory_space<vmem>>, vector<1x8x512xbf16>
    %418 = vector.shape_cast %417 : vector<1x8x512xbf16> to vector<8x512xbf16>
    %419 = arith.extf %418 : vector<8x512xbf16> to vector<8x512xf32>
    %420 = arith.truncf %380 : vector<8x128xf32> to vector<8x128xbf16>
    %cst_89 = arith.constant dense<0.000000e+00> : vector<8x512xf32>
    %421 = tpu.matmul %420, %3, %cst_89 {dimension_numbers = #tpu.dot_dimension_numbers<[1], [0], [0], [1], [0, 0, 1, 1], [], []>} : vector<8x128xbf16>, vector<128x512xbf16>, vector<8x512xf32> -> vector<8x512xf32>
    %422 = arith.addf %419, %421 : vector<8x512xf32>
    %423 = vector.extract_strided_slice %422 {offsets = [0, 0], sizes = [8, 128], strides = [1, 1]} : vector<8x512xf32> to vector<8x128xf32>
    %424 = arith.negf %423 : vector<8x128xf32>
    %425 = math.exp %424 : vector<8x128xf32>
    %cst_90 = arith.constant 1.000000e+00 : f32
    %426 = vector.broadcast %cst_90 : f32 to vector<8x128xf32>
    %427 = arith.addf %426, %425 : vector<8x128xf32>
    %428 = arith.divf %426, %427 : vector<8x128xf32>
    %429 = vector.extract_strided_slice %422 {offsets = [0, 128], sizes = [8, 128], strides = [1, 1]} : vector<8x512xf32> to vector<8x128xf32>
    %430 = arith.negf %429 : vector<8x128xf32>
    %431 = math.exp %430 : vector<8x128xf32>
    %cst_91 = arith.constant 1.000000e+00 : f32
    %432 = vector.broadcast %cst_91 : f32 to vector<8x128xf32>
    %433 = arith.addf %432, %431 : vector<8x128xf32>
    %434 = arith.divf %432, %433 : vector<8x128xf32>
    %435 = vector.extract_strided_slice %422 {offsets = [0, 256], sizes = [8, 128], strides = [1, 1]} : vector<8x512xf32> to vector<8x128xf32>
    %436 = math.tanh %435 : vector<8x128xf32>
    %437 = vector.extract_strided_slice %422 {offsets = [0, 384], sizes = [8, 128], strides = [1, 1]} : vector<8x512xf32> to vector<8x128xf32>
    %438 = arith.negf %437 : vector<8x128xf32>
    %439 = math.exp %438 : vector<8x128xf32>
    %cst_92 = arith.constant 1.000000e+00 : f32
    %440 = vector.broadcast %cst_92 : f32 to vector<8x128xf32>
    %441 = arith.addf %440, %439 : vector<8x128xf32>
    %442 = arith.divf %440, %441 : vector<8x128xf32>
    %443 = arith.mulf %434, %378 : vector<8x128xf32>
    %444 = arith.mulf %428, %436 : vector<8x128xf32>
    %445 = arith.addf %443, %444 : vector<8x128xf32>
    %446 = math.tanh %445 : vector<8x128xf32>
    %447 = arith.mulf %442, %446 : vector<8x128xf32>
    %448 = tpu.concatenate %447, %410 in 1 : vector<8x128xf32>, vector<8x128xf32> -> vector<8x256xf32>
    %449 = arith.truncf %448 : vector<8x256xf32> to vector<8x256xbf16>
    %cst_93 = arith.constant dense<0.000000e+00> : vector<8x512xf32>
    %450 = tpu.matmul %449, %4, %cst_93 {dimension_numbers = #tpu.dot_dimension_numbers<[1], [0], [0], [1], [0, 0, 1, 1], [], []>} : vector<8x256xbf16>, vector<256x512xbf16>, vector<8x512xf32> -> vector<8x512xf32>
    %451 = vector.broadcast %5 : vector<1x512xf32> to vector<8x512xf32>
    %452 = arith.addf %450, %451 : vector<8x512xf32>
    %453 = vector.extract_strided_slice %452 {offsets = [0, 0], sizes = [8, 128], strides = [1, 1]} : vector<8x512xf32> to vector<8x128xf32>
    %454 = arith.negf %453 : vector<8x128xf32>
    %455 = math.exp %454 : vector<8x128xf32>
    %cst_94 = arith.constant 1.000000e+00 : f32
    %456 = vector.broadcast %cst_94 : f32 to vector<8x128xf32>
    %457 = arith.addf %456, %455 : vector<8x128xf32>
    %458 = arith.divf %456, %457 : vector<8x128xf32>
    %459 = vector.extract_strided_slice %452 {offsets = [0, 128], sizes = [8, 128], strides = [1, 1]} : vector<8x512xf32> to vector<8x128xf32>
    %460 = arith.negf %459 : vector<8x128xf32>
    %461 = math.exp %460 : vector<8x128xf32>
    %cst_95 = arith.constant 1.000000e+00 : f32
    %462 = vector.broadcast %cst_95 : f32 to vector<8x128xf32>
    %463 = arith.addf %462, %461 : vector<8x128xf32>
    %464 = arith.divf %462, %463 : vector<8x128xf32>
    %465 = vector.extract_strided_slice %452 {offsets = [0, 256], sizes = [8, 128], strides = [1, 1]} : vector<8x512xf32> to vector<8x128xf32>
    %466 = math.tanh %465 : vector<8x128xf32>
    %467 = vector.extract_strided_slice %452 {offsets = [0, 384], sizes = [8, 128], strides = [1, 1]} : vector<8x512xf32> to vector<8x128xf32>
    %468 = arith.negf %467 : vector<8x128xf32>
    %469 = math.exp %468 : vector<8x128xf32>
    %cst_96 = arith.constant 1.000000e+00 : f32
    %470 = vector.broadcast %cst_96 : f32 to vector<8x128xf32>
    %471 = arith.addf %470, %469 : vector<8x128xf32>
    %472 = arith.divf %470, %471 : vector<8x128xf32>
    %473 = arith.mulf %464, %408 : vector<8x128xf32>
    %474 = arith.mulf %458, %466 : vector<8x128xf32>
    %475 = arith.addf %473, %474 : vector<8x128xf32>
    %476 = math.tanh %475 : vector<8x128xf32>
    %477 = arith.mulf %472, %476 : vector<8x128xf32>
    %478 = arith.addf %447, %477 : vector<8x128xf32>
    %479 = arith.index_cast %c6_i32 : i32 to index
    %c0_97 = arith.constant 0 : index
    %c0_98 = arith.constant 0 : index
    %480 = vector.load %arg5[%479, %c0_97, %c0_98] : memref<8x8x128xf32, #tpu.memory_space<vmem>>, vector<1x8x128xf32>
    %481 = vector.shape_cast %480 : vector<1x8x128xf32> to vector<8x128xf32>
    %482 = vector.shape_cast %478 : vector<8x128xf32> to vector<1x8x128xf32>
    tpu.vector_store %arg5[%479, %c0_97, %c0_98], %482 {strides = array<i32>} : memref<8x8x128xf32, #tpu.memory_space<vmem>>, vector<1x8x128xf32>,
    %c7_i32 = arith.constant 7 : i32
    %483 = arith.index_cast %c7_i32 : i32 to index
    %c0_99 = arith.constant 0 : index
    %c0_100 = arith.constant 0 : index
    %484 = vector.load %arg1[%483, %c0_99, %c0_100] : memref<8x8x512xbf16, #tpu.memory_space<vmem>>, vector<1x8x512xbf16>
    %485 = vector.shape_cast %484 : vector<1x8x512xbf16> to vector<8x512xbf16>
    %486 = arith.extf %485 : vector<8x512xbf16> to vector<8x512xf32>
    %487 = arith.truncf %447 : vector<8x128xf32> to vector<8x128xbf16>
    %cst_101 = arith.constant dense<0.000000e+00> : vector<8x512xf32>
    %488 = tpu.matmul %487, %3, %cst_101 {dimension_numbers = #tpu.dot_dimension_numbers<[1], [0], [0], [1], [0, 0, 1, 1], [], []>} : vector<8x128xbf16>, vector<128x512xbf16>, vector<8x512xf32> -> vector<8x512xf32>
    %489 = arith.addf %486, %488 : vector<8x512xf32>
    %490 = vector.extract_strided_slice %489 {offsets = [0, 0], sizes = [8, 128], strides = [1, 1]} : vector<8x512xf32> to vector<8x128xf32>
    %491 = arith.negf %490 : vector<8x128xf32>
    %492 = math.exp %491 : vector<8x128xf32>
    %cst_102 = arith.constant 1.000000e+00 : f32
    %493 = vector.broadcast %cst_102 : f32 to vector<8x128xf32>
    %494 = arith.addf %493, %492 : vector<8x128xf32>
    %495 = arith.divf %493, %494 : vector<8x128xf32>
    %496 = vector.extract_strided_slice %489 {offsets = [0, 128], sizes = [8, 128], strides = [1, 1]} : vector<8x512xf32> to vector<8x128xf32>
    %497 = arith.negf %496 : vector<8x128xf32>
    %498 = math.exp %497 : vector<8x128xf32>
    %cst_103 = arith.constant 1.000000e+00 : f32
    %499 = vector.broadcast %cst_103 : f32 to vector<8x128xf32>
    %500 = arith.addf %499, %498 : vector<8x128xf32>
    %501 = arith.divf %499, %500 : vector<8x128xf32>
    %502 = vector.extract_strided_slice %489 {offsets = [0, 256], sizes = [8, 128], strides = [1, 1]} : vector<8x512xf32> to vector<8x128xf32>
    %503 = math.tanh %502 : vector<8x128xf32>
    %504 = vector.extract_strided_slice %489 {offsets = [0, 384], sizes = [8, 128], strides = [1, 1]} : vector<8x512xf32> to vector<8x128xf32>
    %505 = arith.negf %504 : vector<8x128xf32>
    %506 = math.exp %505 : vector<8x128xf32>
    %cst_104 = arith.constant 1.000000e+00 : f32
    %507 = vector.broadcast %cst_104 : f32 to vector<8x128xf32>
    %508 = arith.addf %507, %506 : vector<8x128xf32>
    %509 = arith.divf %507, %508 : vector<8x128xf32>
    %510 = arith.mulf %501, %445 : vector<8x128xf32>
    %511 = arith.mulf %495, %503 : vector<8x128xf32>
    %512 = arith.addf %510, %511 : vector<8x128xf32>
    %513 = math.tanh %512 : vector<8x128xf32>
    %514 = arith.mulf %509, %513 : vector<8x128xf32>
    %515 = tpu.concatenate %514, %477 in 1 : vector<8x128xf32>, vector<8x128xf32> -> vector<8x256xf32>
    %516 = arith.truncf %515 : vector<8x256xf32> to vector<8x256xbf16>
    %cst_105 = arith.constant dense<0.000000e+00> : vector<8x512xf32>
    %517 = tpu.matmul %516, %4, %cst_105 {dimension_numbers = #tpu.dot_dimension_numbers<[1], [0], [0], [1], [0, 0, 1, 1], [], []>} : vector<8x256xbf16>, vector<256x512xbf16>, vector<8x512xf32> -> vector<8x512xf32>
    %518 = vector.broadcast %5 : vector<1x512xf32> to vector<8x512xf32>
    %519 = arith.addf %517, %518 : vector<8x512xf32>
    %520 = vector.extract_strided_slice %519 {offsets = [0, 0], sizes = [8, 128], strides = [1, 1]} : vector<8x512xf32> to vector<8x128xf32>
    %521 = arith.negf %520 : vector<8x128xf32>
    %522 = math.exp %521 : vector<8x128xf32>
    %cst_106 = arith.constant 1.000000e+00 : f32
    %523 = vector.broadcast %cst_106 : f32 to vector<8x128xf32>
    %524 = arith.addf %523, %522 : vector<8x128xf32>
    %525 = arith.divf %523, %524 : vector<8x128xf32>
    %526 = vector.extract_strided_slice %519 {offsets = [0, 128], sizes = [8, 128], strides = [1, 1]} : vector<8x512xf32> to vector<8x128xf32>
    %527 = arith.negf %526 : vector<8x128xf32>
    %528 = math.exp %527 : vector<8x128xf32>
    %cst_107 = arith.constant 1.000000e+00 : f32
    %529 = vector.broadcast %cst_107 : f32 to vector<8x128xf32>
    %530 = arith.addf %529, %528 : vector<8x128xf32>
    %531 = arith.divf %529, %530 : vector<8x128xf32>
    %532 = vector.extract_strided_slice %519 {offsets = [0, 256], sizes = [8, 128], strides = [1, 1]} : vector<8x512xf32> to vector<8x128xf32>
    %533 = math.tanh %532 : vector<8x128xf32>
    %534 = vector.extract_strided_slice %519 {offsets = [0, 384], sizes = [8, 128], strides = [1, 1]} : vector<8x512xf32> to vector<8x128xf32>
    %535 = arith.negf %534 : vector<8x128xf32>
    %536 = math.exp %535 : vector<8x128xf32>
    %cst_108 = arith.constant 1.000000e+00 : f32
    %537 = vector.broadcast %cst_108 : f32 to vector<8x128xf32>
    %538 = arith.addf %537, %536 : vector<8x128xf32>
    %539 = arith.divf %537, %538 : vector<8x128xf32>
    %540 = arith.mulf %531, %475 : vector<8x128xf32>
    %541 = arith.mulf %525, %533 : vector<8x128xf32>
    %542 = arith.addf %540, %541 : vector<8x128xf32>
    %543 = math.tanh %542 : vector<8x128xf32>
    %544 = arith.mulf %539, %543 : vector<8x128xf32>
    %545 = arith.addf %514, %544 : vector<8x128xf32>
    %546 = arith.index_cast %c7_i32 : i32 to index
    %c0_109 = arith.constant 0 : index
    %c0_110 = arith.constant 0 : index
    %547 = vector.load %arg5[%546, %c0_109, %c0_110] : memref<8x8x128xf32, #tpu.memory_space<vmem>>, vector<1x8x128xf32>
    %548 = vector.shape_cast %547 : vector<1x8x128xf32> to vector<8x128xf32>
    %549 = vector.shape_cast %545 : vector<8x128xf32> to vector<1x8x128xf32>
    tpu.vector_store %arg5[%546, %c0_109, %c0_110], %549 {strides = array<i32>} : memref<8x8x128xf32, #tpu.memory_space<vmem>>, vector<1x8x128xf32>,
    %c8_i32 = arith.constant 8 : i32
    %c0_111 = arith.constant 0 : index
    %c0_112 = arith.constant 0 : index
    %c0_113 = arith.constant 0 : index
    %550 = vector.load %arg6[%c0_111, %c0_112, %c0_113] : memref<4x8x128xf32, #tpu.memory_space<vmem>>, vector<1x8x128xf32>
    %551 = vector.shape_cast %550 : vector<1x8x128xf32> to vector<8x128xf32>
    %552 = vector.shape_cast %514 : vector<8x128xf32> to vector<1x8x128xf32>
    tpu.vector_store %arg6[%c0_111, %c0_112, %c0_113], %552 {strides = array<i32>} : memref<4x8x128xf32, #tpu.memory_space<vmem>>, vector<1x8x128xf32>,
    %c1_114 = arith.constant 1 : index
    %c0_115 = arith.constant 0 : index
    %c0_116 = arith.constant 0 : index
    %553 = vector.load %arg6[%c1_114, %c0_115, %c0_116] : memref<4x8x128xf32, #tpu.memory_space<vmem>>, vector<1x8x128xf32>
    %554 = vector.shape_cast %553 : vector<1x8x128xf32> to vector<8x128xf32>
    %555 = vector.shape_cast %512 : vector<8x128xf32> to vector<1x8x128xf32>
    tpu.vector_store %arg6[%c1_114, %c0_115, %c0_116], %555 {strides = array<i32>} : memref<4x8x128xf32, #tpu.memory_space<vmem>>, vector<1x8x128xf32>,
    %c2_117 = arith.constant 2 : index
    %c0_118 = arith.constant 0 : index
    %c0_119 = arith.constant 0 : index
    %556 = vector.load %arg6[%c2_117, %c0_118, %c0_119] : memref<4x8x128xf32, #tpu.memory_space<vmem>>, vector<1x8x128xf32>
    %557 = vector.shape_cast %556 : vector<1x8x128xf32> to vector<8x128xf32>
    %558 = vector.shape_cast %544 : vector<8x128xf32> to vector<1x8x128xf32>
    tpu.vector_store %arg6[%c2_117, %c0_118, %c0_119], %558 {strides = array<i32>} : memref<4x8x128xf32, #tpu.memory_space<vmem>>, vector<1x8x128xf32>,
    %c3_120 = arith.constant 3 : index
    %c0_121 = arith.constant 0 : index
    %c0_122 = arith.constant 0 : index
    %559 = vector.load %arg6[%c3_120, %c0_121, %c0_122] : memref<4x8x128xf32, #tpu.memory_space<vmem>>, vector<1x8x128xf32>
    %560 = vector.shape_cast %559 : vector<1x8x128xf32> to vector<8x128xf32>
    %561 = vector.shape_cast %542 : vector<8x128xf32> to vector<1x8x128xf32>
    tpu.vector_store %arg6[%c3_120, %c0_121, %c0_122], %561 {strides = array<i32>} : memref<4x8x128xf32, #tpu.memory_space<vmem>>, vector<1x8x128xf32>,
    return
  }
  func.func @transform_0(%arg0: i32) -> (i32, i32, i32) {
    %c0_i32 = arith.constant 0 : i32
    %c0_i32_0 = arith.constant 0 : i32
    %c0_i32_1 = arith.constant 0 : i32
    return %arg0, %c0_i32, %c0_i32_0 : i32, i32, i32
  }
  func.func @transform_1(%arg0: i32) -> (i32, i32) {
    %c0_i32 = arith.constant 0 : i32
    %c0_i32_0 = arith.constant 0 : i32
    %c0_i32_1 = arith.constant 0 : i32
    return %c0_i32, %c0_i32_0 : i32, i32
  }
  func.func @transform_2(%arg0: i32) -> (i32, i32) {
    %c0_i32 = arith.constant 0 : i32
    %c0_i32_0 = arith.constant 0 : i32
    %c0_i32_1 = arith.constant 0 : i32
    return %c0_i32, %c0_i32_0 : i32, i32
  }
  func.func @transform_3(%arg0: i32) -> (i32, i32) {
    %c0_i32 = arith.constant 0 : i32
    %c0_i32_0 = arith.constant 0 : i32
    %c0_i32_1 = arith.constant 0 : i32
    return %c0_i32, %c0_i32_0 : i32, i32
  }
  func.func @transform_4(%arg0: i32) -> (i32, i32, i32) {
    %c0_i32 = arith.constant 0 : i32
    %c0_i32_0 = arith.constant 0 : i32
    %c0_i32_1 = arith.constant 0 : i32
    return %arg0, %c0_i32, %c0_i32_0 : i32, i32, i32
  }
}

</mosaic_0001>

<bundles_post_ra>
// kernel: lin_lstm_forward.1
= control target key start
LH: loop header
LB: loop body
LE: loop exit
PB: predicated region body
PF: predicated region fallthrough
CT: control target
= control target key end

     0   :  { %v5683_v1 = vmov 0   ;;  %v3222_v38 = vmov 0.0|0.0   ;;  %s5678_s1 = inlined_call_operand.vmem [shape: bf16[128,512], index: 1, kind: input, shape index: {}]   ;;  %s5679_s2 = inlined_call_operand.vmem [shape: bf16[256,512], index: 2, kind: input, shape index: {}]   ;;  %s5680_s0 = inlined_call_operand.vmem [shape: bf16[8,8,512], index: 0, kind: input, shape index: {}]   ;;  %s5681_s3 = inlined_call_operand.vmem [shape: f32[1,512], index: 3, kind: input, shape index: {}]   ;;  %s5682_s4 = inlined_call_operand.vmem [shape: f32[8,8,128], index: 4, kind: output, shape index: {}]  }
   0x1   :  { %v3251_v0 = vld [vmem:[%s5678_s1 + $0x4] ss:$16 sps:$4 sm:$0xff]   ;;  %329 = vmatprep.mubr.bf16.mxu0 %v5683_v1  ;;  %370 = vmatprep.mubr.bf16.mxu1 %v5683_v1  ;;  %v3258_v2 = vld [vmem:[%s5678_s1] ss:$16 sps:$4 sm:$0xff]   ;;  %v3281_v6 = vld [vmem:[%s5678_s1 + $0xc] ss:$16 sps:$4 sm:$0xff]  }
   0x2   :  { %5976 = vst [vmem:[#allocation3_spill] sm:$0xff] %v3251_v0  ;;  %297 = vmatprep.subr.bf16.mxu0 %v3251_v0  ;;  %v3264_v3 = vld [vmem:[%s5678_s1 + $0x24] ss:$16 sps:$4 sm:$0xff]   ;;  %v3270_v4 = vld [vmem:[%s5678_s1 + $0x20] ss:$16 sps:$4 sm:$0xff]   ;;  %5977 = vst [vmem:[#allocation4_spill] sm:$0xff] %v3281_v6  ;;  %338 = vmatprep.subr.bf16.mxu1 %v3281_v6 }
   0x3   :  { %298 = vmatpush1.bf16.msra.mxu0 %v3258_v2  ;;  %v3276_v5 = vld [vmem:[%s5678_s1 + $0x44] ss:$16 sps:$4 sm:$0xff]   ;;  %v3286_v7 = vld [vmem:[%s5678_s1 + $0x8] ss:$16 sps:$4 sm:$0xff]   ;;  %v3292_v8 = vld [vmem:[%s5678_s1 + $0x40] ss:$16 sps:$4 sm:$0xff]  }
   0x4   :  { %299 = vmatprep.subr.bf16.mxu0 %v3264_v3  ;;  %v3299_v9 = vld [vmem:[%s5678_s1 + $0x64] ss:$16 sps:$4 sm:$0xff]   ;;  %339 = vmatpush1.bf16.msra.mxu1 %v3286_v7  ;;  %v3305_v10 = vld [vmem:[%s5678_s1 + $0x2c] ss:$16 sps:$4 sm:$0xff]   ;;  %v3310_v11 = vld [vmem:[%s5678_s1 + $0x28] ss:$16 sps:$4 sm:$0xff]  }
   0x5   :  { %340 = vmatprep.subr.bf16.mxu1 %v3305_v10  ;;  %v3317_v12 = vld [vmem:[%s5678_s1 + $0x60] ss:$16 sps:$4 sm:$0xff]   ;;  %v3322_v13 = vld [vmem:[%s5678_s1 + $0x84] ss:$16 sps:$4 sm:$0xff]   ;;  %v3327_v14 = vld [vmem:[%s5678_s1 + $0x4c] ss:$16 sps:$4 sm:$0xff]  }
   0x6   :  { %v3334_v15 = vld [vmem:[%s5678_s1 + $0x48] ss:$16 sps:$4 sm:$0xff]   ;;  %v3340_v16 = vld [vmem:[%s5678_s1 + $0x6c] ss:$16 sps:$4 sm:$0xff]   ;;  %v3346_v17 = vld [vmem:[%s5678_s1 + $0x80] ss:$16 sps:$4 sm:$0xff]  }
   0x7   :  { %300 = vmatpush1.bf16.msra.mxu0 %v3270_v4  ;;  %v3352_v18 = vld [vmem:[%s5678_s1 + $0xa4] ss:$16 sps:$4 sm:$0xff]   ;;  %v3358_v19 = vld [vmem:[%s5678_s1 + $0x68] ss:$16 sps:$4 sm:$0xff]   ;;  %v3364_v20 = vld [vmem:[%s5678_s1 + $0x8c] ss:$16 sps:$4 sm:$0xff]  }
   0x8   :  { %301 = vmatprep.subr.bf16.mxu0 %v3276_v5  ;;  %341 = vmatpush1.bf16.msra.mxu1 %v3310_v11  ;;  %v3370_v21 = vld [vmem:[%s5678_s1 + $0xa0] ss:$16 sps:$4 sm:$0xff]   ;;  %v3375_v22 = vld [vmem:[%s5678_s1 + $0xc4] ss:$16 sps:$4 sm:$0xff]   ;;  %v3382_v23 = vld [vmem:[%s5678_s1 + $0x88] ss:$16 sps:$4 sm:$0xff]  }
   0x9   :  { %342 = vmatprep.subr.bf16.mxu1 %v3327_v14  ;;  %v3388_v24 = vld [vmem:[%s5678_s1 + $0xac] ss:$16 sps:$4 sm:$0xff]   ;;  %v3394_v25 = vld [vmem:[%s5678_s1 + $0xc0] ss:$16 sps:$4 sm:$0xff]   ;;  %v3399_v26 = vld [vmem:[%s5678_s1 + $0xe4] ss:$16 sps:$4 sm:$0xff]  }
   0xa   :  { %v3406_v27 = vld [vmem:[%s5678_s1 + $0xa8] ss:$16 sps:$4 sm:$0xff]   ;;  %v3412_v28 = vld [vmem:[%s5678_s1 + $0xcc] ss:$16 sps:$4 sm:$0xff]   ;;  %v3418_v29 = vld [vmem:[%s5678_s1 + $0xe0] ss:$16 sps:$4 sm:$0xff]  }
   0xb   :  { %302 = vmatpush1.bf16.msra.mxu0 %v3292_v8  ;;  %v3425_v30 = vld [vmem:[%s5678_s1 + $0xc8] ss:$16 sps:$4 sm:$0xff]   ;;  %v3430_v31 = vld [vmem:[%s5679_s2 + $0x4] ss:$16 sps:$4 sm:$0xff]   ;;  %v3436_v32 = vld [vmem:[%s5678_s1 + $0xec] ss:$16 sps:$4 sm:$0xff]  }
   0xc   :  { %303 = vmatprep.subr.bf16.mxu0 %v3299_v9  ;;  %343 = vmatpush1.bf16.msra.mxu1 %v3334_v15  ;;  %v3442_v33 = vld [vmem:[%s5678_s1 + $0xe8] ss:$16 sps:$4 sm:$0xff]   ;;  %v3447_v34 = vld [vmem:[%s5679_s2 + $0xc] ss:$16 sps:$4 sm:$0xff]   ;;  %v3452_v35 = vld [vmem:[%s5679_s2] ss:$16 sps:$4 sm:$0xff]  }
   0xd   :  { %344 = vmatprep.subr.bf16.mxu1 %v3340_v16  ;;  %v3459_v36 = vld [vmem:[%s5679_s2 + $0x24] ss:$16 sps:$4 sm:$0xff]   ;;  %v3465_v37 = vld [vmem:[%s5679_s2 + $0x20] ss:$16 sps:$4 sm:$0xff]   ;;  %v3470_v39 = vld [vmem:[%s5679_s2 + $0x8] ss:$16 sps:$4 sm:$0xff]  }
   0xe   :  { %v3475_v40 = vld [vmem:[%s5679_s2 + $0x44] ss:$16 sps:$4 sm:$0xff]   ;;  %v3481_v41 = vld [vmem:[%s5679_s2 + $0x2c] ss:$16 sps:$4 sm:$0xff]   ;;  %v3489_v42 = vld [vmem:[%s5679_s2 + $0x40] ss:$16 sps:$4 sm:$0xff]  }
   0xf   :  { %304 = vmatpush1.bf16.msra.mxu0 %v3317_v12  ;;  %v3494_v43 = vld [vmem:[%s5679_s2 + $0x28] ss:$16 sps:$4 sm:$0xff]   ;;  %v3499_v44 = vld [vmem:[%s5679_s2 + $0x64] ss:$16 sps:$4 sm:$0xff]   ;;  %v3505_v45 = vld [vmem:[%s5679_s2 + $0x4c] ss:$16 sps:$4 sm:$0xff]  }
  0x10   :  { %305 = vmatprep.subr.bf16.mxu0 %v3322_v13  ;;  %345 = vmatpush1.bf16.msra.mxu1 %v3358_v19  ;;  %v3513_v46 = vld [vmem:[%s5679_s2 + $0x60] ss:$16 sps:$4 sm:$0xff]   ;;  %v3518_v47 = vld [vmem:[%s5679_s2 + $0x48] ss:$16 sps:$4 sm:$0xff]   ;;  %v3524_v48 = vld [vmem:[%s5679_s2 + $0x6c] ss:$16 sps:$4 sm:$0xff]  }
  0x11   :  { %346 = vmatprep.subr.bf16.mxu1 %v3364_v20  ;;  %5978 = vst [vmem:[#allocation5_spill] sm:$0xff] %v3513_v46  ;;  %5979 = vst [vmem:[#allocation6_spill] sm:$0xff] %v3524_v48  ;;  %v3534_v49 = vld [vmem:[%s5679_s2 + $0x68] ss:$16 sps:$4 sm:$0xff]   ;;  %v3541_v50 = vld [vmem:[%s5679_s2 + $0x84] ss:$16 sps:$4 sm:$0xff]  }
  0x12   :  { %5980 = vst [vmem:[#allocation7_spill] sm:$0xff] %v3534_v49  ;;  %5981 = vst [vmem:[#allocation8_spill] sm:$0xff] %v3541_v50  ;;  %v3546_v51 = vld [vmem:[%s5679_s2 + $0x8c] ss:$16 sps:$4 sm:$0xff]   ;;  %v3551_v52 = vld [vmem:[%s5679_s2 + $0x80] ss:$16 sps:$4 sm:$0xff]  }
  0x13   :  { %306 = vmatpush1.bf16.msra.mxu0 %v3346_v17  ;;  %5982 = vst [vmem:[#allocation9_spill] sm:$0xff] %v3546_v51  ;;  %5983 = vst [vmem:[#allocation10_spill] sm:$0xff] %v3551_v52  ;;  %v3556_v53 = vld [vmem:[%s5679_s2 + $0x88] ss:$16 sps:$4 sm:$0xff]   ;;  %v3565_v54 = vld [vmem:[%s5679_s2 + $0xa4] ss:$16 sps:$4 sm:$0xff]  }
  0x14   :  { %307 = vmatprep.subr.bf16.mxu0 %v3352_v18  ;;  %347 = vmatpush1.bf16.msra.mxu1 %v3382_v23  ;;  %5984 = vst [vmem:[#allocation11_spill] sm:$0xff] %v3556_v53  ;;  %5985 = vst [vmem:[#allocation12_spill] sm:$0xff] %v3565_v54  ;;  %v3570_v55 = vld [vmem:[%s5679_s2 + $0xac] ss:$16 sps:$4 sm:$0xff]   ;;  %v3575_v56 = vld [vmem:[%s5679_s2 + $0xa0] ss:$16 sps:$4 sm:$0xff]  }
  0x15   :  { %348 = vmatprep.subr.bf16.mxu1 %v3388_v24  ;;  %5986 = vst [vmem:[#allocation13_spill] sm:$0xff] %v3570_v55  ;;  %5987 = vst [vmem:[#allocation14_spill] sm:$0xff] %v3575_v56  ;;  %v3580_v57 = vld [vmem:[%s5679_s2 + $0xa8] ss:$16 sps:$4 sm:$0xff]   ;;  %v3589_v58 = vld [vmem:[%s5679_s2 + $0xc4] ss:$16 sps:$4 sm:$0xff]  }
  0x16   :  { %5988 = vst [vmem:[#allocation15_spill] sm:$0xff] %v3580_v57  ;;  %5989 = vst [vmem:[#allocation16_spill] sm:$0xff] %v3589_v58  ;;  %v3594_v59 = vld [vmem:[%s5679_s2 + $0xcc] ss:$16 sps:$4 sm:$0xff]   ;;  %v3599_v60 = vld [vmem:[%s5679_s2 + $0xc0] ss:$16 sps:$4 sm:$0xff]  }
  0x17   :  { %308 = vmatpush1.bf16.msra.mxu0 %v3370_v21  ;;  %5990 = vst [vmem:[#allocation17_spill] sm:$0xff] %v3594_v59  ;;  %5991 = vst [vmem:[#allocation18_spill] sm:$0xff] %v3599_v60  ;;  %v3604_v61 = vld [vmem:[%s5679_s2 + $0xc8] ss:$16 sps:$4 sm:$0xff]   ;;  %v3613_v62 = vld [vmem:[%s5679_s2 + $0xe4] ss:$16 sps:$4 sm:$0xff]  }
  0x18   :  { %309 = vmatprep.subr.bf16.mxu0 %v3375_v22  ;;  %349 = vmatpush1.bf16.msra.mxu1 %v3406_v27  ;;  %5992 = vst [vmem:[#allocation19_spill] sm:$0xff] %v3604_v61  ;;  %5993 = vst [vmem:[#allocation20_spill] sm:$0xff] %v3613_v62  ;;  %v3618_v63 = vld [vmem:[%s5679_s2 + $0xec] ss:$16 sps:$4 sm:$0xff]   ;;  %v3628_v1 = vld [vmem:[%s5679_s2 + $0xe8] ss:$16 sps:$4 sm:$0xff]  }
  0x19   :  { %350 = vmatprep.subr.bf16.mxu1 %v3412_v28  ;;  %5994 = vst [vmem:[#allocation21_spill] sm:$0xff] %v3618_v63  ;;  %5996 = vst [vmem:[#allocation23_spill] sm:$0xff] %v3628_v1 }
  0x1b   :  { %310 = vmatpush1.bf16.msra.mxu0 %v3394_v25 }
  0x1c   :  { %311 = vmatprep.subr.bf16.mxu0 %v3399_v26  ;;  %351 = vmatpush1.bf16.msra.mxu1 %v3425_v30 }
  0x1d   :  { %352 = vmatprep.subr.bf16.mxu1 %v3436_v32 }
  0x1f   :  { %312 = vmatpush1.bf16.msra.mxu0 %v3418_v29 }
  0x20   :  { %750 = vmatprep.subr.bf16.mxu0 %v3430_v31  ;;  %353 = vmatpush1.bf16.msra.mxu1 %v3442_v33 }
  0x21   :  { %791 = vmatprep.subr.bf16.mxu1 %v3447_v34 }
  0x22   :  { %330 = vmatmul.mubr.bf16.vlgmr.msra.gmra.mrb[0].mxu0 %v3222_v38 }
  0x23   :  { %751 = vmatpush1.bf16.msra.mxu0 %v3452_v35  ;;  %782 = vmatprep.mubr.bf16.mxu0 %v3222_v38 }
  0x24   :  { %752 = vmatprep.subr.bf16.mxu0 %v3459_v36  ;;  %371 = vmatmul.mubr.bf16.vlgmr.msra.gmra.mrb[0].mxu1 %v3222_v38 }
  0x25   :  { %792 = vmatpush1.bf16.msra.mxu1 %v3470_v39  ;;  %823 = vmatprep.mubr.bf16.mxu1 %v3222_v38  ;;  %v3623_v38 = vld [vmem:[%s5679_s2 + $0xe0] ss:$16 sps:$4 sm:$0xff]  }
  0x26   :  { %793 = vmatprep.subr.bf16.mxu1 %v3481_v41  ;;  %5995 = vst [vmem:[#allocation22_spill] sm:$0xff] %v3623_v38 }
  0x27   :  { %753 = vmatpush1.bf16.msra.mxu0 %v3465_v37 }
  0x28   :  { %754 = vmatprep.subr.bf16.mxu0 %v3475_v40 }
  0x29   :  { %794 = vmatpush1.bf16.msra.mxu1 %v3494_v43 }
  0x2a   :  { %795 = vmatprep.subr.bf16.mxu1 %v3505_v45 }
  0x2b   :  { %755 = vmatpush1.bf16.msra.mxu0 %v3489_v42 }
  0x2c   :  { %756 = vmatprep.subr.bf16.mxu0 %v3499_v44 }
  0x2d   :  { %796 = vmatpush1.bf16.msra.mxu1 %v3518_v47 }
  0x2e   :  { %797 = vmatprep.subr.bf16.mxu1 %v3524_v48 }
  0x2f   :  { %757 = vmatpush1.bf16.msra.mxu0 %v3513_v46 }
  0x30   :  { %758 = vmatprep.subr.bf16.mxu0 %v3541_v50 }
  0x31   :  { %798 = vmatpush1.bf16.msra.mxu1 %v3534_v49 }
  0x32   :  { %799 = vmatprep.subr.bf16.mxu1 %v3546_v51 }
  0x33   :  { %759 = vmatpush1.bf16.msra.mxu0 %v3551_v52 }
  0x34   :  { %760 = vmatprep.subr.bf16.mxu0 %v3565_v54 }
  0x35   :  { %800 = vmatpush1.bf16.msra.mxu1 %v3556_v53 }
  0x36   :  { %801 = vmatprep.subr.bf16.mxu1 %v3570_v55 }
  0x37   :  { %761 = vmatpush1.bf16.msra.mxu0 %v3575_v56 }
  0x38   :  { %762 = vmatprep.subr.bf16.mxu0 %v3589_v58  ;;  %v3796_v58 = vld [vmem:[%s5679_s2 + $0x1c8] ss:$16 sps:$4 sm:$0xff]  }
  0x39   :  { %802 = vmatpush1.bf16.msra.mxu1 %v3580_v57  ;;  %6024 = vst [vmem:[#allocation51_spill] sm:$0xff] %v3796_v58 }
  0x3a   :  { %803 = vmatprep.subr.bf16.mxu1 %v3594_v59  ;;  %v3791_v59 = vld [vmem:[%s5679_s2 + $0x1c0] ss:$16 sps:$4 sm:$0xff]  }
  0x3b   :  { %763 = vmatpush1.bf16.msra.mxu0 %v3599_v60  ;;  %v3642_v60 = vld [vmem:[%s5679_s2 + $0x10c] ss:$16 sps:$4 sm:$0xff]   ;;  %6023 = vst [vmem:[#allocation50_spill] sm:$0xff] %v3791_v59 }
  0x3c   :  { %764 = vmatprep.subr.bf16.mxu0 %v3613_v62  ;;  %5998 = vst [vmem:[#allocation25_spill] sm:$0xff] %v3642_v60  ;;  %v3647_v62 = vld [vmem:[%s5679_s2 + $0x100] ss:$16 sps:$4 sm:$0xff]  }
  0x3d   :  { %804 = vmatpush1.bf16.msra.mxu1 %v3604_v61  ;;  %v3637_v61 = vld [vmem:[%s5679_s2 + $0x104] ss:$16 sps:$4 sm:$0xff]   ;;  %5999 = vst [vmem:[#allocation26_spill] sm:$0xff] %v3647_v62 }
  0x3e   :  { %805 = vmatprep.subr.bf16.mxu1 %v3618_v63  ;;  %5997 = vst [vmem:[#allocation24_spill] sm:$0xff] %v3637_v61  ;;  %v3666_v63 = vld [vmem:[%s5679_s2 + $0x12c] ss:$16 sps:$4 sm:$0xff]  }
  0x3f   :  { %765 = vmatpush1.bf16.msra.mxu0 %v3623_v38  ;;  %v3652_v38 = vld [vmem:[%s5679_s2 + $0x108] ss:$16 sps:$4 sm:$0xff]   ;;  %6002 = vst [vmem:[#allocation29_spill] sm:$0xff] %v3666_v63 }
  0x40   :  { %6000 = vst [vmem:[#allocation27_spill] sm:$0xff] %v3652_v38  ;;  %766 = vmatprep.subr.bf16.mxu0 %v3637_v61  ;;  %v3671_v61 = vld [vmem:[%s5679_s2 + $0x120] ss:$16 sps:$4 sm:$0xff]  }
  0x41   :  { %806 = vmatpush1.bf16.msra.mxu1 %v3628_v1  ;;  %v3661_v1 = vld [vmem:[%s5679_s2 + $0x124] ss:$16 sps:$4 sm:$0xff]   ;;  %6003 = vst [vmem:[#allocation30_spill] sm:$0xff] %v3671_v61 }
  0x42   :  { %807 = vmatprep.subr.bf16.mxu1 %v3642_v60  ;;  %6001 = vst [vmem:[#allocation28_spill] sm:$0xff] %v3661_v1  ;;  %v3690_v60 = vld [vmem:[%s5679_s2 + $0x14c] ss:$16 sps:$4 sm:$0xff]  }
  0x43   :  { %767 = vmatpush1.bf16.msra.mxu0 %v3647_v62  ;;  %v3676_v62 = vld [vmem:[%s5679_s2 + $0x128] ss:$16 sps:$4 sm:$0xff]   ;;  %6006 = vst [vmem:[#allocation33_spill] sm:$0xff] %v3690_v60 }
  0x44   :  { %6004 = vst [vmem:[#allocation31_spill] sm:$0xff] %v3676_v62  ;;  %768 = vmatprep.subr.bf16.mxu0 %v3661_v1  ;;  %v3695_v1 = vld [vmem:[%s5679_s2 + $0x140] ss:$16 sps:$4 sm:$0xff]  }
  0x45   :  { %808 = vmatpush1.bf16.msra.mxu1 %v3652_v38  ;;  %v3685_v38 = vld [vmem:[%s5679_s2 + $0x144] ss:$16 sps:$4 sm:$0xff]   ;;  %6007 = vst [vmem:[#allocation34_spill] sm:$0xff] %v3695_v1 }
  0x46   :  { %809 = vmatprep.subr.bf16.mxu1 %v3666_v63  ;;  %6005 = vst [vmem:[#allocation32_spill] sm:$0xff] %v3685_v38  ;;  %v3714_v63 = vld [vmem:[%s5679_s2 + $0x16c] ss:$16 sps:$4 sm:$0xff]  }
  0x47   :  { %769 = vmatpush1.bf16.msra.mxu0 %v3671_v61  ;;  %v3700_v61 = vld [vmem:[%s5679_s2 + $0x148] ss:$16 sps:$4 sm:$0xff]   ;;  %6010 = vst [vmem:[#allocation37_spill] sm:$0xff] %v3714_v63 }
  0x48   :  { %6008 = vst [vmem:[#allocation35_spill] sm:$0xff] %v3700_v61  ;;  %770 = vmatprep.subr.bf16.mxu0 %v3685_v38  ;;  %v3719_v38 = vld [vmem:[%s5679_s2 + $0x160] ss:$16 sps:$4 sm:$0xff]  }
  0x49   :  { %810 = vmatpush1.bf16.msra.mxu1 %v3676_v62  ;;  %v3709_v62 = vld [vmem:[%s5679_s2 + $0x164] ss:$16 sps:$4 sm:$0xff]   ;;  %6011 = vst [vmem:[#allocation38_spill] sm:$0xff] %v3719_v38 }
  0x4a   :  { %811 = vmatprep.subr.bf16.mxu1 %v3690_v60  ;;  %6009 = vst [vmem:[#allocation36_spill] sm:$0xff] %v3709_v62  ;;  %v3738_v60 = vld [vmem:[%s5679_s2 + $0x18c] ss:$16 sps:$4 sm:$0xff]  }
  0x4b   :  { %771 = vmatpush1.bf16.msra.mxu0 %v3695_v1  ;;  %v3724_v1 = vld [vmem:[%s5679_s2 + $0x168] ss:$16 sps:$4 sm:$0xff]   ;;  %6014 = vst [vmem:[#allocation41_spill] sm:$0xff] %v3738_v60 }
  0x4c   :  { %6012 = vst [vmem:[#allocation39_spill] sm:$0xff] %v3724_v1  ;;  %772 = vmatprep.subr.bf16.mxu0 %v3709_v62  ;;  %v3743_v62 = vld [vmem:[%s5679_s2 + $0x180] ss:$16 sps:$4 sm:$0xff]  }
  0x4d   :  { %812 = vmatpush1.bf16.msra.mxu1 %v3700_v61  ;;  %v3733_v61 = vld [vmem:[%s5679_s2 + $0x184] ss:$16 sps:$4 sm:$0xff]   ;;  %6015 = vst [vmem:[#allocation42_spill] sm:$0xff] %v3743_v62 }
  0x4e   :  { %813 = vmatprep.subr.bf16.mxu1 %v3714_v63  ;;  %6013 = vst [vmem:[#allocation40_spill] sm:$0xff] %v3733_v61  ;;  %v3762_v63 = vld [vmem:[%s5679_s2 + $0x1ac] ss:$16 sps:$4 sm:$0xff]  }
  0x4f   :  { %773 = vmatpush1.bf16.msra.mxu0 %v3719_v38  ;;  %v3748_v38 = vld [vmem:[%s5679_s2 + $0x188] ss:$16 sps:$4 sm:$0xff]   ;;  %6018 = vst [vmem:[#allocation45_spill] sm:$0xff] %v3762_v63 }
  0x50   :  { %6016 = vst [vmem:[#allocation43_spill] sm:$0xff] %v3748_v38  ;;  %774 = vmatprep.subr.bf16.mxu0 %v3733_v61  ;;  %v3767_v61 = vld [vmem:[%s5679_s2 + $0x1a0] ss:$16 sps:$4 sm:$0xff]  }
  0x51   :  { %814 = vmatpush1.bf16.msra.mxu1 %v3724_v1  ;;  %v3757_v1 = vld [vmem:[%s5679_s2 + $0x1a4] ss:$16 sps:$4 sm:$0xff]   ;;  %6019 = vst [vmem:[#allocation46_spill] sm:$0xff] %v3767_v61 }
  0x52   :  { %815 = vmatprep.subr.bf16.mxu1 %v3738_v60  ;;  %6017 = vst [vmem:[#allocation44_spill] sm:$0xff] %v3757_v1  ;;  %v3782_v60 = vld [vmem:[%s5679_s2 + $0x1cc] ss:$16 sps:$4 sm:$0xff]  }
  0x53   :  { %775 = vmatpush1.bf16.msra.mxu0 %v3743_v62  ;;  %v3772_v62 = vld [vmem:[%s5679_s2 + $0x1a8] ss:$16 sps:$4 sm:$0xff]   ;;  %6022 = vst [vmem:[#allocation49_spill] sm:$0xff] %v3782_v60 }
  0x54   :  { %6020 = vst [vmem:[#allocation47_spill] sm:$0xff] %v3772_v62  ;;  %776 = vmatprep.subr.bf16.mxu0 %v3757_v1 }
  0x55   :  { %816 = vmatpush1.bf16.msra.mxu1 %v3748_v38  ;;  %v3777_v38 = vld [vmem:[%s5679_s2 + $0x1c4] ss:$16 sps:$4 sm:$0xff]  }
  0x56   :  { %6021 = vst [vmem:[#allocation48_spill] sm:$0xff] %v3777_v38  ;;  %817 = vmatprep.subr.bf16.mxu1 %v3762_v63 }
  0x57   :  { %777 = vmatpush1.bf16.msra.mxu0 %v3767_v61  ;;  %v3803_v61 = vld [vmem:[%s5679_s2 + $0x1e4] ss:$16 sps:$4 sm:$0xff]  }
  0x58   :  { %778 = vmatprep.subr.bf16.mxu0 %v3777_v38  ;;  %6025 = vst [vmem:[#allocation52_spill] sm:$0xff] %v3803_v61  ;;  %v3815_v38 = vld [vmem:[%s5679_s2 + $0x1e0] ss:$16 sps:$4 sm:$0xff]  }
  0x59   :  { %818 = vmatpush1.bf16.msra.mxu1 %v3772_v62  ;;  %v3808_v62 = vld [vmem:[%s5679_s2 + $0x1ec] ss:$16 sps:$4 sm:$0xff]   ;;  %6027 = vst [vmem:[#allocation54_spill] sm:$0xff] %v3815_v38 }
  0x5a   :  { %819 = vmatprep.subr.bf16.mxu1 %v3782_v60  ;;  %6026 = vst [vmem:[#allocation53_spill] sm:$0xff] %v3808_v62  ;;  %v3820_v60 = vld [vmem:[%s5679_s2 + $0x1e8] ss:$16 sps:$4 sm:$0xff]  }
  0x5b   :  { %779 = vmatpush1.bf16.msra.mxu0 %v3791_v59  ;;  %6028 = vst [vmem:[#allocation55_spill] sm:$0xff] %v3820_v60 }
  0x5c   :  { %780 = vmatprep.subr.bf16.mxu0 %v3803_v61  ;;  %v131_v61 = vld [vmem:[%s5680_s0 + $0x8] sm:$0xff] }
  0x5d   :  { %820 = vmatpush1.bf16.msra.mxu1 %v3796_v58  ;;  %v130_v58 = vld [vmem:[%s5680_s0] sm:$0xff] }
  0x5e   :  { %821 = vmatprep.subr.bf16.mxu1 %v3808_v62  ;;  %v132_v59 = vunpack.c.l.bf16 %v130_v58  ;;  %v133_v63 = vunpack.c.h.bf16 %v130_v58  ;;  %v134_v58 = vunpack.c.l.bf16 %v131_v61 }
  0x5f   :  { %781 = vmatpush1.bf16.msra.mxu0 %v3815_v38 }
  0x60   :  { %865 = vmatprep.subr.bf16.mxu0 %v3251_v0  ;;  %v135_v0 = vunpack.c.h.bf16 %v131_v61  ;;  %v6046_v61 = vld [vmem:[#allocation21_spill] sm:$0xff] }
  0x61   :  { %822 = vmatpush1.bf16.msra.mxu1 %v3820_v60 }
  0x62   :  { %906 = vmatprep.subr.bf16.mxu1 %v3281_v6 }
  0xf5   :  { %v331_v1 = vpop.f32.mrb[0].mxu0 }
  0xf6   :  { %v379_v62 = vadd.f32 %v331_v1, %v132_v59  ;;  %v333_v57 = vpop.f32.mrb[1].mxu0 }
  0xf7   :  { %v380_v38 = vadd.f32 %v333_v57, %v133_v63  ;;  %v335_v56 = vpop.f32.mrb[2].mxu0  ;;  %v372_v6 = vpop.f32.mrb[0].mxu1 }
  0xf8   :  { %v2494_v60 = vmul.f32 -1.442695, %v379_v62  ;;  %v336_v55 = vpop.f32.mrb[3].mxu0  ;;  %v374_v53 = vpop.f32.mrb[1].mxu1  ;;  %v381_v46 = vadd.f32 %v372_v6, %v134_v58  ;;  %v6048_v58 = vld [vmem:[#allocation23_spill] sm:$0xff] }
  0xf9   :  { %v2495_v54 = vmul.f32 -1.442695, %v380_v38  ;;  %v382_v52 = vadd.f32 %v374_v53, %v135_v0  ;;  %v376_v51 = vpop.f32.mrb[2].mxu1  ;;  %v6045_v53 = vld [vmem:[#allocation20_spill] sm:$0xff]  ;;  %v6047_v38 = vld [vmem:[#allocation22_spill] sm:$0xff] }
  0xfa   :  { %2773 = vpow2.f32 %v2494_v60  ;;  %v377_v50 = vpop.f32.mrb[3].mxu1 }
  0xfb   :  { %2775 = vpow2.f32 %v2495_v54  ;;  %v2496_v49 = vmul.f32 -1.442695, %v382_v52  ;;  %v6044_v52 = vld [vmem:[#allocation19_spill] sm:$0xff] }
  0xfd   :  { %2777 = vpow2.f32 %v2496_v49 }
  0xfe   :  { %2779 = vtanh.f32 %v381_v46 }
 0x104   :  { %v2774_v48 = vpop.eup %2773 }
 0x105   :  { %v2776_v1 = vpop.eup %2775  ;;  %v386_v59 = vadd.f32 1.0, %v2774_v48  ;;  %v6029_v48 = vmov 0  }
 0x106   :  { %v392_v56 = vadd.f32 1.0, %v2776_v1  ;;  %v6049_v1 = vld [vmem:[#allocation24_spill] sm:$0xff] }
 0x107   :  { %2781 = vrcp.f32 %v386_v59  ;;  %v2778_v55 = vpop.eup %2777  ;;  %v6050_v59 = vld [vmem:[#allocation25_spill] sm:$0xff] }
 0x108   :  { %2783 = vrcp.f32 %v392_v56  ;;  %v2780_v57 = vpop.eup %2779  ;;  %v399_v62 = vadd.f32 1.0, %v2778_v55  ;;  %v6051_v56 = vld [vmem:[#allocation26_spill] sm:$0xff]  ;;  %v6052_v55 = vld [vmem:[#allocation27_spill] sm:$0xff] }
 0x10a   :  { %2785 = vrcp.f32 %v399_v62  ;;  %v6055_v62 = vld [vmem:[#allocation30_spill] sm:$0xff] }
 0x111   :  { %v2782_v60 = vpop.eup %2781 }
 0x112   :  { %v2784_v54 = vpop.eup %2783  ;;  %v403_v63 = vmul.f32 %v2782_v60, %v2780_v57  ;;  %v6053_v57 = vld [vmem:[#allocation28_spill] sm:$0xff]  ;;  %v6054_v60 = vld [vmem:[#allocation29_spill] sm:$0xff] }
 0x113   :  { %v402_v0 = vmul.f32 0.0, %v2784_v54  ;;  %v6056_v54 = vld [vmem:[#allocation31_spill] sm:$0xff] }
 0x114   :  { %v2786_v6 = vpop.eup %2785 }
 0x115   :  { %v3834_v51 = vadd.f32 %v403_v63, %v402_v0  ;;  %v6057_v63 = vld [vmem:[#allocation32_spill] sm:$0xff]  ;;  %v6058_v0 = vld [vmem:[#allocation33_spill] sm:$0xff] }
 0x117   :  { %2787 = vtanh.f32 %v3834_v51 }
 0x121   :  { %v2788_v49 = vpop.eup %2787 }
 0x122   :  { %v3837_v50 = vmul.f32 %v2788_v49, %v2786_v6  ;;  %v6059_v6 = vld [vmem:[#allocation34_spill] sm:$0xff]  ;;  %v6060_v49 = vld [vmem:[#allocation35_spill] sm:$0xff] }
 0x124   :  { %v407_v46 = vpack.c.bf16 %v3837_v50, %v3837_v50 }
 0x126   :  { %783 = vmatmul.mubr.bf16.vlgmr.msra.gmra.mrb[4].mxu0 %v407_v46  ;;  %824 = vmatmul.mubr.bf16.vlgmr.msra.gmra.mrb[4].mxu1 %v407_v46 }
 0x127   :  { %866 = vmatpush1.bf16.msra.mxu0 %v3258_v2  ;;  %907 = vmatpush1.bf16.msra.mxu1 %v3286_v7  ;;  %v6030_v2 = vld [vmem:[#allocation6_spill] sm:$0xff]  ;;  %v6034_v7 = vld [vmem:[#allocation9_spill] sm:$0xff] }
 0x128   :  { %867 = vmatprep.subr.bf16.mxu0 %v3264_v3  ;;  %908 = vmatprep.subr.bf16.mxu1 %v3305_v10  ;;  %v6031_v3 = vld [vmem:[#allocation5_spill] sm:$0xff]  ;;  %v6037_v10 = vld [vmem:[#allocation12_spill] sm:$0xff] }
 0x129   :  { %897 = vmatprep.mubr.bf16.mxu0 %v6029_v48  ;;  %938 = vmatprep.mubr.bf16.mxu1 %v6029_v48 }
 0x12b   :  { %868 = vmatpush1.bf16.msra.mxu0 %v3270_v4  ;;  %909 = vmatpush1.bf16.msra.mxu1 %v3310_v11  ;;  %v6032_v4 = vld [vmem:[#allocation7_spill] sm:$0xff]  ;;  %v6038_v11 = vld [vmem:[#allocation13_spill] sm:$0xff] }
 0x12c   :  { %869 = vmatprep.subr.bf16.mxu0 %v3276_v5  ;;  %910 = vmatprep.subr.bf16.mxu1 %v3327_v14  ;;  %v6033_v5 = vld [vmem:[#allocation8_spill] sm:$0xff] }
 0x12d   :  { %v6041_v14 = vld [vmem:[#allocation16_spill] sm:$0xff] }
 0x12f   :  { %870 = vmatpush1.bf16.msra.mxu0 %v3292_v8  ;;  %911 = vmatpush1.bf16.msra.mxu1 %v3334_v15  ;;  %v6035_v8 = vld [vmem:[#allocation10_spill] sm:$0xff]  ;;  %v6042_v15 = vld [vmem:[#allocation17_spill] sm:$0xff] }
 0x130   :  { %871 = vmatprep.subr.bf16.mxu0 %v3299_v9  ;;  %912 = vmatprep.subr.bf16.mxu1 %v3340_v16  ;;  %v6036_v9 = vld [vmem:[#allocation11_spill] sm:$0xff] }
 0x133   :  { %872 = vmatpush1.bf16.msra.mxu0 %v3317_v12  ;;  %913 = vmatpush1.bf16.msra.mxu1 %v3358_v19  ;;  %v6039_v12 = vld [vmem:[#allocation14_spill] sm:$0xff] }
 0x134   :  { %873 = vmatprep.subr.bf16.mxu0 %v3322_v13  ;;  %914 = vmatprep.subr.bf16.mxu1 %v3364_v20  ;;  %v6040_v13 = vld [vmem:[#allocation15_spill] sm:$0xff] }
 0x137   :  { %874 = vmatpush1.bf16.msra.mxu0 %v3346_v17  ;;  %915 = vmatpush1.bf16.msra.mxu1 %v3382_v23  ;;  %v6043_v17 = vld [vmem:[#allocation18_spill] sm:$0xff] }
 0x138   :  { %875 = vmatprep.subr.bf16.mxu0 %v3352_v18  ;;  %916 = vmatprep.subr.bf16.mxu1 %v3388_v24 }
 0x13b   :  { %876 = vmatpush1.bf16.msra.mxu0 %v3370_v21  ;;  %917 = vmatpush1.bf16.msra.mxu1 %v3406_v27 }
 0x13c   :  { %877 = vmatprep.subr.bf16.mxu0 %v3375_v22  ;;  %918 = vmatprep.subr.bf16.mxu1 %v3412_v28 }
 0x13f   :  { %878 = vmatpush1.bf16.msra.mxu0 %v3394_v25  ;;  %919 = vmatpush1.bf16.msra.mxu1 %v3425_v30 }
 0x140   :  { %879 = vmatprep.subr.bf16.mxu0 %v3399_v26  ;;  %920 = vmatprep.subr.bf16.mxu1 %v3436_v32 }
 0x143   :  { %880 = vmatpush1.bf16.msra.mxu0 %v3418_v29  ;;  %921 = vmatpush1.bf16.msra.mxu1 %v3442_v33 }
 0x144   :  { %977 = vmatprep.subr.bf16.mxu0 %v3430_v31  ;;  %1018 = vmatprep.subr.bf16.mxu1 %v3447_v34 }
 0x146   :  { %898 = vmatmul.mubr.bf16.vlgmr.msra.gmra.mrb[8].mxu0 %v407_v46  ;;  %939 = vmatmul.mubr.bf16.vlgmr.msra.gmra.mrb[8].mxu1 %v407_v46  ;;  %v6061_v46 = vld [vmem:[#allocation36_spill] sm:$0xff] }
 0x147   :  { %978 = vmatpush1.bf16.msra.mxu0 %v3452_v35  ;;  %1019 = vmatpush1.bf16.msra.mxu1 %v3470_v39 }
 0x148   :  { %979 = vmatprep.subr.bf16.mxu0 %v3459_v36  ;;  %1020 = vmatprep.subr.bf16.mxu1 %v3481_v41 }
 0x14b   :  { %980 = vmatpush1.bf16.msra.mxu0 %v3465_v37  ;;  %1021 = vmatpush1.bf16.msra.mxu1 %v3494_v43 }
 0x14c   :  { %981 = vmatprep.subr.bf16.mxu0 %v3475_v40  ;;  %1022 = vmatprep.subr.bf16.mxu1 %v3505_v45 }
 0x14f   :  { %982 = vmatpush1.bf16.msra.mxu0 %v3489_v42  ;;  %1023 = vmatpush1.bf16.msra.mxu1 %v3518_v47 }
 0x150   :  { %983 = vmatprep.subr.bf16.mxu0 %v3499_v44  ;;  %1024 = vmatprep.subr.bf16.mxu1 %v6030_v2 }
 0x153   :  { %984 = vmatpush1.bf16.msra.mxu0 %v6031_v3  ;;  %1025 = vmatpush1.bf16.msra.mxu1 %v6032_v4 }
 0x154   :  { %985 = vmatprep.subr.bf16.mxu0 %v6033_v5  ;;  %1026 = vmatprep.subr.bf16.mxu1 %v6034_v7 }
 0x157   :  { %986 = vmatpush1.bf16.msra.mxu0 %v6035_v8  ;;  %1027 = vmatpush1.bf16.msra.mxu1 %v6036_v9 }
 0x158   :  { %987 = vmatprep.subr.bf16.mxu0 %v6037_v10  ;;  %1028 = vmatprep.subr.bf16.mxu1 %v6038_v11 }
 0x15b   :  { %988 = vmatpush1.bf16.msra.mxu0 %v6039_v12  ;;  %1029 = vmatpush1.bf16.msra.mxu1 %v6040_v13 }
 0x15c   :  { %989 = vmatprep.subr.bf16.mxu0 %v6041_v14  ;;  %1030 = vmatprep.subr.bf16.mxu1 %v6042_v15 }
 0x15f   :  { %990 = vmatpush1.bf16.msra.mxu0 %v6043_v17  ;;  %1031 = vmatpush1.bf16.msra.mxu1 %v6044_v52 }
 0x160   :  { %991 = vmatprep.subr.bf16.mxu0 %v6045_v53  ;;  %1032 = vmatprep.subr.bf16.mxu1 %v6046_v61 }
 0x163   :  { %992 = vmatpush1.bf16.msra.mxu0 %v6047_v38  ;;  %1033 = vmatpush1.bf16.msra.mxu1 %v6048_v58 }
 0x164   :  { %993 = vmatprep.subr.bf16.mxu0 %v6049_v1  ;;  %1034 = vmatprep.subr.bf16.mxu1 %v6050_v59 }
 0x167   :  { %994 = vmatpush1.bf16.msra.mxu0 %v6051_v56  ;;  %1035 = vmatpush1.bf16.msra.mxu1 %v6052_v55  ;;  %v6062_v56 = vld [vmem:[#allocation37_spill] sm:$0xff]  ;;  %v6063_v55 = vld [vmem:[#allocation38_spill] sm:$0xff] }
 0x168   :  { %995 = vmatprep.subr.bf16.mxu0 %v6053_v57  ;;  %1036 = vmatprep.subr.bf16.mxu1 %v6054_v60  ;;  %v6064_v57 = vld [vmem:[#allocation39_spill] sm:$0xff]  ;;  %v6065_v60 = vld [vmem:[#allocation40_spill] sm:$0xff] }
 0x16b   :  { %996 = vmatpush1.bf16.msra.mxu0 %v6055_v62  ;;  %1037 = vmatpush1.bf16.msra.mxu1 %v6056_v54  ;;  %v6066_v62 = vld [vmem:[#allocation41_spill] sm:$0xff]  ;;  %v6067_v54 = vld [vmem:[#allocation42_spill] sm:$0xff] }
 0x16c   :  { %997 = vmatprep.subr.bf16.mxu0 %v6057_v63  ;;  %1038 = vmatprep.subr.bf16.mxu1 %v6058_v0  ;;  %v6068_v63 = vld [vmem:[#allocation43_spill] sm:$0xff]  ;;  %v6069_v0 = vld [vmem:[#allocation44_spill] sm:$0xff] }
 0x16f   :  { %998 = vmatpush1.bf16.msra.mxu0 %v6059_v6  ;;  %1039 = vmatpush1.bf16.msra.mxu1 %v6060_v49  ;;  %v6070_v6 = vld [vmem:[#allocation45_spill] sm:$0xff]  ;;  %v6071_v49 = vld [vmem:[#allocation46_spill] sm:$0xff] }
 0x170   :  { %999 = vmatprep.subr.bf16.mxu0 %v6061_v46  ;;  %1040 = vmatprep.subr.bf16.mxu1 %v6062_v56  ;;  %v6072_v46 = vld [vmem:[#allocation47_spill] sm:$0xff]  ;;  %v6073_v56 = vld [vmem:[#allocation48_spill] sm:$0xff] }
 0x173   :  { %1000 = vmatpush1.bf16.msra.mxu0 %v6063_v55  ;;  %1041 = vmatpush1.bf16.msra.mxu1 %v6064_v57  ;;  %v6074_v55 = vld [vmem:[#allocation49_spill] sm:$0xff]  ;;  %v6075_v57 = vld [vmem:[#allocation50_spill] sm:$0xff] }
 0x174   :  { %1001 = vmatprep.subr.bf16.mxu0 %v6065_v60  ;;  %1042 = vmatprep.subr.bf16.mxu1 %v6066_v62  ;;  %v6076_v60 = vld [vmem:[#allocation51_spill] sm:$0xff]  ;;  %v6077_v62 = vld [vmem:[#allocation52_spill] sm:$0xff] }
 0x177   :  { %1002 = vmatpush1.bf16.msra.mxu0 %v6067_v54  ;;  %1043 = vmatpush1.bf16.msra.mxu1 %v6068_v63  ;;  %v6078_v54 = vld [vmem:[#allocation53_spill] sm:$0xff]  ;;  %v6079_v63 = vld [vmem:[#allocation54_spill] sm:$0xff] }
 0x178   :  { %1003 = vmatprep.subr.bf16.mxu0 %v6069_v0  ;;  %1044 = vmatprep.subr.bf16.mxu1 %v6070_v6  ;;  %v6080_v0 = vld [vmem:[#allocation55_spill] sm:$0xff] }
 0x179   :  { %v6081_v6 = vld [vmem:[#allocation3_spill] sm:$0xff] }
 0x17b   :  { %1004 = vmatpush1.bf16.msra.mxu0 %v6071_v49  ;;  %1045 = vmatpush1.bf16.msra.mxu1 %v6072_v46  ;;  %v6082_v49 = vld [vmem:[#allocation4_spill] sm:$0xff]  ;;  %v410_v46 = vlaneseq }
 0x17c   :  { %1005 = vmatprep.subr.bf16.mxu0 %v6073_v56  ;;  %1046 = vmatprep.subr.bf16.mxu1 %v6074_v55 }
 0x17d   :  { %v411_v56 = vshrl.u32 %v410_v46, 7 }
 0x17f   :  { %1006 = vmatpush1.bf16.msra.mxu0 %v6075_v57  ;;  %1047 = vmatpush1.bf16.msra.mxu1 %v6076_v60  ;;  %v412_v59 = vsub.s32 0, %v411_v56  ;;  %v122_v57 = vld [vmem:[%s5681_s3] sm:$0xf]  ;;  %v416_v60 = vsub.s32 1, %v411_v56  ;;  %v424_v1 = vsub.s32 3, %v411_v56 }
 0x180   :  { %1007 = vmatprep.subr.bf16.mxu0 %v6077_v62  ;;  %1048 = vmatprep.subr.bf16.mxu1 %v6078_v54 }
 0x181   :  { %v3942_v55 = vrot.slane %v122_v57, %v412_v59  ;;  %v3944_v62 = vrot.slane %v122_v57, %v416_v60  ;;  %v3948_v15 = vrot.slane %v122_v57, %v424_v1  ;;  %v420_v59 = vsub.s32 2, %v411_v56 }
 0x183   :  { %1008 = vmatpush1.bf16.msra.mxu0 %v6079_v63  ;;  %1049 = vmatpush1.bf16.msra.mxu1 %v6080_v0  ;;  %6083 = vst [vmem:[#allocation6_spill] sm:$0xff] %v3942_v55  ;;  %6084 = vst [vmem:[#allocation5_spill] sm:$0xff] %v3944_v62  ;;  %v3951_v14 = vrot.slane %v122_v57, %v420_v59 }
 0x184   :  { %1093 = vmatprep.subr.bf16.mxu0 %v6081_v6  ;;  %1134 = vmatprep.subr.bf16.mxu1 %v6082_v49  ;;  %6085 = vst [vmem:[#allocation7_spill] sm:$0xff] %v3948_v15 }
 0x185   :  { %6086 = vst [vmem:[#allocation8_spill] sm:$0xff] %v3951_v14 }
 0x1f9   :  { %v784_v54 = vpop.f32.mrb[4].mxu0  ;;  %v825_v63 = vpop.f32.mrb[4].mxu1 }
 0x1fa   :  { %v785_v0 = vadd.f32 %v784_v54, %v3942_v55  ;;  %v786_v6 = vpop.f32.mrb[5].mxu0  ;;  %v827_v58 = vpop.f32.mrb[5].mxu1  ;;  %v826_v55 = vadd.f32 %v825_v63, %v3951_v14 }
 0x1fb   :  { %v787_v49 = vadd.f32 %v786_v6, %v3944_v62  ;;  %v788_v46 = vpop.f32.mrb[6].mxu0  ;;  %v829_v38 = vpop.f32.mrb[6].mxu1  ;;  %v828_v60 = vadd.f32 %v827_v58, %v3948_v15 }
 0x1fc   :  { %v2561_v61 = vmul.f32 -1.442695, %v785_v0  ;;  %v789_v53 = vpop.f32.mrb[7].mxu0  ;;  %v830_v52 = vpop.f32.mrb[7].mxu1 }
 0x1fd   :  { %v2562_v17 = vmul.f32 -1.442695, %v787_v49  ;;  %v2563_v54 = vmul.f32 -1.442695, %v828_v60  ;;  %v2565_v60 = vld [vmem:[%s5680_s0 + $0x18] sm:$0xff] }
 0x1fe   :  { %2789 = vpow2.f32 %v2561_v61 }
 0x1ff   :  { %2791 = vpow2.f32 %v2562_v17  ;;  %v2564_v17 = vld [vmem:[%s5680_s0 + $0x10] sm:$0xff] }
 0x200   :  { %2793 = vpow2.f32 %v2563_v54  ;;  %v861_v57 = vunpack.c.l.bf16 %v2564_v17  ;;  %v862_v0 = vunpack.c.h.bf16 %v2564_v17 }
 0x201   :  { %2795 = vtanh.f32 %v826_v55 }
 0x208   :  { %v2790_v13 = vpop.eup %2789 }
 0x209   :  { %v2792_v6 = vpop.eup %2791  ;;  %v835_v46 = vadd.f32 1.0, %v2790_v13 }
 0x20a   :  { %v841_v53 = vadd.f32 1.0, %v2792_v6  ;;  %v2794_v52 = vpop.eup %2793 }
 0x20b   :  { %2797 = vrcp.f32 %v835_v46  ;;  %v2796_v61 = vpop.eup %2795  ;;  %v848_v56 = vadd.f32 1.0, %v2794_v52 }
 0x20c   :  { %2799 = vrcp.f32 %v841_v53 }
 0x20d   :  { %2801 = vrcp.f32 %v848_v56 }
 0x215   :  { %v2798_v38 = vpop.eup %2797 }
 0x216   :  { %v2800_v58 = vpop.eup %2799  ;;  %v852_v1 = vmul.f32 %v2798_v38, %v2796_v61 }
 0x217   :  { %v851_v63 = vmul.f32 0.0, %v2800_v58 }
 0x219   :  { %v3957_v49 = vadd.f32 %v852_v1, %v851_v63  ;;  %v899_v13 = vpop.f32.mrb[8].mxu0  ;;  %v940_v55 = vpop.f32.mrb[8].mxu1  ;;  %v864_v1 = vunpack.c.h.bf16 %v2565_v60 }
 0x21a   :  { %v947_v59 = vadd.f32 %v899_v13, %v861_v57  ;;  %v901_v54 = vpop.f32.mrb[9].mxu0  ;;  %v942_v6 = vpop.f32.mrb[9].mxu1  ;;  %v863_v57 = vunpack.c.l.bf16 %v2565_v60 }
 0x21b   :  { %6087 = vst [vmem:[#allocation9_spill] sm:$0xff] %v3957_v49  ;;  %2803 = vtanh.f32 %v3957_v49  ;;  %v948_v46 = vadd.f32 %v901_v54, %v862_v0  ;;  %v903_v53 = vpop.f32.mrb[10].mxu0  ;;  %v944_v52 = vpop.f32.mrb[10].mxu1  ;;  %v950_v56 = vadd.f32 %v942_v6, %v864_v1  ;;  %v4004_v1 = vld [vmem:[%s5678_s1 + $0x20] ss:$16 sps:$4 sm:$0xff]  }
 0x21c   :  { %v2566_v61 = vmul.f32 -1.442695, %v947_v59  ;;  %v904_v38 = vpop.f32.mrb[11].mxu0  ;;  %v945_v17 = vpop.f32.mrb[11].mxu1  ;;  %v949_v15 = vadd.f32 %v940_v55, %v863_v57  ;;  %v4016_v57 = vld [vmem:[%s5678_s1 + $0x44] ss:$16 sps:$4 sm:$0xff]  }
 0x21d   :  { %v2567_v58 = vmul.f32 -1.442695, %v948_v46  ;;  %v2802_v63 = vpop.eup %2801  ;;  %v2568_v14 = vmul.f32 -1.442695, %v950_v56  ;;  %v3978_v38 = vld [vmem:[%s5678_s1] ss:$16 sps:$4 sm:$0xff]  }
 0x21e   :  { %2805 = vpow2.f32 %v2566_v61  ;;  %v3990_v17 = vld [vmem:[%s5678_s1 + $0x24] ss:$16 sps:$4 sm:$0xff]   ;;  %v4010_v56 = vld [vmem:[%s5678_s1 + $0x28] ss:$16 sps:$4 sm:$0xff]  }
 0x21f   :  { %2807 = vpow2.f32 %v2567_v58  ;;  %v3996_v58 = vld [vmem:[%s5678_s1 + $0x2c] ss:$16 sps:$4 sm:$0xff]  }
 0x220   :  { %2809 = vpow2.f32 %v2568_v14 }
 0x221   :  { %2811 = vtanh.f32 %v949_v15 }
 0x225   :  { %v2804_v13 = vpop.eup %2803 }
 0x226   :  { %v855_v62 = vmul.f32 %v2804_v13, %v2802_v63  ;;  %v4022_v63 = vld [vmem:[%s5678_s1 + $0x4c] ss:$16 sps:$4 sm:$0xff]   ;;  %v4028_v13 = vld [vmem:[%s5678_s1 + $0x40] ss:$16 sps:$4 sm:$0xff]  }
 0x228   :  { %v2806_v12 = vpop.eup %2805  ;;  %v856_v49 = vadd.f32 %v855_v62, %v3837_v50  ;;  %v976_v0 = vpack.c.bf16 %v855_v62, %v855_v62 }
 0x229   :  { %v2808_v54 = vpop.eup %2807  ;;  %v954_v53 = vadd.f32 1.0, %v2806_v12 }
 0x22a   :  { %v960_v59 = vadd.f32 1.0, %v2808_v54  ;;  %857 = vst [vmem:[%s5682_s4] sm:$0xff] %v856_v49  ;;  %1009 = vmatprep.mubr.bf16.mxu0 %v976_v0  ;;  %1050 = vmatprep.mubr.bf16.mxu1 %v976_v0  ;;  %v2810_v60 = vpop.eup %2809  ;;  %v4034_v0 = vld [vmem:[%s5678_s1 + $0x48] ss:$16 sps:$4 sm:$0xff]   ;;  %v4040_v54 = vld [vmem:[%s5678_s1 + $0x64] ss:$16 sps:$4 sm:$0xff]  }
 0x22b   :  { %2813 = vrcp.f32 %v954_v53  ;;  %v2812_v55 = vpop.eup %2811  ;;  %v967_v50 = vadd.f32 1.0, %v2810_v60  ;;  %v4047_v53 = vld [vmem:[%s5678_s1 + $0x60] ss:$16 sps:$4 sm:$0xff]  }
 0x22c   :  { %2815 = vrcp.f32 %v960_v59  ;;  %v4054_v59 = vld [vmem:[%s5678_s1 + $0x84] ss:$16 sps:$4 sm:$0xff]  }
 0x22d   :  { %2817 = vrcp.f32 %v967_v50  ;;  %v6125_v60 = vld [vmem:[#allocation51_spill] sm:$0xff] }
 0x22e   :  { %v4144_v50 = vld [vmem:[%s5678_s1 + $0x4] ss:$16 sps:$4 sm:$0xff]  }
 0x22f   :  { %6130 = vst [vmem:[#allocation10_spill] sm:$0xff] %v4144_v50 }
 0x235   :  { %v2814_v6 = vpop.eup %2813 }
 0x236   :  { %v2816_v46 = vpop.eup %2815  ;;  %v971_v52 = vmul.f32 %v2814_v6, %v2812_v55  ;;  %v6126_v55 = vld [vmem:[#allocation52_spill] sm:$0xff]  ;;  %v6127_v6 = vld [vmem:[#allocation53_spill] sm:$0xff] }
 0x237   :  { %v970_v62 = vmul.f32 %v2816_v46, %v3834_v51  ;;  %v2818_v14 = vpop.eup %2817  ;;  %v3984_v51 = vld [vmem:[%s5678_s1 + $0x8] ss:$16 sps:$4 sm:$0xff]  }
 0x238   :  { %v6128_v46 = vld [vmem:[#allocation54_spill] sm:$0xff] }
 0x239   :  { %v3968_v12 = vadd.f32 %v971_v52, %v970_v62  ;;  %v6129_v52 = vld [vmem:[#allocation55_spill] sm:$0xff]  ;;  %v4150_v62 = vld [vmem:[%s5678_s1 + $0xc] ss:$16 sps:$4 sm:$0xff]  }
 0x23a   :  { %6131 = vst [vmem:[#allocation11_spill] sm:$0xff] %v4150_v62 }
 0x23b   :  { %2819 = vtanh.f32 %v3968_v12 }
 0x245   :  { %v2820_v15 = vpop.eup %2819 }
 0x246   :  { %v3971_v49 = vmul.f32 %v2820_v15, %v2818_v14 }
 0x248   :  { %v975_v61 = vpack.c.bf16 %v3971_v49, %v3971_v49 }
 0x24a   :  { %1010 = vmatmul.mubr.bf16.vlgmr.msra.gmra.mrb[12].mxu0 %v975_v61  ;;  %1051 = vmatmul.mubr.bf16.vlgmr.msra.gmra.mrb[12].mxu1 %v975_v61 }
 0x24b   :  { %1094 = vmatpush1.bf16.msra.mxu0 %v3978_v38  ;;  %1135 = vmatpush1.bf16.msra.mxu1 %v3984_v51 }
 0x24c   :  { %1095 = vmatprep.subr.bf16.mxu0 %v3990_v17  ;;  %1136 = vmatprep.subr.bf16.mxu1 %v3996_v58 }
 0x24d   :  { %1125 = vmatprep.mubr.bf16.mxu0 %v6029_v48  ;;  %1166 = vmatprep.mubr.bf16.mxu1 %v6029_v48 }
 0x24f   :  { %1096 = vmatpush1.bf16.msra.mxu0 %v4004_v1  ;;  %1137 = vmatpush1.bf16.msra.mxu1 %v4010_v56 }
 0x250   :  { %1097 = vmatprep.subr.bf16.mxu0 %v4016_v57  ;;  %1138 = vmatprep.subr.bf16.mxu1 %v4022_v63 }
 0x253   :  { %1098 = vmatpush1.bf16.msra.mxu0 %v4028_v13  ;;  %1139 = vmatpush1.bf16.msra.mxu1 %v4034_v0 }
 0x254   :  { %1099 = vmatprep.subr.bf16.mxu0 %v4040_v54  ;;  %1140 = vmatprep.subr.bf16.mxu1 %v3340_v16  ;;  %v4061_v16 = vld [vmem:[%s5678_s1 + $0x80] ss:$16 sps:$4 sm:$0xff]  }
 0x257   :  { %1100 = vmatpush1.bf16.msra.mxu0 %v4047_v53  ;;  %1141 = vmatpush1.bf16.msra.mxu1 %v3358_v19  ;;  %v6089_v19 = vld [vmem:[#allocation15_spill] sm:$0xff] }
 0x258   :  { %1101 = vmatprep.subr.bf16.mxu0 %v4054_v59  ;;  %1142 = vmatprep.subr.bf16.mxu1 %v3364_v20  ;;  %v6090_v20 = vld [vmem:[#allocation16_spill] sm:$0xff] }
 0x25b   :  { %1102 = vmatpush1.bf16.msra.mxu0 %v4061_v16  ;;  %1143 = vmatpush1.bf16.msra.mxu1 %v3382_v23  ;;  %v6093_v23 = vld [vmem:[#allocation19_spill] sm:$0xff] }
 0x25c   :  { %1103 = vmatprep.subr.bf16.mxu0 %v3352_v18  ;;  %1144 = vmatprep.subr.bf16.mxu1 %v3388_v24  ;;  %v6088_v18 = vld [vmem:[#allocation14_spill] sm:$0xff]  ;;  %v6094_v24 = vld [vmem:[#allocation20_spill] sm:$0xff] }
 0x25f   :  { %1104 = vmatpush1.bf16.msra.mxu0 %v3370_v21  ;;  %1145 = vmatpush1.bf16.msra.mxu1 %v3406_v27  ;;  %v6091_v21 = vld [vmem:[#allocation17_spill] sm:$0xff]  ;;  %v6097_v27 = vld [vmem:[#allocation23_spill] sm:$0xff] }
 0x260   :  { %1105 = vmatprep.subr.bf16.mxu0 %v3375_v22  ;;  %1146 = vmatprep.subr.bf16.mxu1 %v3412_v28  ;;  %v6092_v22 = vld [vmem:[#allocation18_spill] sm:$0xff]  ;;  %v6098_v28 = vld [vmem:[#allocation24_spill] sm:$0xff] }
 0x263   :  { %1106 = vmatpush1.bf16.msra.mxu0 %v3394_v25  ;;  %1147 = vmatpush1.bf16.msra.mxu1 %v3425_v30  ;;  %v6095_v25 = vld [vmem:[#allocation21_spill] sm:$0xff]  ;;  %v6100_v30 = vld [vmem:[#allocation26_spill] sm:$0xff] }
 0x264   :  { %1107 = vmatprep.subr.bf16.mxu0 %v3399_v26  ;;  %1148 = vmatprep.subr.bf16.mxu1 %v3436_v32  ;;  %v6096_v26 = vld [vmem:[#allocation22_spill] sm:$0xff]  ;;  %v6102_v32 = vld [vmem:[#allocation28_spill] sm:$0xff] }
 0x267   :  { %1108 = vmatpush1.bf16.msra.mxu0 %v3418_v29  ;;  %1149 = vmatpush1.bf16.msra.mxu1 %v3442_v33  ;;  %v6099_v29 = vld [vmem:[#allocation25_spill] sm:$0xff] }
 0x268   :  { %1205 = vmatprep.subr.bf16.mxu0 %v3430_v31  ;;  %1246 = vmatprep.subr.bf16.mxu1 %v3447_v34  ;;  %v6101_v31 = vld [vmem:[#allocation27_spill] sm:$0xff]  ;;  %v6103_v33 = vld [vmem:[#allocation29_spill] sm:$0xff]  ;;  %v6104_v34 = vld [vmem:[#allocation30_spill] sm:$0xff] }
 0x26a   :  { %1126 = vmatmul.mubr.bf16.vlgmr.msra.gmra.mrb[16].mxu0 %v975_v61  ;;  %1167 = vmatmul.mubr.bf16.vlgmr.msra.gmra.mrb[16].mxu1 %v975_v61  ;;  %v6132_v61 = vld [vmem:[#allocation6_spill] sm:$0xff] }
 0x26b   :  { %1206 = vmatpush1.bf16.msra.mxu0 %v3452_v35  ;;  %1247 = vmatpush1.bf16.msra.mxu1 %v3470_v39  ;;  %v6105_v35 = vld [vmem:[#allocation31_spill] sm:$0xff]  ;;  %v6108_v39 = vld [vmem:[#allocation34_spill] sm:$0xff] }
 0x26c   :  { %1207 = vmatprep.subr.bf16.mxu0 %v3459_v36  ;;  %1248 = vmatprep.subr.bf16.mxu1 %v3481_v41  ;;  %v6106_v36 = vld [vmem:[#allocation32_spill] sm:$0xff] }
 0x26d   :  { %v6110_v41 = vld [vmem:[#allocation36_spill] sm:$0xff] }
 0x26f   :  { %1208 = vmatpush1.bf16.msra.mxu0 %v3465_v37  ;;  %1249 = vmatpush1.bf16.msra.mxu1 %v3494_v43  ;;  %v6107_v37 = vld [vmem:[#allocation33_spill] sm:$0xff]  ;;  %v6112_v43 = vld [vmem:[#allocation38_spill] sm:$0xff] }
 0x270   :  { %1209 = vmatprep.subr.bf16.mxu0 %v3475_v40  ;;  %1250 = vmatprep.subr.bf16.mxu1 %v3505_v45  ;;  %v6109_v40 = vld [vmem:[#allocation35_spill] sm:$0xff]  ;;  %v6114_v45 = vld [vmem:[#allocation40_spill] sm:$0xff] }
 0x273   :  { %1210 = vmatpush1.bf16.msra.mxu0 %v3489_v42  ;;  %1251 = vmatpush1.bf16.msra.mxu1 %v3518_v47  ;;  %v6111_v42 = vld [vmem:[#allocation37_spill] sm:$0xff] }
 0x274   :  { %1211 = vmatprep.subr.bf16.mxu0 %v3499_v44  ;;  %1252 = vmatprep.subr.bf16.mxu1 %v6030_v2  ;;  %v6113_v44 = vld [vmem:[#allocation39_spill] sm:$0xff]  ;;  %v6115_v47 = vld [vmem:[#allocation41_spill] sm:$0xff]  ;;  %v6116_v2 = vld [vmem:[#allocation42_spill] sm:$0xff] }
 0x277   :  { %1212 = vmatpush1.bf16.msra.mxu0 %v6031_v3  ;;  %1253 = vmatpush1.bf16.msra.mxu1 %v6032_v4  ;;  %v6117_v3 = vld [vmem:[#allocation43_spill] sm:$0xff]  ;;  %v6118_v4 = vld [vmem:[#allocation44_spill] sm:$0xff] }
 0x278   :  { %1213 = vmatprep.subr.bf16.mxu0 %v6033_v5  ;;  %1254 = vmatprep.subr.bf16.mxu1 %v6034_v7  ;;  %v6119_v5 = vld [vmem:[#allocation45_spill] sm:$0xff]  ;;  %v6120_v7 = vld [vmem:[#allocation46_spill] sm:$0xff] }
 0x27b   :  { %1214 = vmatpush1.bf16.msra.mxu0 %v6035_v8  ;;  %1255 = vmatpush1.bf16.msra.mxu1 %v6036_v9  ;;  %v6121_v8 = vld [vmem:[#allocation47_spill] sm:$0xff]  ;;  %v6122_v9 = vld [vmem:[#allocation48_spill] sm:$0xff] }
 0x27c   :  { %1215 = vmatprep.subr.bf16.mxu0 %v6037_v10  ;;  %1256 = vmatprep.subr.bf16.mxu1 %v6038_v11  ;;  %v6123_v10 = vld [vmem:[#allocation49_spill] sm:$0xff]  ;;  %v6124_v11 = vld [vmem:[#allocation50_spill] sm:$0xff] }
 0x27f   :  { %1216 = vmatpush1.bf16.msra.mxu0 %v6088_v18  ;;  %1257 = vmatpush1.bf16.msra.mxu1 %v6089_v19 }
 0x280   :  { %1217 = vmatprep.subr.bf16.mxu0 %v6090_v20  ;;  %1258 = vmatprep.subr.bf16.mxu1 %v6091_v21  ;;  %v6133_v21 = vld [vmem:[#allocation5_spill] sm:$0xff] }
 0x283   :  { %1218 = vmatpush1.bf16.msra.mxu0 %v6092_v22  ;;  %1259 = vmatpush1.bf16.msra.mxu1 %v6093_v23 }
 0x284   :  { %1219 = vmatprep.subr.bf16.mxu0 %v6094_v24  ;;  %1260 = vmatprep.subr.bf16.mxu1 %v6095_v25 }
 0x287   :  { %1220 = vmatpush1.bf16.msra.mxu0 %v6096_v26  ;;  %1261 = vmatpush1.bf16.msra.mxu1 %v6097_v27 }
 0x288   :  { %1221 = vmatprep.subr.bf16.mxu0 %v6098_v28  ;;  %1262 = vmatprep.subr.bf16.mxu1 %v6099_v29  ;;  %v6134_v29 = vld [vmem:[#allocation7_spill] sm:$0xff] }
 0x28b   :  { %1222 = vmatpush1.bf16.msra.mxu0 %v6100_v30  ;;  %1263 = vmatpush1.bf16.msra.mxu1 %v6101_v31 }
 0x28c   :  { %1223 = vmatprep.subr.bf16.mxu0 %v6102_v32  ;;  %1264 = vmatprep.subr.bf16.mxu1 %v6103_v33  ;;  %v6135_v32 = vld [vmem:[#allocation8_spill] sm:$0xff] }
 0x28f   :  { %1224 = vmatpush1.bf16.msra.mxu0 %v6104_v34  ;;  %1265 = vmatpush1.bf16.msra.mxu1 %v6105_v35 }
 0x290   :  { %1225 = vmatprep.subr.bf16.mxu0 %v6106_v36  ;;  %1266 = vmatprep.subr.bf16.mxu1 %v6107_v37 }
 0x293   :  { %1226 = vmatpush1.bf16.msra.mxu0 %v6108_v39  ;;  %1267 = vmatpush1.bf16.msra.mxu1 %v6109_v40  ;;  %v2573_v40 = vld [vmem:[%s5680_s0 + $0x20] sm:$0xff] }
 0x294   :  { %1227 = vmatprep.subr.bf16.mxu0 %v6110_v41  ;;  %1268 = vmatprep.subr.bf16.mxu1 %v6111_v42 }
 0x297   :  { %1228 = vmatpush1.bf16.msra.mxu0 %v6112_v43  ;;  %1269 = vmatpush1.bf16.msra.mxu1 %v6113_v44 }
 0x298   :  { %1229 = vmatprep.subr.bf16.mxu0 %v6114_v45  ;;  %1270 = vmatprep.subr.bf16.mxu1 %v6115_v47  ;;  %v1089_v47 = vunpack.c.l.bf16 %v2573_v40 }
 0x29b   :  { %1230 = vmatpush1.bf16.msra.mxu0 %v6116_v2  ;;  %1271 = vmatpush1.bf16.msra.mxu1 %v6117_v3  ;;  %v6136_v2 = vld [vmem:[#allocation9_spill] sm:$0xff] }
 0x29c   :  { %1231 = vmatprep.subr.bf16.mxu0 %v6118_v4  ;;  %1272 = vmatprep.subr.bf16.mxu1 %v6119_v5  ;;  %v1090_v4 = vunpack.c.h.bf16 %v2573_v40 }
 0x29f   :  { %1232 = vmatpush1.bf16.msra.mxu0 %v6120_v7  ;;  %1273 = vmatpush1.bf16.msra.mxu1 %v6121_v8 }
 0x2a0   :  { %1233 = vmatprep.subr.bf16.mxu0 %v6122_v9  ;;  %1274 = vmatprep.subr.bf16.mxu1 %v6123_v10  ;;  %v2574_v10 = vld [vmem:[%s5680_s0 + $0x28] sm:$0xff] }
 0x2a3   :  { %1234 = vmatpush1.bf16.msra.mxu0 %v6124_v11  ;;  %1275 = vmatpush1.bf16.msra.mxu1 %v6125_v60 }
 0x2a4   :  { %1235 = vmatprep.subr.bf16.mxu0 %v6126_v55  ;;  %1276 = vmatprep.subr.bf16.mxu1 %v6127_v6 }
 0x2a7   :  { %1236 = vmatpush1.bf16.msra.mxu0 %v6128_v46  ;;  %1277 = vmatpush1.bf16.msra.mxu1 %v6129_v52 }
 0x2a8   :  { %1321 = vmatprep.subr.bf16.mxu0 %v4144_v50  ;;  %1362 = vmatprep.subr.bf16.mxu1 %v4150_v62 }
 0x31d   :  { %v1011_v14 = vpop.f32.mrb[12].mxu0  ;;  %v1052_v15 = vpop.f32.mrb[12].mxu1 }
 0x31e   :  { %v1012_v18 = vadd.f32 %v1011_v14, %v6132_v61  ;;  %v1013_v19 = vpop.f32.mrb[13].mxu0  ;;  %v1054_v20 = vpop.f32.mrb[13].mxu1  ;;  %v1053_v33 = vadd.f32 %v1052_v15, %v6135_v32 }
 0x31f   :  { %v1014_v22 = vadd.f32 %v1013_v19, %v6133_v21  ;;  %v1015_v23 = vpop.f32.mrb[14].mxu0  ;;  %v1056_v24 = vpop.f32.mrb[14].mxu1  ;;  %v1055_v30 = vadd.f32 %v1054_v20, %v6134_v29  ;;  %v1092_v19 = vunpack.c.h.bf16 %v2574_v10 }
 0x320   :  { %v2569_v25 = vmul.f32 -1.442695, %v1012_v18  ;;  %v1016_v26 = vpop.f32.mrb[15].mxu0  ;;  %v1057_v27 = vpop.f32.mrb[15].mxu1 }
 0x321   :  { %v2570_v28 = vmul.f32 -1.442695, %v1014_v22  ;;  %v2571_v31 = vmul.f32 -1.442695, %v1055_v30  ;;  %v1091_v22 = vunpack.c.l.bf16 %v2574_v10  ;;  %v4234_v10 = vld [vmem:[%s5678_s1 + $0xa0] ss:$16 sps:$4 sm:$0xff]  }
 0x322   :  { %2821 = vpow2.f32 %v2569_v25 }
 0x323   :  { %2823 = vpow2.f32 %v2570_v28 }
 0x324   :  { %2825 = vpow2.f32 %v2571_v31 }
 0x325   :  { %2827 = vtanh.f32 %v1053_v33 }
 0x32c   :  { %v2822_v34 = vpop.eup %2821 }
 0x32d   :  { %v2824_v35 = vpop.eup %2823  ;;  %v1062_v36 = vadd.f32 1.0, %v2822_v34 }
 0x32e   :  { %v1068_v37 = vadd.f32 1.0, %v2824_v35  ;;  %v2826_v39 = vpop.eup %2825 }
 0x32f   :  { %2829 = vrcp.f32 %v1062_v36  ;;  %v2828_v41 = vpop.eup %2827  ;;  %v1075_v45 = vadd.f32 1.0, %v2826_v39 }
 0x330   :  { %2831 = vrcp.f32 %v1068_v37 }
 0x331   :  { %2833 = vrcp.f32 %v1075_v45 }
 0x339   :  { %v2830_v42 = vpop.eup %2829 }
 0x33a   :  { %v2832_v43 = vpop.eup %2831  ;;  %v1079_v44 = vmul.f32 %v2830_v42, %v2828_v41 }
 0x33b   :  { %v1078_v3 = vmul.f32 %v2832_v43, %v6136_v2  ;;  %v2834_v23 = vpop.eup %2833 }
 0x33d   :  { %v4161_v5 = vadd.f32 %v1079_v44, %v1078_v3  ;;  %v1127_v7 = vpop.f32.mrb[16].mxu0  ;;  %v1168_v8 = vpop.f32.mrb[16].mxu1  ;;  %v4202_v3 = vld [vmem:[%s5678_s1 + $0x68] ss:$16 sps:$4 sm:$0xff]  }
 0x33e   :  { %v1175_v9 = vadd.f32 %v1127_v7, %v1089_v47  ;;  %v1129_v11 = vpop.f32.mrb[17].mxu0  ;;  %v1170_v60 = vpop.f32.mrb[17].mxu1  ;;  %v1177_v26 = vadd.f32 %v1168_v8, %v1091_v22  ;;  %v4216_v7 = vld [vmem:[%s5678_s1 + $0x88] ss:$16 sps:$4 sm:$0xff]   ;;  %v4222_v8 = vld [vmem:[%s5678_s1 + $0xa4] ss:$16 sps:$4 sm:$0xff]  }
 0x33f   :  { %v1176_v55 = vadd.f32 %v1129_v11, %v1090_v4  ;;  %v1131_v6 = vpop.f32.mrb[18].mxu0  ;;  %v1172_v46 = vpop.f32.mrb[18].mxu1  ;;  %2835 = vtanh.f32 %v4161_v5  ;;  %v1178_v20 = vadd.f32 %v1170_v60, %v1092_v19  ;;  %v4209_v4 = vld [vmem:[%s5678_s1 + $0x8c] ss:$16 sps:$4 sm:$0xff]   ;;  %v4240_v11 = vld [vmem:[%s5678_s1 + $0xa8] ss:$16 sps:$4 sm:$0xff]  }
 0x340   :  { %v2575_v52 = vmul.f32 -1.442695, %v1175_v9  ;;  %v1132_v14 = vpop.f32.mrb[19].mxu0  ;;  %v1173_v15 = vpop.f32.mrb[19].mxu1  ;;  %v4228_v9 = vld [vmem:[%s5678_s1 + $0xac] ss:$16 sps:$4 sm:$0xff]  }
 0x341   :  { %v2576_v18 = vmul.f32 -1.442695, %v1176_v55  ;;  %v2577_v25 = vmul.f32 -1.442695, %v1178_v20  ;;  %v4246_v60 = vld [vmem:[%s5678_s1 + $0xc4] ss:$16 sps:$4 sm:$0xff]  }
 0x342   :  { %2837 = vpow2.f32 %v2575_v52  ;;  %v4252_v55 = vld [vmem:[%s5678_s1 + $0xcc] ss:$16 sps:$4 sm:$0xff]   ;;  %v4258_v6 = vld [vmem:[%s5678_s1 + $0xc0] ss:$16 sps:$4 sm:$0xff]   ;;  %v4264_v46 = vld [vmem:[%s5678_s1 + $0xc8] ss:$16 sps:$4 sm:$0xff]  }
 0x343   :  { %2839 = vpow2.f32 %v2576_v18  ;;  %v4270_v52 = vld [vmem:[%s5678_s1 + $0xe4] ss:$16 sps:$4 sm:$0xff]   ;;  %v4276_v14 = vld [vmem:[%s5678_s1 + $0xec] ss:$16 sps:$4 sm:$0xff]   ;;  %v4282_v15 = vld [vmem:[%s5678_s1 + $0xe0] ss:$16 sps:$4 sm:$0xff]  }
 0x344   :  { %2841 = vpow2.f32 %v2577_v25  ;;  %v4288_v18 = vld [vmem:[%s5678_s1 + $0xe8] ss:$16 sps:$4 sm:$0xff]   ;;  %v4294_v19 = vld [vmem:[%s5679_s2 + $0x4] ss:$16 sps:$4 sm:$0xff]   ;;  %v4300_v20 = vld [vmem:[%s5679_s2 + $0xc] ss:$16 sps:$4 sm:$0xff]  }
 0x345   :  { %2843 = vtanh.f32 %v1177_v26  ;;  %v4306_v22 = vld [vmem:[%s5679_s2] ss:$16 sps:$4 sm:$0xff]   ;;  %v4324_v25 = vld [vmem:[%s5679_s2 + $0x2c] ss:$16 sps:$4 sm:$0xff]  }
 0x346   :  { %v4330_v26 = vld [vmem:[%s5679_s2 + $0x20] ss:$16 sps:$4 sm:$0xff]  }
 0x349   :  { %v2836_v24 = vpop.eup %2835 }
 0x34a   :  { %v1082_v27 = vmul.f32 %v2836_v24, %v2834_v23  ;;  %v4312_v23 = vld [vmem:[%s5679_s2 + $0x8] ss:$16 sps:$4 sm:$0xff]   ;;  %v4318_v24 = vld [vmem:[%s5679_s2 + $0x24] ss:$16 sps:$4 sm:$0xff]  }
 0x34c   :  { %v2838_v28 = vpop.eup %2837  ;;  %v1083_v30 = vadd.f32 %v1082_v27, %v3971_v49  ;;  %v1204_v31 = vpack.c.bf16 %v1082_v27, %v1082_v27  ;;  %v4336_v27 = vld [vmem:[%s5679_s2 + $0x28] ss:$16 sps:$4 sm:$0xff]  }
 0x34d   :  { %v2840_v33 = vpop.eup %2839  ;;  %v1182_v34 = vadd.f32 1.0, %v2838_v28  ;;  %v4342_v28 = vld [vmem:[%s5679_s2 + $0x44] ss:$16 sps:$4 sm:$0xff]  }
 0x34e   :  { %v1188_v35 = vadd.f32 1.0, %v2840_v33  ;;  %2572 = vst [vmem:[%s5682_s4 + $0x8] sm:$0xff] %v1083_v30  ;;  %1237 = vmatprep.mubr.bf16.mxu0 %v1204_v31  ;;  %1278 = vmatprep.mubr.bf16.mxu1 %v1204_v31  ;;  %v2842_v36 = vpop.eup %2841  ;;  %6137 = vst [vmem:[#allocation12_spill] sm:$0xff] %v4342_v28  ;;  %v4348_v30 = vld [vmem:[%s5679_s2 + $0x4c] ss:$16 sps:$4 sm:$0xff]  }
 0x34f   :  { %2845 = vrcp.f32 %v1182_v34  ;;  %v2844_v37 = vpop.eup %2843  ;;  %v1195_v49 = vadd.f32 1.0, %v2842_v36  ;;  %6138 = vst [vmem:[#allocation13_spill] sm:$0xff] %v4348_v30  ;;  %v4354_v31 = vld [vmem:[%s5679_s2 + $0x40] ss:$16 sps:$4 sm:$0xff]   ;;  %v4360_v33 = vld [vmem:[%s5679_s2 + $0x48] ss:$16 sps:$4 sm:$0xff]  }
 0x350   :  { %2847 = vrcp.f32 %v1188_v35  ;;  %6139 = vst [vmem:[#allocation3_spill] sm:$0xff] %v4354_v31  ;;  %6140 = vst [vmem:[#allocation4_spill] sm:$0xff] %v4360_v33  ;;  %v4366_v34 = vld [vmem:[%s5679_s2 + $0x64] ss:$16 sps:$4 sm:$0xff]   ;;  %v4372_v35 = vld [vmem:[%s5679_s2 + $0x6c] ss:$16 sps:$4 sm:$0xff]  }
 0x351   :  { %2849 = vrcp.f32 %v1195_v49  ;;  %6141 = vst [vmem:[#allocation14_spill] sm:$0xff] %v4366_v34  ;;  %6142 = vst [vmem:[#allocation15_spill] sm:$0xff] %v4372_v35  ;;  %v4378_v36 = vld [vmem:[%s5679_s2 + $0x60] ss:$16 sps:$4 sm:$0xff]   ;;  %v4408_v49 = vld [vmem:[%s5679_s2 + $0x88] ss:$16 sps:$4 sm:$0xff]  }
 0x352   :  { %6143 = vst [vmem:[#allocation16_spill] sm:$0xff] %v4378_v36  ;;  %6148 = vst [vmem:[#allocation21_spill] sm:$0xff] %v4408_v49 }
 0x359   :  { %v2846_v39 = vpop.eup %2845 }
 0x35a   :  { %v2848_v40 = vpop.eup %2847  ;;  %v1199_v41 = vmul.f32 %v2846_v39, %v2844_v37  ;;  %v4384_v37 = vld [vmem:[%s5679_s2 + $0x68] ss:$16 sps:$4 sm:$0xff]   ;;  %v4390_v39 = vld [vmem:[%s5679_s2 + $0x84] ss:$16 sps:$4 sm:$0xff]  }
 0x35b   :  { %v1198_v42 = vmul.f32 %v2848_v40, %v3968_v12  ;;  %v2850_v44 = vpop.eup %2849  ;;  %v4195_v12 = vld [vmem:[%s5678_s1 + $0x6c] ss:$16 sps:$4 sm:$0xff]   ;;  %6144 = vst [vmem:[#allocation17_spill] sm:$0xff] %v4384_v37  ;;  %6145 = vst [vmem:[#allocation18_spill] sm:$0xff] %v4390_v39 }
 0x35c   :  { %v4396_v40 = vld [vmem:[%s5679_s2 + $0x8c] ss:$16 sps:$4 sm:$0xff]  }
 0x35d   :  { %v4172_v43 = vadd.f32 %v1199_v41, %v1198_v42  ;;  %6146 = vst [vmem:[#allocation19_spill] sm:$0xff] %v4396_v40  ;;  %v4402_v41 = vld [vmem:[%s5679_s2 + $0x80] ss:$16 sps:$4 sm:$0xff]   ;;  %v4414_v42 = vld [vmem:[%s5679_s2 + $0xa4] ss:$16 sps:$4 sm:$0xff]  }
 0x35e   :  { %6147 = vst [vmem:[#allocation20_spill] sm:$0xff] %v4402_v41  ;;  %6149 = vst [vmem:[#allocation22_spill] sm:$0xff] %v4414_v42 }
 0x35f   :  { %2851 = vtanh.f32 %v4172_v43 }
 0x369   :  { %v2852_v45 = vpop.eup %2851 }
 0x36a   :  { %v4175_v47 = vmul.f32 %v2852_v45, %v2850_v44  ;;  %v4420_v44 = vld [vmem:[%s5679_s2 + $0xac] ss:$16 sps:$4 sm:$0xff]   ;;  %v4426_v45 = vld [vmem:[%s5679_s2 + $0xa0] ss:$16 sps:$4 sm:$0xff]  }
 0x36b   :  { %6150 = vst [vmem:[#allocation23_spill] sm:$0xff] %v4420_v44  ;;  %6151 = vst [vmem:[#allocation24_spill] sm:$0xff] %v4426_v45 }
 0x36c   :  { %v1203_v2 = vpack.c.bf16 %v4175_v47, %v4175_v47 }
 0x36e   :  { %1238 = vmatmul.mubr.bf16.vlgmr.msra.gmra.mrb[20].mxu0 %v1203_v2  ;;  %1279 = vmatmul.mubr.bf16.vlgmr.msra.gmra.mrb[20].mxu1 %v1203_v2 }
 0x36f   :  { %1322 = vmatpush1.bf16.msra.mxu0 %v3978_v38  ;;  %1363 = vmatpush1.bf16.msra.mxu1 %v3984_v51 }
 0x370   :  { %1323 = vmatprep.subr.bf16.mxu0 %v3990_v17  ;;  %1364 = vmatprep.subr.bf16.mxu1 %v3996_v58 }
 0x371   :  { %1353 = vmatprep.mubr.bf16.mxu0 %v6029_v48  ;;  %1394 = vmatprep.mubr.bf16.mxu1 %v6029_v48 }
 0x373   :  { %1324 = vmatpush1.bf16.msra.mxu0 %v4004_v1  ;;  %1365 = vmatpush1.bf16.msra.mxu1 %v4010_v56 }
 0x374   :  { %1325 = vmatprep.subr.bf16.mxu0 %v4016_v57  ;;  %1366 = vmatprep.subr.bf16.mxu1 %v4022_v63 }
 0x377   :  { %1326 = vmatpush1.bf16.msra.mxu0 %v4028_v13  ;;  %1367 = vmatpush1.bf16.msra.mxu1 %v4034_v0 }
 0x378   :  { %1327 = vmatprep.subr.bf16.mxu0 %v4040_v54  ;;  %1368 = vmatprep.subr.bf16.mxu1 %v4195_v12 }
 0x37b   :  { %1328 = vmatpush1.bf16.msra.mxu0 %v4047_v53  ;;  %1369 = vmatpush1.bf16.msra.mxu1 %v4202_v3 }
 0x37c   :  { %1329 = vmatprep.subr.bf16.mxu0 %v4054_v59  ;;  %1370 = vmatprep.subr.bf16.mxu1 %v4209_v4 }
 0x37f   :  { %1330 = vmatpush1.bf16.msra.mxu0 %v4061_v16  ;;  %1371 = vmatpush1.bf16.msra.mxu1 %v4216_v7 }
 0x380   :  { %1331 = vmatprep.subr.bf16.mxu0 %v4222_v8  ;;  %1372 = vmatprep.subr.bf16.mxu1 %v4228_v9 }
 0x383   :  { %1332 = vmatpush1.bf16.msra.mxu0 %v4234_v10  ;;  %1373 = vmatpush1.bf16.msra.mxu1 %v4240_v11 }
 0x384   :  { %1333 = vmatprep.subr.bf16.mxu0 %v4246_v60  ;;  %1374 = vmatprep.subr.bf16.mxu1 %v4252_v55 }
 0x387   :  { %1334 = vmatpush1.bf16.msra.mxu0 %v4258_v6  ;;  %1375 = vmatpush1.bf16.msra.mxu1 %v4264_v46 }
 0x388   :  { %1335 = vmatprep.subr.bf16.mxu0 %v4270_v52  ;;  %1376 = vmatprep.subr.bf16.mxu1 %v4276_v14 }
 0x38b   :  { %1336 = vmatpush1.bf16.msra.mxu0 %v4282_v15  ;;  %1377 = vmatpush1.bf16.msra.mxu1 %v4288_v18 }
 0x38c   :  { %1433 = vmatprep.subr.bf16.mxu0 %v4294_v19  ;;  %1474 = vmatprep.subr.bf16.mxu1 %v4300_v20 }
 0x38e   :  { %1354 = vmatmul.mubr.bf16.vlgmr.msra.gmra.mrb[24].mxu0 %v1203_v2  ;;  %1395 = vmatmul.mubr.bf16.vlgmr.msra.gmra.mrb[24].mxu1 %v1203_v2  ;;  %v4432_v2 = vld [vmem:[%s5679_s2 + $0xa8] ss:$16 sps:$4 sm:$0xff]  }
 0x38f   :  { %1434 = vmatpush1.bf16.msra.mxu0 %v4306_v22  ;;  %1475 = vmatpush1.bf16.msra.mxu1 %v4312_v23  ;;  %6152 = vst [vmem:[#allocation25_spill] sm:$0xff] %v4432_v2 }
 0x390   :  { %1435 = vmatprep.subr.bf16.mxu0 %v4318_v24  ;;  %1476 = vmatprep.subr.bf16.mxu1 %v4324_v25 }
 0x393   :  { %1436 = vmatpush1.bf16.msra.mxu0 %v4330_v26  ;;  %1477 = vmatpush1.bf16.msra.mxu1 %v4336_v27 }
 0x394   :  { %1437 = vmatprep.subr.bf16.mxu0 %v4342_v28  ;;  %1478 = vmatprep.subr.bf16.mxu1 %v4348_v30 }
 0x397   :  { %1438 = vmatpush1.bf16.msra.mxu0 %v4354_v31  ;;  %1479 = vmatpush1.bf16.msra.mxu1 %v4360_v33 }
 0x398   :  { %1439 = vmatprep.subr.bf16.mxu0 %v4366_v34  ;;  %1480 = vmatprep.subr.bf16.mxu1 %v4372_v35 }
 0x39b   :  { %1440 = vmatpush1.bf16.msra.mxu0 %v4378_v36  ;;  %1481 = vmatpush1.bf16.msra.mxu1 %v4384_v37 }
 0x39c   :  { %1441 = vmatprep.subr.bf16.mxu0 %v4390_v39  ;;  %1482 = vmatprep.subr.bf16.mxu1 %v4396_v40 }
 0x39f   :  { %1442 = vmatpush1.bf16.msra.mxu0 %v4402_v41  ;;  %1483 = vmatpush1.bf16.msra.mxu1 %v4408_v49 }
 0x3a0   :  { %1443 = vmatprep.subr.bf16.mxu0 %v4414_v42  ;;  %1484 = vmatprep.subr.bf16.mxu1 %v4420_v44  ;;  %v4438_v42 = vld [vmem:[%s5679_s2 + $0xc4] ss:$16 sps:$4 sm:$0xff]   ;;  %v4444_v44 = vld [vmem:[%s5679_s2 + $0xcc] ss:$16 sps:$4 sm:$0xff]  }
 0x3a1   :  { %6153 = vst [vmem:[#allocation26_spill] sm:$0xff] %v4438_v42  ;;  %6154 = vst [vmem:[#allocation27_spill] sm:$0xff] %v4444_v44 }
 0x3a3   :  { %1444 = vmatpush1.bf16.msra.mxu0 %v4426_v45  ;;  %1485 = vmatpush1.bf16.msra.mxu1 %v4432_v2  ;;  %v4450_v45 = vld [vmem:[%s5679_s2 + $0xc0] ss:$16 sps:$4 sm:$0xff]   ;;  %v4456_v2 = vld [vmem:[%s5679_s2 + $0xc8] ss:$16 sps:$4 sm:$0xff]  }
 0x3a4   :  { %1445 = vmatprep.subr.bf16.mxu0 %v4438_v42  ;;  %1486 = vmatprep.subr.bf16.mxu1 %v4444_v44  ;;  %6155 = vst [vmem:[#allocation28_spill] sm:$0xff] %v4450_v45  ;;  %6156 = vst [vmem:[#allocation29_spill] sm:$0xff] %v4456_v2  ;;  %v4462_v42 = vld [vmem:[%s5679_s2 + $0xe4] ss:$16 sps:$4 sm:$0xff]   ;;  %v4468_v44 = vld [vmem:[%s5679_s2 + $0xec] ss:$16 sps:$4 sm:$0xff]  }
 0x3a5   :  { %6157 = vst [vmem:[#allocation30_spill] sm:$0xff] %v4462_v42  ;;  %6158 = vst [vmem:[#allocation31_spill] sm:$0xff] %v4468_v44 }
 0x3a7   :  { %1446 = vmatpush1.bf16.msra.mxu0 %v4450_v45  ;;  %1487 = vmatpush1.bf16.msra.mxu1 %v4456_v2  ;;  %v4474_v45 = vld [vmem:[%s5679_s2 + $0xe0] ss:$16 sps:$4 sm:$0xff]   ;;  %v4480_v2 = vld [vmem:[%s5679_s2 + $0xe8] ss:$16 sps:$4 sm:$0xff]  }
 0x3a8   :  { %1447 = vmatprep.subr.bf16.mxu0 %v4462_v42  ;;  %1488 = vmatprep.subr.bf16.mxu1 %v4468_v44  ;;  %6159 = vst [vmem:[#allocation32_spill] sm:$0xff] %v4474_v45  ;;  %6160 = vst [vmem:[#allocation33_spill] sm:$0xff] %v4480_v2  ;;  %v4486_v42 = vld [vmem:[%s5679_s2 + $0x104] ss:$16 sps:$4 sm:$0xff]   ;;  %v4492_v44 = vld [vmem:[%s5679_s2 + $0x10c] ss:$16 sps:$4 sm:$0xff]  }
 0x3a9   :  { %6161 = vst [vmem:[#allocation34_spill] sm:$0xff] %v4486_v42  ;;  %6162 = vst [vmem:[#allocation35_spill] sm:$0xff] %v4492_v44 }
 0x3ab   :  { %1448 = vmatpush1.bf16.msra.mxu0 %v4474_v45  ;;  %1489 = vmatpush1.bf16.msra.mxu1 %v4480_v2  ;;  %v4498_v45 = vld [vmem:[%s5679_s2 + $0x100] ss:$16 sps:$4 sm:$0xff]   ;;  %v4504_v2 = vld [vmem:[%s5679_s2 + $0x108] ss:$16 sps:$4 sm:$0xff]  }
 0x3ac   :  { %1449 = vmatprep.subr.bf16.mxu0 %v4486_v42  ;;  %1490 = vmatprep.subr.bf16.mxu1 %v4492_v44  ;;  %6163 = vst [vmem:[#allocation36_spill] sm:$0xff] %v4498_v45  ;;  %6164 = vst [vmem:[#allocation37_spill] sm:$0xff] %v4504_v2  ;;  %v4510_v42 = vld [vmem:[%s5679_s2 + $0x124] ss:$16 sps:$4 sm:$0xff]   ;;  %v4516_v44 = vld [vmem:[%s5679_s2 + $0x12c] ss:$16 sps:$4 sm:$0xff]  }
 0x3ad   :  { %6165 = vst [vmem:[#allocation38_spill] sm:$0xff] %v4510_v42  ;;  %6166 = vst [vmem:[#allocation39_spill] sm:$0xff] %v4516_v44 }
 0x3af   :  { %1450 = vmatpush1.bf16.msra.mxu0 %v4498_v45  ;;  %1491 = vmatpush1.bf16.msra.mxu1 %v4504_v2  ;;  %v4522_v45 = vld [vmem:[%s5679_s2 + $0x120] ss:$16 sps:$4 sm:$0xff]   ;;  %v4528_v2 = vld [vmem:[%s5679_s2 + $0x128] ss:$16 sps:$4 sm:$0xff]  }
 0x3b0   :  { %1451 = vmatprep.subr.bf16.mxu0 %v4510_v42  ;;  %1492 = vmatprep.subr.bf16.mxu1 %v4516_v44  ;;  %6167 = vst [vmem:[#allocation40_spill] sm:$0xff] %v4522_v45  ;;  %6168 = vst [vmem:[#allocation41_spill] sm:$0xff] %v4528_v2  ;;  %v4534_v42 = vld [vmem:[%s5679_s2 + $0x144] ss:$16 sps:$4 sm:$0xff]   ;;  %v4540_v44 = vld [vmem:[%s5679_s2 + $0x14c] ss:$16 sps:$4 sm:$0xff]  }
 0x3b1   :  { %6169 = vst [vmem:[#allocation42_spill] sm:$0xff] %v4534_v42  ;;  %6170 = vst [vmem:[#allocation43_spill] sm:$0xff] %v4540_v44 }
 0x3b3   :  { %1452 = vmatpush1.bf16.msra.mxu0 %v4522_v45  ;;  %1493 = vmatpush1.bf16.msra.mxu1 %v4528_v2  ;;  %v4546_v45 = vld [vmem:[%s5679_s2 + $0x140] ss:$16 sps:$4 sm:$0xff]   ;;  %v4552_v2 = vld [vmem:[%s5679_s2 + $0x148] ss:$16 sps:$4 sm:$0xff]  }
 0x3b4   :  { %1453 = vmatprep.subr.bf16.mxu0 %v4534_v42  ;;  %1494 = vmatprep.subr.bf16.mxu1 %v4540_v44  ;;  %6171 = vst [vmem:[#allocation44_spill] sm:$0xff] %v4546_v45  ;;  %6172 = vst [vmem:[#allocation45_spill] sm:$0xff] %v4552_v2  ;;  %v4558_v42 = vld [vmem:[%s5679_s2 + $0x164] ss:$16 sps:$4 sm:$0xff]   ;;  %v4564_v44 = vld [vmem:[%s5679_s2 + $0x16c] ss:$16 sps:$4 sm:$0xff]  }
 0x3b5   :  { %6173 = vst [vmem:[#allocation46_spill] sm:$0xff] %v4558_v42  ;;  %6174 = vst [vmem:[#allocation47_spill] sm:$0xff] %v4564_v44 }
 0x3b7   :  { %1454 = vmatpush1.bf16.msra.mxu0 %v4546_v45  ;;  %1495 = vmatpush1.bf16.msra.mxu1 %v4552_v2  ;;  %v4570_v45 = vld [vmem:[%s5679_s2 + $0x160] ss:$16 sps:$4 sm:$0xff]   ;;  %v4576_v2 = vld [vmem:[%s5679_s2 + $0x168] ss:$16 sps:$4 sm:$0xff]  }
 0x3b8   :  { %1455 = vmatprep.subr.bf16.mxu0 %v4558_v42  ;;  %1496 = vmatprep.subr.bf16.mxu1 %v4564_v44  ;;  %6175 = vst [vmem:[#allocation48_spill] sm:$0xff] %v4570_v45  ;;  %6176 = vst [vmem:[#allocation49_spill] sm:$0xff] %v4576_v2  ;;  %v4582_v42 = vld [vmem:[%s5679_s2 + $0x184] ss:$16 sps:$4 sm:$0xff]   ;;  %v4588_v44 = vld [vmem:[%s5679_s2 + $0x18c] ss:$16 sps:$4 sm:$0xff]  }
 0x3b9   :  { %6177 = vst [vmem:[#allocation50_spill] sm:$0xff] %v4582_v42  ;;  %6178 = vst [vmem:[#allocation51_spill] sm:$0xff] %v4588_v44 }
 0x3bb   :  { %1456 = vmatpush1.bf16.msra.mxu0 %v4570_v45  ;;  %1497 = vmatpush1.bf16.msra.mxu1 %v4576_v2  ;;  %v4594_v45 = vld [vmem:[%s5679_s2 + $0x180] ss:$16 sps:$4 sm:$0xff]   ;;  %v4600_v2 = vld [vmem:[%s5679_s2 + $0x188] ss:$16 sps:$4 sm:$0xff]  }
 0x3bc   :  { %1457 = vmatprep.subr.bf16.mxu0 %v4582_v42  ;;  %1498 = vmatprep.subr.bf16.mxu1 %v4588_v44  ;;  %6179 = vst [vmem:[#allocation52_spill] sm:$0xff] %v4594_v45  ;;  %6180 = vst [vmem:[#allocation53_spill] sm:$0xff] %v4600_v2  ;;  %v4606_v42 = vld [vmem:[%s5679_s2 + $0x1a4] ss:$16 sps:$4 sm:$0xff]   ;;  %v4612_v44 = vld [vmem:[%s5679_s2 + $0x1ac] ss:$16 sps:$4 sm:$0xff]  }
 0x3bd   :  { %6181 = vst [vmem:[#allocation54_spill] sm:$0xff] %v4606_v42  ;;  %6182 = vst [vmem:[#allocation55_spill] sm:$0xff] %v4612_v44 }
 0x3bf   :  { %1458 = vmatpush1.bf16.msra.mxu0 %v4594_v45  ;;  %1499 = vmatpush1.bf16.msra.mxu1 %v4600_v2  ;;  %v4618_v45 = vld [vmem:[%s5679_s2 + $0x1a0] ss:$16 sps:$4 sm:$0xff]   ;;  %v4624_v2 = vld [vmem:[%s5679_s2 + $0x1a8] ss:$16 sps:$4 sm:$0xff]  }
 0x3c0   :  { %1459 = vmatprep.subr.bf16.mxu0 %v4606_v42  ;;  %1500 = vmatprep.subr.bf16.mxu1 %v4612_v44  ;;  %6183 = vst [vmem:[#allocation9_spill] sm:$0xff] %v4618_v45  ;;  %6184 = vst [vmem:[#allocation56_spill] sm:$0xff] %v4624_v2  ;;  %v4630_v42 = vld [vmem:[%s5679_s2 + $0x1c4] ss:$16 sps:$4 sm:$0xff]   ;;  %v4636_v44 = vld [vmem:[%s5679_s2 + $0x1cc] ss:$16 sps:$4 sm:$0xff]  }
 0x3c1   :  { %6185 = vst [vmem:[#allocation57_spill] sm:$0xff] %v4630_v42  ;;  %6186 = vst [vmem:[#allocation58_spill] sm:$0xff] %v4636_v44 }
 0x3c3   :  { %1460 = vmatpush1.bf16.msra.mxu0 %v4618_v45  ;;  %1501 = vmatpush1.bf16.msra.mxu1 %v4624_v2  ;;  %v4642_v45 = vld [vmem:[%s5679_s2 + $0x1c0] ss:$16 sps:$4 sm:$0xff]   ;;  %v4648_v2 = vld [vmem:[%s5679_s2 + $0x1c8] ss:$16 sps:$4 sm:$0xff]  }
 0x3c4   :  { %1461 = vmatprep.subr.bf16.mxu0 %v4630_v42  ;;  %1502 = vmatprep.subr.bf16.mxu1 %v4636_v44  ;;  %6187 = vst [vmem:[#allocation59_spill] sm:$0xff] %v4642_v45  ;;  %6188 = vst [vmem:[#allocation60_spill] sm:$0xff] %v4648_v2  ;;  %v4654_v42 = vld [vmem:[%s5679_s2 + $0x1e4] ss:$16 sps:$4 sm:$0xff]   ;;  %v4660_v44 = vld [vmem:[%s5679_s2 + $0x1ec] ss:$16 sps:$4 sm:$0xff]  }
 0x3c5   :  { %6189 = vst [vmem:[#allocation61_spill] sm:$0xff] %v4654_v42  ;;  %6190 = vst [vmem:[#allocation62_spill] sm:$0xff] %v4660_v44 }
 0x3c7   :  { %1462 = vmatpush1.bf16.msra.mxu0 %v4642_v45  ;;  %1503 = vmatpush1.bf16.msra.mxu1 %v4648_v2  ;;  %v4666_v45 = vld [vmem:[%s5679_s2 + $0x1e0] ss:$16 sps:$4 sm:$0xff]   ;;  %v4672_v2 = vld [vmem:[%s5679_s2 + $0x1e8] ss:$16 sps:$4 sm:$0xff]  }
 0x3c8   :  { %1463 = vmatprep.subr.bf16.mxu0 %v4654_v42  ;;  %1504 = vmatprep.subr.bf16.mxu1 %v4660_v44  ;;  %6191 = vst [vmem:[#allocation63_spill] sm:$0xff] %v4666_v45  ;;  %6192 = vst [vmem:[#allocation64_spill] sm:$0xff] %v4672_v2 }
 0x3cb   :  { %1464 = vmatpush1.bf16.msra.mxu0 %v4666_v45  ;;  %1505 = vmatpush1.bf16.msra.mxu1 %v4672_v2 }
 0x3cc   :  { %1549 = vmatprep.subr.bf16.mxu0 %v4144_v50  ;;  %1590 = vmatprep.subr.bf16.mxu1 %v4150_v62 }
 0x441   :  { %v1239_v42 = vpop.f32.mrb[20].mxu0  ;;  %v1280_v44 = vpop.f32.mrb[20].mxu1 }
 0x442   :  { %v1240_v49 = vadd.f32 %v1239_v42, %v6132_v61  ;;  %v1241_v41 = vpop.f32.mrb[21].mxu0  ;;  %v1282_v40 = vpop.f32.mrb[21].mxu1  ;;  %v1281_v62 = vadd.f32 %v1280_v44, %v6135_v32  ;;  %v2583_v44 = vld [vmem:[%s5680_s0 + $0x38] sm:$0xff] }
 0x443   :  { %v1242_v39 = vadd.f32 %v1241_v41, %v6133_v21  ;;  %v1243_v45 = vpop.f32.mrb[22].mxu0  ;;  %v1284_v37 = vpop.f32.mrb[22].mxu1  ;;  %v1283_v50 = vadd.f32 %v1282_v40, %v6134_v29 }
 0x444   :  { %v2578_v36 = vmul.f32 -1.442695, %v1240_v49  ;;  %v1244_v35 = vpop.f32.mrb[23].mxu0  ;;  %v1285_v34 = vpop.f32.mrb[23].mxu1 }
 0x445   :  { %v2579_v33 = vmul.f32 -1.442695, %v1242_v39  ;;  %v2580_v2 = vmul.f32 -1.442695, %v1283_v50  ;;  %v2582_v34 = vld [vmem:[%s5680_s0 + $0x30] sm:$0xff] }
 0x446   :  { %2853 = vpow2.f32 %v2578_v36  ;;  %v1317_v40 = vunpack.c.l.bf16 %v2582_v34  ;;  %v1318_v49 = vunpack.c.h.bf16 %v2582_v34 }
 0x447   :  { %2855 = vpow2.f32 %v2579_v33 }
 0x448   :  { %2857 = vpow2.f32 %v2580_v2 }
 0x449   :  { %2859 = vtanh.f32 %v1281_v62 }
 0x450   :  { %v2854_v31 = vpop.eup %2853 }
 0x451   :  { %v2856_v30 = vpop.eup %2855  ;;  %v1290_v42 = vadd.f32 1.0, %v2854_v31 }
 0x452   :  { %v1296_v61 = vadd.f32 1.0, %v2856_v30  ;;  %v2858_v37 = vpop.eup %2857 }
 0x453   :  { %2861 = vrcp.f32 %v1290_v42  ;;  %v2860_v35 = vpop.eup %2859  ;;  %v1303_v50 = vadd.f32 1.0, %v2858_v37 }
 0x454   :  { %2863 = vrcp.f32 %v1296_v61 }
 0x455   :  { %2865 = vrcp.f32 %v1303_v50  ;;  %v1319_v50 = vunpack.c.l.bf16 %v2583_v44 }
 0x45d   :  { %v2862_v33 = vpop.eup %2861 }
 0x45e   :  { %v2864_v36 = vpop.eup %2863  ;;  %v1307_v39 = vmul.f32 %v2862_v33, %v2860_v35 }
 0x45f   :  { %v1306_v41 = vmul.f32 %v2864_v36, %v4161_v5  ;;  %v1320_v36 = vunpack.c.h.bf16 %v2583_v44 }
 0x461   :  { %v4685_v31 = vadd.f32 %v1307_v39, %v1306_v41  ;;  %v1355_v62 = vpop.f32.mrb[24].mxu0  ;;  %v1396_v30 = vpop.f32.mrb[24].mxu1 }
 0x462   :  { %v1403_v61 = vadd.f32 %v1355_v62, %v1317_v40  ;;  %v1357_v45 = vpop.f32.mrb[25].mxu0  ;;  %v1398_v2 = vpop.f32.mrb[25].mxu1  ;;  %v1405_v29 = vadd.f32 %v1396_v30, %v1319_v50  ;;  %v6210_v50 = vld [vmem:[#allocation27_spill] sm:$0xff] }
 0x463   :  { %v1404_v42 = vadd.f32 %v1357_v45, %v1318_v49  ;;  %v1359_v32 = vpop.f32.mrb[26].mxu0  ;;  %v1400_v35 = vpop.f32.mrb[26].mxu1  ;;  %2867 = vtanh.f32 %v4685_v31  ;;  %v1406_v39 = vadd.f32 %v1398_v2, %v1320_v36  ;;  %v6208_v36 = vld [vmem:[#allocation25_spill] sm:$0xff] }
 0x464   :  { %v2584_v37 = vmul.f32 -1.442695, %v1403_v61  ;;  %v1360_v5 = vpop.f32.mrb[27].mxu0  ;;  %v1401_v34 = vpop.f32.mrb[27].mxu1 }
 0x465   :  { %v2585_v33 = vmul.f32 -1.442695, %v1404_v42  ;;  %v2866_v40 = vpop.eup %2865  ;;  %v2586_v62 = vmul.f32 -1.442695, %v1406_v39  ;;  %v6209_v39 = vld [vmem:[#allocation26_spill] sm:$0xff] }
 0x466   :  { %2869 = vpow2.f32 %v2584_v37 }
 0x467   :  { %2871 = vpow2.f32 %v2585_v33 }
 0x468   :  { %2873 = vpow2.f32 %v2586_v62  ;;  %v6213_v62 = vld [vmem:[#allocation30_spill] sm:$0xff] }
 0x469   :  { %2875 = vtanh.f32 %v1405_v29 }
 0x46d   :  { %v2868_v41 = vpop.eup %2867 }
 0x46e   :  { %v1310_v21 = vmul.f32 %v2868_v41, %v2866_v40  ;;  %v6211_v40 = vld [vmem:[#allocation28_spill] sm:$0xff]  ;;  %v6212_v41 = vld [vmem:[#allocation29_spill] sm:$0xff] }
 0x470   :  { %v2870_v28 = vpop.eup %2869  ;;  %v1311_v32 = vadd.f32 %v1310_v21, %v4175_v47  ;;  %v1432_v49 = vpack.c.bf16 %v1310_v21, %v1310_v21 }
 0x471   :  { %v2872_v45 = vpop.eup %2871  ;;  %v1410_v35 = vadd.f32 1.0, %v2870_v28 }
 0x472   :  { %v1416_v61 = vadd.f32 1.0, %v2872_v45  ;;  %2581 = vst [vmem:[%s5682_s4 + $0x10] sm:$0xff] %v1311_v32  ;;  %1465 = vmatprep.mubr.bf16.mxu0 %v1432_v49  ;;  %1506 = vmatprep.mubr.bf16.mxu1 %v1432_v49  ;;  %v2874_v44 = vpop.eup %2873  ;;  %v6214_v32 = vld [vmem:[#allocation31_spill] sm:$0xff]  ;;  %v6215_v49 = vld [vmem:[#allocation32_spill] sm:$0xff]  ;;  %v6216_v45 = vld [vmem:[#allocation33_spill] sm:$0xff] }
 0x473   :  { %2877 = vrcp.f32 %v1410_v35  ;;  %v2876_v30 = vpop.eup %2875  ;;  %v1423_v47 = vadd.f32 1.0, %v2874_v44  ;;  %v6217_v35 = vld [vmem:[#allocation34_spill] sm:$0xff]  ;;  %v6219_v44 = vld [vmem:[#allocation36_spill] sm:$0xff] }
 0x474   :  { %2879 = vrcp.f32 %v1416_v61  ;;  %v6218_v61 = vld [vmem:[#allocation35_spill] sm:$0xff] }
 0x475   :  { %2881 = vrcp.f32 %v1423_v47  ;;  %v6224_v47 = vld [vmem:[#allocation41_spill] sm:$0xff] }
 0x47d   :  { %v2878_v2 = vpop.eup %2877 }
 0x47e   :  { %v2880_v42 = vpop.eup %2879  ;;  %v1427_v37 = vmul.f32 %v2878_v2, %v2876_v30  ;;  %v6220_v30 = vld [vmem:[#allocation37_spill] sm:$0xff]  ;;  %v6221_v2 = vld [vmem:[#allocation38_spill] sm:$0xff] }
 0x47f   :  { %v1426_v21 = vmul.f32 %v2880_v42, %v4172_v43  ;;  %v2882_v29 = vpop.eup %2881  ;;  %v6207_v43 = vld [vmem:[#allocation24_spill] sm:$0xff]  ;;  %v6222_v42 = vld [vmem:[#allocation39_spill] sm:$0xff] }
 0x481   :  { %v4696_v28 = vadd.f32 %v1427_v37, %v1426_v21  ;;  %v6223_v37 = vld [vmem:[#allocation40_spill] sm:$0xff]  ;;  %v6225_v21 = vld [vmem:[#allocation42_spill] sm:$0xff] }
 0x483   :  { %2883 = vtanh.f32 %v4696_v28 }
 0x48d   :  { %v2884_v5 = vpop.eup %2883 }
 0x48e   :  { %v4699_v34 = vmul.f32 %v2884_v5, %v2882_v29  ;;  %v6226_v29 = vld [vmem:[#allocation43_spill] sm:$0xff]  ;;  %v6227_v5 = vld [vmem:[#allocation44_spill] sm:$0xff] }
 0x490   :  { %v1431_v33 = vpack.c.bf16 %v4699_v34, %v4699_v34 }
 0x492   :  { %1466 = vmatmul.mubr.bf16.vlgmr.msra.gmra.mrb[28].mxu0 %v1431_v33  ;;  %1507 = vmatmul.mubr.bf16.vlgmr.msra.gmra.mrb[28].mxu1 %v1431_v33 }
 0x493   :  { %1550 = vmatpush1.bf16.msra.mxu0 %v3978_v38  ;;  %1591 = vmatpush1.bf16.msra.mxu1 %v3984_v51  ;;  %v6193_v38 = vld [vmem:[#allocation12_spill] sm:$0xff]  ;;  %v6194_v51 = vld [vmem:[#allocation13_spill] sm:$0xff] }
 0x494   :  { %1551 = vmatprep.subr.bf16.mxu0 %v3990_v17  ;;  %1592 = vmatprep.subr.bf16.mxu1 %v3996_v58  ;;  %v6195_v17 = vld [vmem:[#allocation3_spill] sm:$0xff]  ;;  %v6196_v58 = vld [vmem:[#allocation4_spill] sm:$0xff] }
 0x495   :  { %1581 = vmatprep.mubr.bf16.mxu0 %v6029_v48  ;;  %1622 = vmatprep.mubr.bf16.mxu1 %v6029_v48 }
 0x497   :  { %1552 = vmatpush1.bf16.msra.mxu0 %v4004_v1  ;;  %1593 = vmatpush1.bf16.msra.mxu1 %v4010_v56  ;;  %v6197_v1 = vld [vmem:[#allocation14_spill] sm:$0xff]  ;;  %v6198_v56 = vld [vmem:[#allocation15_spill] sm:$0xff] }
 0x498   :  { %1553 = vmatprep.subr.bf16.mxu0 %v4016_v57  ;;  %1594 = vmatprep.subr.bf16.mxu1 %v4022_v63  ;;  %v6199_v57 = vld [vmem:[#allocation16_spill] sm:$0xff]  ;;  %v6200_v63 = vld [vmem:[#allocation17_spill] sm:$0xff] }
 0x49b   :  { %1554 = vmatpush1.bf16.msra.mxu0 %v4028_v13  ;;  %1595 = vmatpush1.bf16.msra.mxu1 %v4034_v0  ;;  %v6201_v13 = vld [vmem:[#allocation18_spill] sm:$0xff]  ;;  %v6202_v0 = vld [vmem:[#allocation19_spill] sm:$0xff] }
 0x49c   :  { %1555 = vmatprep.subr.bf16.mxu0 %v4040_v54  ;;  %1596 = vmatprep.subr.bf16.mxu1 %v4195_v12  ;;  %v6203_v54 = vld [vmem:[#allocation20_spill] sm:$0xff] }
 0x49f   :  { %1556 = vmatpush1.bf16.msra.mxu0 %v4047_v53  ;;  %1597 = vmatpush1.bf16.msra.mxu1 %v4202_v3  ;;  %v6204_v53 = vld [vmem:[#allocation21_spill] sm:$0xff] }
 0x4a0   :  { %1557 = vmatprep.subr.bf16.mxu0 %v4054_v59  ;;  %1598 = vmatprep.subr.bf16.mxu1 %v4209_v4  ;;  %v6205_v59 = vld [vmem:[#allocation22_spill] sm:$0xff] }
 0x4a3   :  { %1558 = vmatpush1.bf16.msra.mxu0 %v4061_v16  ;;  %1599 = vmatpush1.bf16.msra.mxu1 %v4216_v7  ;;  %v6206_v16 = vld [vmem:[#allocation23_spill] sm:$0xff] }
 0x4a4   :  { %1559 = vmatprep.subr.bf16.mxu0 %v4222_v8  ;;  %1600 = vmatprep.subr.bf16.mxu1 %v4228_v9 }
 0x4a7   :  { %1560 = vmatpush1.bf16.msra.mxu0 %v4234_v10  ;;  %1601 = vmatpush1.bf16.msra.mxu1 %v4240_v11 }
 0x4a8   :  { %1561 = vmatprep.subr.bf16.mxu0 %v4246_v60  ;;  %1602 = vmatprep.subr.bf16.mxu1 %v4252_v55 }
 0x4ab   :  { %1562 = vmatpush1.bf16.msra.mxu0 %v4258_v6  ;;  %1603 = vmatpush1.bf16.msra.mxu1 %v4264_v46 }
 0x4ac   :  { %1563 = vmatprep.subr.bf16.mxu0 %v4270_v52  ;;  %1604 = vmatprep.subr.bf16.mxu1 %v4276_v14 }
 0x4af   :  { %1564 = vmatpush1.bf16.msra.mxu0 %v4282_v15  ;;  %1605 = vmatpush1.bf16.msra.mxu1 %v4288_v18 }
 0x4b0   :  { %1661 = vmatprep.subr.bf16.mxu0 %v4294_v19  ;;  %1702 = vmatprep.subr.bf16.mxu1 %v4300_v20 }
 0x4b2   :  { %1582 = vmatmul.mubr.bf16.vlgmr.msra.gmra.mrb[32].mxu0 %v1431_v33  ;;  %1623 = vmatmul.mubr.bf16.vlgmr.msra.gmra.mrb[32].mxu1 %v1431_v33  ;;  %v6228_v33 = vld [vmem:[#allocation45_spill] sm:$0xff] }
 0x4b3   :  { %1662 = vmatpush1.bf16.msra.mxu0 %v4306_v22  ;;  %1703 = vmatpush1.bf16.msra.mxu1 %v4312_v23 }
 0x4b4   :  { %1663 = vmatprep.subr.bf16.mxu0 %v4318_v24  ;;  %1704 = vmatprep.subr.bf16.mxu1 %v4324_v25 }
 0x4b7   :  { %1664 = vmatpush1.bf16.msra.mxu0 %v4330_v26  ;;  %1705 = vmatpush1.bf16.msra.mxu1 %v4336_v27 }
 0x4b8   :  { %1665 = vmatprep.subr.bf16.mxu0 %v6193_v38  ;;  %1706 = vmatprep.subr.bf16.mxu1 %v6194_v51 }
 0x4bb   :  { %1666 = vmatpush1.bf16.msra.mxu0 %v6195_v17  ;;  %1707 = vmatpush1.bf16.msra.mxu1 %v6196_v58 }
 0x4bc   :  { %1667 = vmatprep.subr.bf16.mxu0 %v6197_v1  ;;  %1708 = vmatprep.subr.bf16.mxu1 %v6198_v56 }
 0x4bf   :  { %1668 = vmatpush1.bf16.msra.mxu0 %v6199_v57  ;;  %1709 = vmatpush1.bf16.msra.mxu1 %v6200_v63 }
 0x4c0   :  { %1669 = vmatprep.subr.bf16.mxu0 %v6201_v13  ;;  %1710 = vmatprep.subr.bf16.mxu1 %v6202_v0 }
 0x4c3   :  { %1670 = vmatpush1.bf16.msra.mxu0 %v6203_v54  ;;  %1711 = vmatpush1.bf16.msra.mxu1 %v6204_v53 }
 0x4c4   :  { %1671 = vmatprep.subr.bf16.mxu0 %v6205_v59  ;;  %1712 = vmatprep.subr.bf16.mxu1 %v6206_v16 }
 0x4c7   :  { %1672 = vmatpush1.bf16.msra.mxu0 %v6207_v43  ;;  %1713 = vmatpush1.bf16.msra.mxu1 %v6208_v36 }
 0x4c8   :  { %1673 = vmatprep.subr.bf16.mxu0 %v6209_v39  ;;  %1714 = vmatprep.subr.bf16.mxu1 %v6210_v50 }
 0x4cb   :  { %1674 = vmatpush1.bf16.msra.mxu0 %v6211_v40  ;;  %1715 = vmatpush1.bf16.msra.mxu1 %v6212_v41 }
 0x4cc   :  { %1675 = vmatprep.subr.bf16.mxu0 %v6213_v62  ;;  %1716 = vmatprep.subr.bf16.mxu1 %v6214_v32 }
 0x4cf   :  { %1676 = vmatpush1.bf16.msra.mxu0 %v6215_v49  ;;  %1717 = vmatpush1.bf16.msra.mxu1 %v6216_v45  ;;  %v6252_v49 = vld [vmem:[#allocation5_spill] sm:$0xff] }
 0x4d0   :  { %1677 = vmatprep.subr.bf16.mxu0 %v6217_v35  ;;  %1718 = vmatprep.subr.bf16.mxu1 %v6218_v61  ;;  %v6229_v61 = vld [vmem:[#allocation46_spill] sm:$0xff] }
 0x4d1   :  { %v6251_v35 = vld [vmem:[#allocation6_spill] sm:$0xff] }
 0x4d3   :  { %1678 = vmatpush1.bf16.msra.mxu0 %v6219_v44  ;;  %1719 = vmatpush1.bf16.msra.mxu1 %v6220_v30  ;;  %v6230_v44 = vld [vmem:[#allocation47_spill] sm:$0xff]  ;;  %v6231_v30 = vld [vmem:[#allocation48_spill] sm:$0xff] }
 0x4d4   :  { %1679 = vmatprep.subr.bf16.mxu0 %v6221_v2  ;;  %1720 = vmatprep.subr.bf16.mxu1 %v6222_v42  ;;  %v6232_v2 = vld [vmem:[#allocation49_spill] sm:$0xff]  ;;  %v6233_v42 = vld [vmem:[#allocation50_spill] sm:$0xff] }
 0x4d7   :  { %1680 = vmatpush1.bf16.msra.mxu0 %v6223_v37  ;;  %1721 = vmatpush1.bf16.msra.mxu1 %v6224_v47  ;;  %v6234_v37 = vld [vmem:[#allocation51_spill] sm:$0xff]  ;;  %v6235_v47 = vld [vmem:[#allocation52_spill] sm:$0xff] }
 0x4d8   :  { %1681 = vmatprep.subr.bf16.mxu0 %v6225_v21  ;;  %1722 = vmatprep.subr.bf16.mxu1 %v6226_v29  ;;  %v6236_v21 = vld [vmem:[#allocation53_spill] sm:$0xff]  ;;  %v6237_v29 = vld [vmem:[#allocation54_spill] sm:$0xff] }
 0x4db   :  { %1682 = vmatpush1.bf16.msra.mxu0 %v6227_v5  ;;  %1723 = vmatpush1.bf16.msra.mxu1 %v6228_v33  ;;  %v6238_v5 = vld [vmem:[#allocation55_spill] sm:$0xff]  ;;  %v6239_v33 = vld [vmem:[#allocation9_spill] sm:$0xff] }
 0x4dc   :  { %1683 = vmatprep.subr.bf16.mxu0 %v6229_v61  ;;  %1724 = vmatprep.subr.bf16.mxu1 %v6230_v44  ;;  %v6240_v61 = vld [vmem:[#allocation56_spill] sm:$0xff]  ;;  %v6241_v44 = vld [vmem:[#allocation57_spill] sm:$0xff] }
 0x4df   :  { %1684 = vmatpush1.bf16.msra.mxu0 %v6231_v30  ;;  %1725 = vmatpush1.bf16.msra.mxu1 %v6232_v2  ;;  %v6242_v30 = vld [vmem:[#allocation58_spill] sm:$0xff]  ;;  %v6243_v2 = vld [vmem:[#allocation59_spill] sm:$0xff] }
 0x4e0   :  { %1685 = vmatprep.subr.bf16.mxu0 %v6233_v42  ;;  %1726 = vmatprep.subr.bf16.mxu1 %v6234_v37  ;;  %v6244_v42 = vld [vmem:[#allocation60_spill] sm:$0xff]  ;;  %v6245_v37 = vld [vmem:[#allocation61_spill] sm:$0xff] }
 0x4e3   :  { %1686 = vmatpush1.bf16.msra.mxu0 %v6235_v47  ;;  %1727 = vmatpush1.bf16.msra.mxu1 %v6236_v21  ;;  %v6246_v47 = vld [vmem:[#allocation62_spill] sm:$0xff]  ;;  %v6247_v21 = vld [vmem:[#allocation63_spill] sm:$0xff] }
 0x4e4   :  { %1687 = vmatprep.subr.bf16.mxu0 %v6237_v29  ;;  %1728 = vmatprep.subr.bf16.mxu1 %v6238_v5  ;;  %v6248_v29 = vld [vmem:[#allocation64_spill] sm:$0xff]  ;;  %v6249_v5 = vld [vmem:[#allocation10_spill] sm:$0xff] }
 0x4e7   :  { %1688 = vmatpush1.bf16.msra.mxu0 %v6239_v33  ;;  %1729 = vmatpush1.bf16.msra.mxu1 %v6240_v61  ;;  %v6250_v33 = vld [vmem:[#allocation11_spill] sm:$0xff] }
 0x4e8   :  { %1689 = vmatprep.subr.bf16.mxu0 %v6241_v44  ;;  %1730 = vmatprep.subr.bf16.mxu1 %v6242_v30 }
 0x4eb   :  { %1690 = vmatpush1.bf16.msra.mxu0 %v6243_v2  ;;  %1731 = vmatpush1.bf16.msra.mxu1 %v6244_v42 }
 0x4ec   :  { %1691 = vmatprep.subr.bf16.mxu0 %v6245_v37  ;;  %1732 = vmatprep.subr.bf16.mxu1 %v6246_v47 }
 0x4ef   :  { %1692 = vmatpush1.bf16.msra.mxu0 %v6247_v21  ;;  %1733 = vmatpush1.bf16.msra.mxu1 %v6248_v29  ;;  %v6253_v29 = vld [vmem:[#allocation7_spill] sm:$0xff] }
 0x4f0   :  { %1777 = vmatprep.subr.bf16.mxu0 %v6249_v5  ;;  %1818 = vmatprep.subr.bf16.mxu1 %v6250_v33  ;;  %v6254_v33 = vld [vmem:[#allocation8_spill] sm:$0xff] }
 0x565   :  { %v1467_v61 = vpop.f32.mrb[28].mxu0  ;;  %v1508_v44 = vpop.f32.mrb[28].mxu1 }
 0x566   :  { %v1468_v30 = vadd.f32 %v1467_v61, %v6251_v35  ;;  %v1469_v45 = vpop.f32.mrb[29].mxu0  ;;  %v1510_v2 = vpop.f32.mrb[29].mxu1  ;;  %v1509_v50 = vadd.f32 %v1508_v44, %v6254_v33 }
 0x567   :  { %v1470_v42 = vadd.f32 %v1469_v45, %v6252_v49  ;;  %v1471_v32 = vpop.f32.mrb[30].mxu0  ;;  %v1512_v37 = vpop.f32.mrb[30].mxu1  ;;  %v1511_v5 = vadd.f32 %v1510_v2, %v6253_v29 }
 0x568   :  { %v2587_v62 = vmul.f32 -1.442695, %v1468_v30  ;;  %v1472_v47 = vpop.f32.mrb[31].mxu0  ;;  %v1513_v41 = vpop.f32.mrb[31].mxu1 }
 0x569   :  { %v2588_v21 = vmul.f32 -1.442695, %v1470_v42  ;;  %v2589_v40 = vmul.f32 -1.442695, %v1511_v5  ;;  %v2591_v41 = vld [vmem:[%s5680_s0 + $0x40] sm:$0xff] }
 0x56a   :  { %2885 = vpow2.f32 %v2587_v62  ;;  %v1545_v37 = vunpack.c.l.bf16 %v2591_v41  ;;  %v1546_v47 = vunpack.c.h.bf16 %v2591_v41 }
 0x56b   :  { %2887 = vpow2.f32 %v2588_v21 }
 0x56c   :  { %2889 = vpow2.f32 %v2589_v40 }
 0x56d   :  { %2891 = vtanh.f32 %v1509_v50 }
 0x574   :  { %v2886_v39 = vpop.eup %2885 }
 0x575   :  { %v2888_v36 = vpop.eup %2887  ;;  %v1518_v61 = vadd.f32 1.0, %v2886_v39 }
 0x576   :  { %v1524_v35 = vadd.f32 1.0, %v2888_v36  ;;  %v2890_v32 = vpop.eup %2889 }
 0x577   :  { %2893 = vrcp.f32 %v1518_v61  ;;  %v2892_v62 = vpop.eup %2891  ;;  %v1531_v42 = vadd.f32 1.0, %v2890_v32 }
 0x578   :  { %2895 = vrcp.f32 %v1524_v35  ;;  %v2592_v35 = vld [vmem:[%s5680_s0 + $0x48] sm:$0xff] }
 0x579   :  { %2897 = vrcp.f32 %v1531_v42  ;;  %v1547_v42 = vunpack.c.l.bf16 %v2592_v35 }
 0x581   :  { %v2894_v45 = vpop.eup %2893 }
 0x582   :  { %v2896_v30 = vpop.eup %2895  ;;  %v1535_v2 = vmul.f32 %v2894_v45, %v2892_v62 }
 0x583   :  { %v1534_v44 = vmul.f32 %v2896_v30, %v4685_v31  ;;  %v1548_v30 = vunpack.c.h.bf16 %v2592_v35 }
 0x585   :  { %v4809_v39 = vadd.f32 %v1535_v2, %v1534_v44  ;;  %v1583_v50 = vpop.f32.mrb[32].mxu0  ;;  %v1624_v36 = vpop.f32.mrb[32].mxu1 }
 0x586   :  { %v1631_v40 = vadd.f32 %v1583_v50, %v1545_v37  ;;  %v1585_v21 = vpop.f32.mrb[33].mxu0  ;;  %v1626_v5 = vpop.f32.mrb[33].mxu1  ;;  %v1633_v29 = vadd.f32 %v1624_v36, %v1547_v42  ;;  %v4848_v42 = vld [vmem:[%s5678_s1 + $0x2c] ss:$16 sps:$4 sm:$0xff]  }
 0x587   :  { %v1632_v61 = vadd.f32 %v1585_v21, %v1546_v47  ;;  %v1587_v33 = vpop.f32.mrb[34].mxu0  ;;  %v1628_v62 = vpop.f32.mrb[34].mxu1  ;;  %2899 = vtanh.f32 %v4809_v39  ;;  %v1634_v2 = vadd.f32 %v1626_v5, %v1548_v30  ;;  %v4830_v30 = vld [vmem:[%s5678_s1] ss:$16 sps:$4 sm:$0xff]  }
 0x588   :  { %v2593_v32 = vmul.f32 -1.442695, %v1631_v40  ;;  %v1588_v31 = vpop.f32.mrb[35].mxu0  ;;  %v1629_v41 = vpop.f32.mrb[35].mxu1 }
 0x589   :  { %v2594_v45 = vmul.f32 -1.442695, %v1632_v61  ;;  %v2898_v37 = vpop.eup %2897  ;;  %v2595_v50 = vmul.f32 -1.442695, %v1634_v2  ;;  %v4842_v2 = vld [vmem:[%s5678_s1 + $0x24] ss:$16 sps:$4 sm:$0xff]  }
 0x58a   :  { %2901 = vpow2.f32 %v2593_v32 }
 0x58b   :  { %2903 = vpow2.f32 %v2594_v45 }
 0x58c   :  { %2905 = vpow2.f32 %v2595_v50  ;;  %v4868_v50 = vld [vmem:[%s5678_s1 + $0x44] ss:$16 sps:$4 sm:$0xff]  }
 0x58d   :  { %2907 = vtanh.f32 %v1633_v29 }
 0x591   :  { %v2900_v44 = vpop.eup %2899 }
 0x592   :  { %v1538_v49 = vmul.f32 %v2900_v44, %v2898_v37  ;;  %v4856_v37 = vld [vmem:[%s5678_s1 + $0x20] ss:$16 sps:$4 sm:$0xff]   ;;  %v4862_v44 = vld [vmem:[%s5678_s1 + $0x28] ss:$16 sps:$4 sm:$0xff]  }
 0x594   :  { %v2902_v43 = vpop.eup %2901  ;;  %v1539_v33 = vadd.f32 %v1538_v49, %v4699_v34  ;;  %v1660_v47 = vpack.c.bf16 %v1538_v49, %v1538_v49 }
 0x595   :  { %v2904_v21 = vpop.eup %2903  ;;  %v1638_v62 = vadd.f32 1.0, %v2902_v43 }
 0x596   :  { %v1644_v40 = vadd.f32 1.0, %v2904_v21  ;;  %2590 = vst [vmem:[%s5682_s4 + $0x18] sm:$0xff] %v1539_v33  ;;  %1693 = vmatprep.mubr.bf16.mxu0 %v1660_v47  ;;  %1734 = vmatprep.mubr.bf16.mxu1 %v1660_v47  ;;  %v2906_v35 = vpop.eup %2905  ;;  %v4874_v33 = vld [vmem:[%s5678_s1 + $0x4c] ss:$16 sps:$4 sm:$0xff]   ;;  %v4880_v47 = vld [vmem:[%s5678_s1 + $0x40] ss:$16 sps:$4 sm:$0xff]  }
 0x597   :  { %2909 = vrcp.f32 %v1638_v62  ;;  %v2908_v36 = vpop.eup %2907  ;;  %v1651_v34 = vadd.f32 1.0, %v2906_v35  ;;  %v4886_v21 = vld [vmem:[%s5678_s1 + $0x48] ss:$16 sps:$4 sm:$0xff]   ;;  %v4892_v62 = vld [vmem:[%s5678_s1 + $0x64] ss:$16 sps:$4 sm:$0xff]  }
 0x598   :  { %2911 = vrcp.f32 %v1644_v40  ;;  %v4899_v40 = vld [vmem:[%s5678_s1 + $0x60] ss:$16 sps:$4 sm:$0xff]   ;;  %v4906_v35 = vld [vmem:[%s5678_s1 + $0x84] ss:$16 sps:$4 sm:$0xff]  }
 0x599   :  { %2913 = vrcp.f32 %v1651_v34  ;;  %v6296_v34 = vld [vmem:[#allocation64_spill] sm:$0xff] }
 0x5a1   :  { %v2910_v5 = vpop.eup %2909 }
 0x5a2   :  { %v2912_v61 = vpop.eup %2911  ;;  %v1655_v32 = vmul.f32 %v2910_v5, %v2908_v36  ;;  %v6292_v36 = vld [vmem:[#allocation60_spill] sm:$0xff]  ;;  %v6293_v5 = vld [vmem:[#allocation61_spill] sm:$0xff] }
 0x5a3   :  { %v1654_v49 = vmul.f32 %v2912_v61, %v4696_v28  ;;  %v2914_v29 = vpop.eup %2913  ;;  %v4836_v28 = vld [vmem:[%s5678_s1 + $0x8] ss:$16 sps:$4 sm:$0xff]  }
 0x5a4   :  { %v6294_v61 = vld [vmem:[#allocation62_spill] sm:$0xff] }
 0x5a5   :  { %v4820_v43 = vadd.f32 %v1655_v32, %v1654_v49  ;;  %v6295_v32 = vld [vmem:[#allocation63_spill] sm:$0xff] }
 0x5a6   :  { %v4996_v49 = vld [vmem:[%s5678_s1 + $0x4] ss:$16 sps:$4 sm:$0xff]  }
 0x5a7   :  { %2915 = vtanh.f32 %v4820_v43 }
 0x5b1   :  { %v2916_v31 = vpop.eup %2915 }
 0x5b2   :  { %v4823_v41 = vmul.f32 %v2916_v31, %v2914_v29  ;;  %v5002_v29 = vld [vmem:[%s5678_s1 + $0xc] ss:$16 sps:$4 sm:$0xff]  }
 0x5b4   :  { %v1659_v45 = vpack.c.bf16 %v4823_v41, %v4823_v41 }
 0x5b6   :  { %1694 = vmatmul.mubr.bf16.vlgmr.msra.gmra.mrb[36].mxu0 %v1659_v45  ;;  %1735 = vmatmul.mubr.bf16.vlgmr.msra.gmra.mrb[36].mxu1 %v1659_v45 }
 0x5b7   :  { %1778 = vmatpush1.bf16.msra.mxu0 %v4830_v30  ;;  %1819 = vmatpush1.bf16.msra.mxu1 %v4836_v28 }
 0x5b8   :  { %1779 = vmatprep.subr.bf16.mxu0 %v4842_v2  ;;  %1820 = vmatprep.subr.bf16.mxu1 %v4848_v42 }
 0x5b9   :  { %1809 = vmatprep.mubr.bf16.mxu0 %v6029_v48  ;;  %1850 = vmatprep.mubr.bf16.mxu1 %v6029_v48 }
 0x5bb   :  { %1780 = vmatpush1.bf16.msra.mxu0 %v4856_v37  ;;  %1821 = vmatpush1.bf16.msra.mxu1 %v4862_v44 }
 0x5bc   :  { %1781 = vmatprep.subr.bf16.mxu0 %v4868_v50  ;;  %1822 = vmatprep.subr.bf16.mxu1 %v4874_v33 }
 0x5bf   :  { %1782 = vmatpush1.bf16.msra.mxu0 %v4880_v47  ;;  %1823 = vmatpush1.bf16.msra.mxu1 %v4886_v21 }
 0x5c0   :  { %1783 = vmatprep.subr.bf16.mxu0 %v4892_v62  ;;  %1824 = vmatprep.subr.bf16.mxu1 %v4195_v12  ;;  %v4913_v12 = vld [vmem:[%s5678_s1 + $0x80] ss:$16 sps:$4 sm:$0xff]  }
 0x5c3   :  { %1784 = vmatpush1.bf16.msra.mxu0 %v4899_v40  ;;  %1825 = vmatpush1.bf16.msra.mxu1 %v4202_v3  ;;  %v6255_v3 = vld [vmem:[#allocation24_spill] sm:$0xff] }
 0x5c4   :  { %1785 = vmatprep.subr.bf16.mxu0 %v4906_v35  ;;  %1826 = vmatprep.subr.bf16.mxu1 %v4209_v4  ;;  %v6256_v4 = vld [vmem:[#allocation25_spill] sm:$0xff] }
 0x5c7   :  { %1786 = vmatpush1.bf16.msra.mxu0 %v4913_v12  ;;  %1827 = vmatpush1.bf16.msra.mxu1 %v4216_v7  ;;  %v6257_v7 = vld [vmem:[#allocation26_spill] sm:$0xff] }
 0x5c8   :  { %1787 = vmatprep.subr.bf16.mxu0 %v4222_v8  ;;  %1828 = vmatprep.subr.bf16.mxu1 %v4228_v9  ;;  %v6258_v8 = vld [vmem:[#allocation27_spill] sm:$0xff]  ;;  %v6259_v9 = vld [vmem:[#allocation28_spill] sm:$0xff] }
 0x5cb   :  { %1788 = vmatpush1.bf16.msra.mxu0 %v4234_v10  ;;  %1829 = vmatpush1.bf16.msra.mxu1 %v4240_v11  ;;  %v6260_v10 = vld [vmem:[#allocation29_spill] sm:$0xff]  ;;  %v6261_v11 = vld [vmem:[#allocation30_spill] sm:$0xff] }
 0x5cc   :  { %1789 = vmatprep.subr.bf16.mxu0 %v4246_v60  ;;  %1830 = vmatprep.subr.bf16.mxu1 %v4252_v55  ;;  %v6262_v60 = vld [vmem:[#allocation31_spill] sm:$0xff]  ;;  %v6263_v55 = vld [vmem:[#allocation32_spill] sm:$0xff] }
 0x5cf   :  { %1790 = vmatpush1.bf16.msra.mxu0 %v4258_v6  ;;  %1831 = vmatpush1.bf16.msra.mxu1 %v4264_v46  ;;  %v6264_v6 = vld [vmem:[#allocation33_spill] sm:$0xff]  ;;  %v6265_v46 = vld [vmem:[#allocation34_spill] sm:$0xff] }
 0x5d0   :  { %1791 = vmatprep.subr.bf16.mxu0 %v4270_v52  ;;  %1832 = vmatprep.subr.bf16.mxu1 %v4276_v14  ;;  %v6266_v52 = vld [vmem:[#allocation35_spill] sm:$0xff]  ;;  %v6267_v14 = vld [vmem:[#allocation36_spill] sm:$0xff] }
 0x5d3   :  { %1792 = vmatpush1.bf16.msra.mxu0 %v4282_v15  ;;  %1833 = vmatpush1.bf16.msra.mxu1 %v4288_v18  ;;  %v6268_v15 = vld [vmem:[#allocation37_spill] sm:$0xff]  ;;  %v6269_v18 = vld [vmem:[#allocation38_spill] sm:$0xff] }
 0x5d4   :  { %1889 = vmatprep.subr.bf16.mxu0 %v4294_v19  ;;  %1930 = vmatprep.subr.bf16.mxu1 %v4300_v20  ;;  %v6270_v19 = vld [vmem:[#allocation39_spill] sm:$0xff]  ;;  %v6271_v20 = vld [vmem:[#allocation40_spill] sm:$0xff] }
 0x5d6   :  { %1810 = vmatmul.mubr.bf16.vlgmr.msra.gmra.mrb[40].mxu0 %v1659_v45  ;;  %1851 = vmatmul.mubr.bf16.vlgmr.msra.gmra.mrb[40].mxu1 %v1659_v45 }
 0x5d7   :  { %1890 = vmatpush1.bf16.msra.mxu0 %v4306_v22  ;;  %1931 = vmatpush1.bf16.msra.mxu1 %v4312_v23  ;;  %v6272_v22 = vld [vmem:[#allocation41_spill] sm:$0xff]  ;;  %v6273_v23 = vld [vmem:[#allocation42_spill] sm:$0xff] }
 0x5d8   :  { %1891 = vmatprep.subr.bf16.mxu0 %v4318_v24  ;;  %1932 = vmatprep.subr.bf16.mxu1 %v4324_v25  ;;  %v6274_v24 = vld [vmem:[#allocation43_spill] sm:$0xff]  ;;  %v6275_v25 = vld [vmem:[#allocation44_spill] sm:$0xff] }
 0x5db   :  { %1892 = vmatpush1.bf16.msra.mxu0 %v4330_v26  ;;  %1933 = vmatpush1.bf16.msra.mxu1 %v4336_v27  ;;  %v6276_v26 = vld [vmem:[#allocation45_spill] sm:$0xff]  ;;  %v6277_v27 = vld [vmem:[#allocation46_spill] sm:$0xff] }
 0x5dc   :  { %1893 = vmatprep.subr.bf16.mxu0 %v6193_v38  ;;  %1934 = vmatprep.subr.bf16.mxu1 %v6194_v51  ;;  %v6278_v38 = vld [vmem:[#allocation47_spill] sm:$0xff]  ;;  %v6279_v51 = vld [vmem:[#allocation48_spill] sm:$0xff] }
 0x5df   :  { %1894 = vmatpush1.bf16.msra.mxu0 %v6195_v17  ;;  %1935 = vmatpush1.bf16.msra.mxu1 %v6196_v58  ;;  %v6280_v17 = vld [vmem:[#allocation49_spill] sm:$0xff]  ;;  %v6281_v58 = vld [vmem:[#allocation50_spill] sm:$0xff] }
 0x5e0   :  { %1895 = vmatprep.subr.bf16.mxu0 %v6197_v1  ;;  %1936 = vmatprep.subr.bf16.mxu1 %v6198_v56  ;;  %v6282_v1 = vld [vmem:[#allocation51_spill] sm:$0xff]  ;;  %v6283_v56 = vld [vmem:[#allocation52_spill] sm:$0xff] }
 0x5e3   :  { %1896 = vmatpush1.bf16.msra.mxu0 %v6199_v57  ;;  %1937 = vmatpush1.bf16.msra.mxu1 %v6200_v63  ;;  %v6284_v57 = vld [vmem:[#allocation53_spill] sm:$0xff]  ;;  %v6285_v63 = vld [vmem:[#allocation54_spill] sm:$0xff] }
 0x5e4   :  { %1897 = vmatprep.subr.bf16.mxu0 %v6201_v13  ;;  %1938 = vmatprep.subr.bf16.mxu1 %v6202_v0  ;;  %v6286_v13 = vld [vmem:[#allocation55_spill] sm:$0xff]  ;;  %v6287_v0 = vld [vmem:[#allocation9_spill] sm:$0xff] }
 0x5e7   :  { %1898 = vmatpush1.bf16.msra.mxu0 %v6203_v54  ;;  %1939 = vmatpush1.bf16.msra.mxu1 %v6204_v53  ;;  %v6288_v54 = vld [vmem:[#allocation56_spill] sm:$0xff]  ;;  %v6289_v53 = vld [vmem:[#allocation57_spill] sm:$0xff] }
 0x5e8   :  { %1899 = vmatprep.subr.bf16.mxu0 %v6205_v59  ;;  %1940 = vmatprep.subr.bf16.mxu1 %v6206_v16  ;;  %v6290_v59 = vld [vmem:[#allocation58_spill] sm:$0xff]  ;;  %v6291_v16 = vld [vmem:[#allocation59_spill] sm:$0xff] }
 0x5eb   :  { %1900 = vmatpush1.bf16.msra.mxu0 %v6255_v3  ;;  %1941 = vmatpush1.bf16.msra.mxu1 %v6256_v4  ;;  %v6297_v3 = vld [vmem:[#allocation6_spill] sm:$0xff] }
 0x5ec   :  { %1901 = vmatprep.subr.bf16.mxu0 %v6257_v7  ;;  %1942 = vmatprep.subr.bf16.mxu1 %v6258_v8 }
 0x5ef   :  { %1902 = vmatpush1.bf16.msra.mxu0 %v6259_v9  ;;  %1943 = vmatpush1.bf16.msra.mxu1 %v6260_v10  ;;  %v6298_v9 = vld [vmem:[#allocation5_spill] sm:$0xff] }
 0x5f0   :  { %1903 = vmatprep.subr.bf16.mxu0 %v6261_v11  ;;  %1944 = vmatprep.subr.bf16.mxu1 %v6262_v60 }
 0x5f3   :  { %1904 = vmatpush1.bf16.msra.mxu0 %v6263_v55  ;;  %1945 = vmatpush1.bf16.msra.mxu1 %v6264_v6 }
 0x5f4   :  { %1905 = vmatprep.subr.bf16.mxu0 %v6265_v46  ;;  %1946 = vmatprep.subr.bf16.mxu1 %v6266_v52 }
 0x5f7   :  { %1906 = vmatpush1.bf16.msra.mxu0 %v6267_v14  ;;  %1947 = vmatpush1.bf16.msra.mxu1 %v6268_v15  ;;  %v6299_v14 = vld [vmem:[#allocation7_spill] sm:$0xff] }
 0x5f8   :  { %1907 = vmatprep.subr.bf16.mxu0 %v6269_v18  ;;  %1948 = vmatprep.subr.bf16.mxu1 %v6270_v19  ;;  %v6300_v19 = vld [vmem:[#allocation8_spill] sm:$0xff] }
 0x5fb   :  { %1908 = vmatpush1.bf16.msra.mxu0 %v6271_v20  ;;  %1949 = vmatpush1.bf16.msra.mxu1 %v6272_v22 }
 0x5fc   :  { %1909 = vmatprep.subr.bf16.mxu0 %v6273_v23  ;;  %1950 = vmatprep.subr.bf16.mxu1 %v6274_v24 }
 0x5ff   :  { %1910 = vmatpush1.bf16.msra.mxu0 %v6275_v25  ;;  %1951 = vmatpush1.bf16.msra.mxu1 %v6276_v26 }
 0x600   :  { %1911 = vmatprep.subr.bf16.mxu0 %v6277_v27  ;;  %1952 = vmatprep.subr.bf16.mxu1 %v6278_v38  ;;  %v2600_v27 = vld [vmem:[%s5680_s0 + $0x50] sm:$0xff] }
 0x603   :  { %1912 = vmatpush1.bf16.msra.mxu0 %v6279_v51  ;;  %1953 = vmatpush1.bf16.msra.mxu1 %v6280_v17 }
 0x604   :  { %1913 = vmatprep.subr.bf16.mxu0 %v6281_v58  ;;  %1954 = vmatprep.subr.bf16.mxu1 %v6282_v1 }
 0x607   :  { %1914 = vmatpush1.bf16.msra.mxu0 %v6283_v56  ;;  %1955 = vmatpush1.bf16.msra.mxu1 %v6284_v57  ;;  %v1773_v56 = vunpack.c.l.bf16 %v2600_v27 }
 0x608   :  { %1915 = vmatprep.subr.bf16.mxu0 %v6285_v63  ;;  %1956 = vmatprep.subr.bf16.mxu1 %v6286_v13  ;;  %v1774_v63 = vunpack.c.h.bf16 %v2600_v27 }
 0x60b   :  { %1916 = vmatpush1.bf16.msra.mxu0 %v6287_v0  ;;  %1957 = vmatpush1.bf16.msra.mxu1 %v6288_v54 }
 0x60c   :  { %1917 = vmatprep.subr.bf16.mxu0 %v6289_v53  ;;  %1958 = vmatprep.subr.bf16.mxu1 %v6290_v59  ;;  %v2601_v59 = vld [vmem:[%s5680_s0 + $0x58] sm:$0xff] }
 0x60f   :  { %1918 = vmatpush1.bf16.msra.mxu0 %v6291_v16  ;;  %1959 = vmatpush1.bf16.msra.mxu1 %v6292_v36 }
 0x610   :  { %1919 = vmatprep.subr.bf16.mxu0 %v6293_v5  ;;  %1960 = vmatprep.subr.bf16.mxu1 %v6294_v61 }
 0x613   :  { %1920 = vmatpush1.bf16.msra.mxu0 %v6295_v32  ;;  %1961 = vmatpush1.bf16.msra.mxu1 %v6296_v34 }
 0x614   :  { %2005 = vmatprep.subr.bf16.mxu0 %v4996_v49  ;;  %2046 = vmatprep.subr.bf16.mxu1 %v5002_v29 }
 0x689   :  { %v1695_v31 = vpop.f32.mrb[36].mxu0  ;;  %v1736_v45 = vpop.f32.mrb[36].mxu1 }
 0x68a   :  { %v1696_v4 = vadd.f32 %v1695_v31, %v6297_v3  ;;  %v1697_v7 = vpop.f32.mrb[37].mxu0  ;;  %v1738_v8 = vpop.f32.mrb[37].mxu1  ;;  %v1737_v20 = vadd.f32 %v1736_v45, %v6300_v19 }
 0x68b   :  { %v1698_v10 = vadd.f32 %v1697_v7, %v6298_v9  ;;  %v1699_v11 = vpop.f32.mrb[38].mxu0  ;;  %v1740_v60 = vpop.f32.mrb[38].mxu1  ;;  %v1739_v15 = vadd.f32 %v1738_v8, %v6299_v14  ;;  %v1775_v8 = vunpack.c.l.bf16 %v2601_v59 }
 0x68c   :  { %v2596_v55 = vmul.f32 -1.442695, %v1696_v4  ;;  %v1700_v6 = vpop.f32.mrb[39].mxu0  ;;  %v1741_v46 = vpop.f32.mrb[39].mxu1  ;;  %v1776_v4 = vunpack.c.h.bf16 %v2601_v59  ;;  %v5086_v59 = vld [vmem:[%s5678_s1 + $0xa0] ss:$16 sps:$4 sm:$0xff]  }
 0x68d   :  { %v2597_v52 = vmul.f32 -1.442695, %v1698_v10  ;;  %v2598_v18 = vmul.f32 -1.442695, %v1739_v15 }
 0x68e   :  { %2917 = vpow2.f32 %v2596_v55 }
 0x68f   :  { %2919 = vpow2.f32 %v2597_v52 }
 0x690   :  { %2921 = vpow2.f32 %v2598_v18 }
 0x691   :  { %2923 = vtanh.f32 %v1737_v20 }
 0x698   :  { %v2918_v22 = vpop.eup %2917 }
 0x699   :  { %v2920_v23 = vpop.eup %2919  ;;  %v1746_v24 = vadd.f32 1.0, %v2918_v22 }
 0x69a   :  { %v1752_v25 = vadd.f32 1.0, %v2920_v23  ;;  %v2922_v26 = vpop.eup %2921 }
 0x69b   :  { %2925 = vrcp.f32 %v1746_v24  ;;  %v2924_v38 = vpop.eup %2923  ;;  %v1759_v1 = vadd.f32 1.0, %v2922_v26 }
 0x69c   :  { %2927 = vrcp.f32 %v1752_v25 }
 0x69d   :  { %2929 = vrcp.f32 %v1759_v1 }
 0x6a5   :  { %v2926_v51 = vpop.eup %2925 }
 0x6a6   :  { %v2928_v17 = vpop.eup %2927  ;;  %v1763_v58 = vmul.f32 %v2926_v51, %v2924_v38 }
 0x6a7   :  { %v1762_v57 = vmul.f32 %v2928_v17, %v4809_v39  ;;  %v2930_v10 = vpop.eup %2929 }
 0x6a9   :  { %v5013_v13 = vadd.f32 %v1763_v58, %v1762_v57  ;;  %v1811_v0 = vpop.f32.mrb[40].mxu0  ;;  %v1852_v54 = vpop.f32.mrb[40].mxu1  ;;  %v5054_v57 = vld [vmem:[%s5678_s1 + $0x68] ss:$16 sps:$4 sm:$0xff]  }
 0x6aa   :  { %v1859_v53 = vadd.f32 %v1811_v0, %v1773_v56  ;;  %v1813_v16 = vpop.f32.mrb[41].mxu0  ;;  %v1854_v36 = vpop.f32.mrb[41].mxu1  ;;  %v1861_v55 = vadd.f32 %v1852_v54, %v1775_v8  ;;  %v5068_v0 = vld [vmem:[%s5678_s1 + $0x88] ss:$16 sps:$4 sm:$0xff]   ;;  %v5074_v54 = vld [vmem:[%s5678_s1 + $0xa4] ss:$16 sps:$4 sm:$0xff]  }
 0x6ab   :  { %v1860_v5 = vadd.f32 %v1813_v16, %v1774_v63  ;;  %v1815_v61 = vpop.f32.mrb[42].mxu0  ;;  %v1856_v32 = vpop.f32.mrb[42].mxu1  ;;  %2931 = vtanh.f32 %v5013_v13  ;;  %v1862_v7 = vadd.f32 %v1854_v36, %v1776_v4  ;;  %v5061_v63 = vld [vmem:[%s5678_s1 + $0x8c] ss:$16 sps:$4 sm:$0xff]   ;;  %v5092_v16 = vld [vmem:[%s5678_s1 + $0xa8] ss:$16 sps:$4 sm:$0xff]  }
 0x6ac   :  { %v2602_v34 = vmul.f32 -1.442695, %v1859_v53  ;;  %v1816_v39 = vpop.f32.mrb[43].mxu0  ;;  %v1857_v31 = vpop.f32.mrb[43].mxu1  ;;  %v5080_v53 = vld [vmem:[%s5678_s1 + $0xac] ss:$16 sps:$4 sm:$0xff]  }
 0x6ad   :  { %v2603_v45 = vmul.f32 -1.442695, %v1860_v5  ;;  %v2604_v60 = vmul.f32 -1.442695, %v1862_v7  ;;  %v5098_v36 = vld [vmem:[%s5678_s1 + $0xc4] ss:$16 sps:$4 sm:$0xff]  }
 0x6ae   :  { %2933 = vpow2.f32 %v2602_v34  ;;  %v5104_v5 = vld [vmem:[%s5678_s1 + $0xcc] ss:$16 sps:$4 sm:$0xff]   ;;  %v5110_v61 = vld [vmem:[%s5678_s1 + $0xc0] ss:$16 sps:$4 sm:$0xff]   ;;  %v5116_v32 = vld [vmem:[%s5678_s1 + $0xc8] ss:$16 sps:$4 sm:$0xff]  }
 0x6af   :  { %2935 = vpow2.f32 %v2603_v45  ;;  %v5122_v34 = vld [vmem:[%s5678_s1 + $0xe4] ss:$16 sps:$4 sm:$0xff]   ;;  %v5128_v39 = vld [vmem:[%s5678_s1 + $0xec] ss:$16 sps:$4 sm:$0xff]   ;;  %v5134_v31 = vld [vmem:[%s5678_s1 + $0xe0] ss:$16 sps:$4 sm:$0xff]  }
 0x6b0   :  { %2937 = vpow2.f32 %v2604_v60  ;;  %v5140_v45 = vld [vmem:[%s5678_s1 + $0xe8] ss:$16 sps:$4 sm:$0xff]   ;;  %v5146_v4 = vld [vmem:[%s5679_s2 + $0x4] ss:$16 sps:$4 sm:$0xff]   ;;  %v5152_v7 = vld [vmem:[%s5679_s2 + $0xc] ss:$16 sps:$4 sm:$0xff]  }
 0x6b1   :  { %2939 = vtanh.f32 %v1861_v55  ;;  %v5158_v8 = vld [vmem:[%s5679_s2] ss:$16 sps:$4 sm:$0xff]   ;;  %v5176_v60 = vld [vmem:[%s5679_s2 + $0x2c] ss:$16 sps:$4 sm:$0xff]  }
 0x6b2   :  { %v5182_v55 = vld [vmem:[%s5679_s2 + $0x20] ss:$16 sps:$4 sm:$0xff]  }
 0x6b5   :  { %v2932_v11 = vpop.eup %2931 }
 0x6b6   :  { %v1766_v6 = vmul.f32 %v2932_v11, %v2930_v10  ;;  %v5164_v10 = vld [vmem:[%s5679_s2 + $0x8] ss:$16 sps:$4 sm:$0xff]   ;;  %v5170_v11 = vld [vmem:[%s5679_s2 + $0x24] ss:$16 sps:$4 sm:$0xff]  }
 0x6b8   :  { %v2934_v46 = vpop.eup %2933  ;;  %v1767_v52 = vadd.f32 %v1766_v6, %v4823_v41  ;;  %v1888_v15 = vpack.c.bf16 %v1766_v6, %v1766_v6  ;;  %v5188_v6 = vld [vmem:[%s5679_s2 + $0x28] ss:$16 sps:$4 sm:$0xff]  }
 0x6b9   :  { %v2936_v18 = vpop.eup %2935  ;;  %v1866_v20 = vadd.f32 1.0, %v2934_v46  ;;  %v5194_v46 = vld [vmem:[%s5679_s2 + $0x44] ss:$16 sps:$4 sm:$0xff]  }
 0x6ba   :  { %v1872_v22 = vadd.f32 1.0, %v2936_v18  ;;  %2599 = vst [vmem:[%s5682_s4 + $0x20] sm:$0xff] %v1767_v52  ;;  %1921 = vmatprep.mubr.bf16.mxu0 %v1888_v15  ;;  %1962 = vmatprep.mubr.bf16.mxu1 %v1888_v15  ;;  %v2938_v23 = vpop.eup %2937  ;;  %6301 = vst [vmem:[#allocation12_spill] sm:$0xff] %v5194_v46  ;;  %v5200_v52 = vld [vmem:[%s5679_s2 + $0x4c] ss:$16 sps:$4 sm:$0xff]  }
 0x6bb   :  { %2941 = vrcp.f32 %v1866_v20  ;;  %v2940_v24 = vpop.eup %2939  ;;  %v1879_v41 = vadd.f32 1.0, %v2938_v23  ;;  %6302 = vst [vmem:[#allocation13_spill] sm:$0xff] %v5200_v52  ;;  %v5206_v15 = vld [vmem:[%s5679_s2 + $0x40] ss:$16 sps:$4 sm:$0xff]   ;;  %v5212_v18 = vld [vmem:[%s5679_s2 + $0x48] ss:$16 sps:$4 sm:$0xff]  }
 0x6bc   :  { %2943 = vrcp.f32 %v1872_v22  ;;  %6303 = vst [vmem:[#allocation3_spill] sm:$0xff] %v5206_v15  ;;  %6304 = vst [vmem:[#allocation4_spill] sm:$0xff] %v5212_v18  ;;  %v5218_v20 = vld [vmem:[%s5679_s2 + $0x64] ss:$16 sps:$4 sm:$0xff]   ;;  %v5224_v22 = vld [vmem:[%s5679_s2 + $0x6c] ss:$16 sps:$4 sm:$0xff]  }
 0x6bd   :  { %2945 = vrcp.f32 %v1879_v41  ;;  %6305 = vst [vmem:[#allocation14_spill] sm:$0xff] %v5218_v20  ;;  %6306 = vst [vmem:[#allocation15_spill] sm:$0xff] %v5224_v22  ;;  %v5230_v23 = vld [vmem:[%s5679_s2 + $0x60] ss:$16 sps:$4 sm:$0xff]   ;;  %v5260_v41 = vld [vmem:[%s5679_s2 + $0x88] ss:$16 sps:$4 sm:$0xff]  }
 0x6be   :  { %6307 = vst [vmem:[#allocation16_spill] sm:$0xff] %v5230_v23  ;;  %6312 = vst [vmem:[#allocation21_spill] sm:$0xff] %v5260_v41 }
 0x6c5   :  { %v2942_v25 = vpop.eup %2941 }
 0x6c6   :  { %v2944_v26 = vpop.eup %2943  ;;  %v1883_v27 = vmul.f32 %v2942_v25, %v2940_v24  ;;  %v5236_v24 = vld [vmem:[%s5679_s2 + $0x68] ss:$16 sps:$4 sm:$0xff]   ;;  %v5242_v25 = vld [vmem:[%s5679_s2 + $0x84] ss:$16 sps:$4 sm:$0xff]  }
 0x6c7   :  { %v1882_v38 = vmul.f32 %v2944_v26, %v4820_v43  ;;  %v2946_v17 = vpop.eup %2945  ;;  %v5047_v43 = vld [vmem:[%s5678_s1 + $0x6c] ss:$16 sps:$4 sm:$0xff]   ;;  %6308 = vst [vmem:[#allocation17_spill] sm:$0xff] %v5236_v24  ;;  %6309 = vst [vmem:[#allocation18_spill] sm:$0xff] %v5242_v25 }
 0x6c8   :  { %v5248_v26 = vld [vmem:[%s5679_s2 + $0x8c] ss:$16 sps:$4 sm:$0xff]  }
 0x6c9   :  { %v5024_v51 = vadd.f32 %v1883_v27, %v1882_v38  ;;  %6310 = vst [vmem:[#allocation19_spill] sm:$0xff] %v5248_v26  ;;  %v5254_v27 = vld [vmem:[%s5679_s2 + $0x80] ss:$16 sps:$4 sm:$0xff]   ;;  %v5266_v38 = vld [vmem:[%s5679_s2 + $0xa4] ss:$16 sps:$4 sm:$0xff]  }
 0x6ca   :  { %6311 = vst [vmem:[#allocation20_spill] sm:$0xff] %v5254_v27  ;;  %6313 = vst [vmem:[#allocation22_spill] sm:$0xff] %v5266_v38 }
 0x6cb   :  { %2947 = vtanh.f32 %v5024_v51 }
 0x6d5   :  { %v2948_v58 = vpop.eup %2947 }
 0x6d6   :  { %v5027_v1 = vmul.f32 %v2948_v58, %v2946_v17  ;;  %v5272_v17 = vld [vmem:[%s5679_s2 + $0xac] ss:$16 sps:$4 sm:$0xff]   ;;  %v5278_v58 = vld [vmem:[%s5679_s2 + $0xa0] ss:$16 sps:$4 sm:$0xff]  }
 0x6d7   :  { %6314 = vst [vmem:[#allocation23_spill] sm:$0xff] %v5272_v17  ;;  %6315 = vst [vmem:[#allocation10_spill] sm:$0xff] %v5278_v58 }
 0x6d8   :  { %v1887_v56 = vpack.c.bf16 %v5027_v1, %v5027_v1 }
 0x6da   :  { %1922 = vmatmul.mubr.bf16.vlgmr.msra.gmra.mrb[44].mxu0 %v1887_v56  ;;  %1963 = vmatmul.mubr.bf16.vlgmr.msra.gmra.mrb[44].mxu1 %v1887_v56 }
 0x6db   :  { %2006 = vmatpush1.bf16.msra.mxu0 %v4830_v30  ;;  %2047 = vmatpush1.bf16.msra.mxu1 %v4836_v28 }
 0x6dc   :  { %2007 = vmatprep.subr.bf16.mxu0 %v4842_v2  ;;  %2048 = vmatprep.subr.bf16.mxu1 %v4848_v42 }
 0x6dd   :  { %2037 = vmatprep.mubr.bf16.mxu0 %v6029_v48  ;;  %2078 = vmatprep.mubr.bf16.mxu1 %v6029_v48 }
 0x6df   :  { %2008 = vmatpush1.bf16.msra.mxu0 %v4856_v37  ;;  %2049 = vmatpush1.bf16.msra.mxu1 %v4862_v44 }
 0x6e0   :  { %2009 = vmatprep.subr.bf16.mxu0 %v4868_v50  ;;  %2050 = vmatprep.subr.bf16.mxu1 %v4874_v33 }
 0x6e3   :  { %2010 = vmatpush1.bf16.msra.mxu0 %v4880_v47  ;;  %2051 = vmatpush1.bf16.msra.mxu1 %v4886_v21 }
 0x6e4   :  { %2011 = vmatprep.subr.bf16.mxu0 %v4892_v62  ;;  %2052 = vmatprep.subr.bf16.mxu1 %v5047_v43 }
 0x6e7   :  { %2012 = vmatpush1.bf16.msra.mxu0 %v4899_v40  ;;  %2053 = vmatpush1.bf16.msra.mxu1 %v5054_v57 }
 0x6e8   :  { %2013 = vmatprep.subr.bf16.mxu0 %v4906_v35  ;;  %2054 = vmatprep.subr.bf16.mxu1 %v5061_v63 }
 0x6eb   :  { %2014 = vmatpush1.bf16.msra.mxu0 %v4913_v12  ;;  %2055 = vmatpush1.bf16.msra.mxu1 %v5068_v0 }
 0x6ec   :  { %2015 = vmatprep.subr.bf16.mxu0 %v5074_v54  ;;  %2056 = vmatprep.subr.bf16.mxu1 %v5080_v53 }
 0x6ef   :  { %2016 = vmatpush1.bf16.msra.mxu0 %v5086_v59  ;;  %2057 = vmatpush1.bf16.msra.mxu1 %v5092_v16 }
 0x6f0   :  { %2017 = vmatprep.subr.bf16.mxu0 %v5098_v36  ;;  %2058 = vmatprep.subr.bf16.mxu1 %v5104_v5 }
 0x6f3   :  { %2018 = vmatpush1.bf16.msra.mxu0 %v5110_v61  ;;  %2059 = vmatpush1.bf16.msra.mxu1 %v5116_v32 }
 0x6f4   :  { %2019 = vmatprep.subr.bf16.mxu0 %v5122_v34  ;;  %2060 = vmatprep.subr.bf16.mxu1 %v5128_v39 }
 0x6f7   :  { %2020 = vmatpush1.bf16.msra.mxu0 %v5134_v31  ;;  %2061 = vmatpush1.bf16.msra.mxu1 %v5140_v45 }
 0x6f8   :  { %2117 = vmatprep.subr.bf16.mxu0 %v5146_v4  ;;  %2158 = vmatprep.subr.bf16.mxu1 %v5152_v7 }
 0x6fa   :  { %2038 = vmatmul.mubr.bf16.vlgmr.msra.gmra.mrb[48].mxu0 %v1887_v56  ;;  %2079 = vmatmul.mubr.bf16.vlgmr.msra.gmra.mrb[48].mxu1 %v1887_v56  ;;  %v5284_v56 = vld [vmem:[%s5679_s2 + $0xa8] ss:$16 sps:$4 sm:$0xff]  }
 0x6fb   :  { %2118 = vmatpush1.bf16.msra.mxu0 %v5158_v8  ;;  %2159 = vmatpush1.bf16.msra.mxu1 %v5164_v10  ;;  %6316 = vst [vmem:[#allocation11_spill] sm:$0xff] %v5284_v56 }
 0x6fc   :  { %2119 = vmatprep.subr.bf16.mxu0 %v5170_v11  ;;  %2160 = vmatprep.subr.bf16.mxu1 %v5176_v60 }
 0x6ff   :  { %2120 = vmatpush1.bf16.msra.mxu0 %v5182_v55  ;;  %2161 = vmatpush1.bf16.msra.mxu1 %v5188_v6 }
 0x700   :  { %2121 = vmatprep.subr.bf16.mxu0 %v5194_v46  ;;  %2162 = vmatprep.subr.bf16.mxu1 %v5200_v52 }
 0x703   :  { %2122 = vmatpush1.bf16.msra.mxu0 %v5206_v15  ;;  %2163 = vmatpush1.bf16.msra.mxu1 %v5212_v18 }
 0x704   :  { %2123 = vmatprep.subr.bf16.mxu0 %v5218_v20  ;;  %2164 = vmatprep.subr.bf16.mxu1 %v5224_v22 }
 0x707   :  { %2124 = vmatpush1.bf16.msra.mxu0 %v5230_v23  ;;  %2165 = vmatpush1.bf16.msra.mxu1 %v5236_v24 }
 0x708   :  { %2125 = vmatprep.subr.bf16.mxu0 %v5242_v25  ;;  %2166 = vmatprep.subr.bf16.mxu1 %v5248_v26 }
 0x70b   :  { %2126 = vmatpush1.bf16.msra.mxu0 %v5254_v27  ;;  %2167 = vmatpush1.bf16.msra.mxu1 %v5260_v41 }
 0x70c   :  { %2127 = vmatprep.subr.bf16.mxu0 %v5266_v38  ;;  %2168 = vmatprep.subr.bf16.mxu1 %v5272_v17  ;;  %v5290_v38 = vld [vmem:[%s5679_s2 + $0xc4] ss:$16 sps:$4 sm:$0xff]   ;;  %v5296_v17 = vld [vmem:[%s5679_s2 + $0xcc] ss:$16 sps:$4 sm:$0xff]  }
 0x70d   :  { %6317 = vst [vmem:[#allocation24_spill] sm:$0xff] %v5290_v38  ;;  %6318 = vst [vmem:[#allocation25_spill] sm:$0xff] %v5296_v17 }
 0x70f   :  { %2128 = vmatpush1.bf16.msra.mxu0 %v5278_v58  ;;  %2169 = vmatpush1.bf16.msra.mxu1 %v5284_v56  ;;  %v5302_v58 = vld [vmem:[%s5679_s2 + $0xc0] ss:$16 sps:$4 sm:$0xff]   ;;  %v5308_v56 = vld [vmem:[%s5679_s2 + $0xc8] ss:$16 sps:$4 sm:$0xff]  }
 0x710   :  { %2129 = vmatprep.subr.bf16.mxu0 %v5290_v38  ;;  %2170 = vmatprep.subr.bf16.mxu1 %v5296_v17  ;;  %6319 = vst [vmem:[#allocation26_spill] sm:$0xff] %v5302_v58  ;;  %6320 = vst [vmem:[#allocation27_spill] sm:$0xff] %v5308_v56  ;;  %v5314_v38 = vld [vmem:[%s5679_s2 + $0xe4] ss:$16 sps:$4 sm:$0xff]   ;;  %v5320_v17 = vld [vmem:[%s5679_s2 + $0xec] ss:$16 sps:$4 sm:$0xff]  }
 0x711   :  { %6321 = vst [vmem:[#allocation28_spill] sm:$0xff] %v5314_v38  ;;  %6322 = vst [vmem:[#allocation29_spill] sm:$0xff] %v5320_v17 }
 0x713   :  { %2130 = vmatpush1.bf16.msra.mxu0 %v5302_v58  ;;  %2171 = vmatpush1.bf16.msra.mxu1 %v5308_v56  ;;  %v5326_v58 = vld [vmem:[%s5679_s2 + $0xe0] ss:$16 sps:$4 sm:$0xff]   ;;  %v5332_v56 = vld [vmem:[%s5679_s2 + $0xe8] ss:$16 sps:$4 sm:$0xff]  }
 0x714   :  { %2131 = vmatprep.subr.bf16.mxu0 %v5314_v38  ;;  %2172 = vmatprep.subr.bf16.mxu1 %v5320_v17  ;;  %6323 = vst [vmem:[#allocation30_spill] sm:$0xff] %v5326_v58  ;;  %6324 = vst [vmem:[#allocation31_spill] sm:$0xff] %v5332_v56  ;;  %v5338_v38 = vld [vmem:[%s5679_s2 + $0x104] ss:$16 sps:$4 sm:$0xff]   ;;  %v5344_v17 = vld [vmem:[%s5679_s2 + $0x10c] ss:$16 sps:$4 sm:$0xff]  }
 0x715   :  { %6325 = vst [vmem:[#allocation32_spill] sm:$0xff] %v5338_v38  ;;  %6326 = vst [vmem:[#allocation33_spill] sm:$0xff] %v5344_v17 }
 0x717   :  { %2132 = vmatpush1.bf16.msra.mxu0 %v5326_v58  ;;  %2173 = vmatpush1.bf16.msra.mxu1 %v5332_v56  ;;  %v5350_v58 = vld [vmem:[%s5679_s2 + $0x100] ss:$16 sps:$4 sm:$0xff]   ;;  %v5356_v56 = vld [vmem:[%s5679_s2 + $0x108] ss:$16 sps:$4 sm:$0xff]  }
 0x718   :  { %2133 = vmatprep.subr.bf16.mxu0 %v5338_v38  ;;  %2174 = vmatprep.subr.bf16.mxu1 %v5344_v17  ;;  %6327 = vst [vmem:[#allocation34_spill] sm:$0xff] %v5350_v58  ;;  %6328 = vst [vmem:[#allocation35_spill] sm:$0xff] %v5356_v56  ;;  %v5362_v38 = vld [vmem:[%s5679_s2 + $0x124] ss:$16 sps:$4 sm:$0xff]   ;;  %v5368_v17 = vld [vmem:[%s5679_s2 + $0x12c] ss:$16 sps:$4 sm:$0xff]  }
 0x719   :  { %6329 = vst [vmem:[#allocation36_spill] sm:$0xff] %v5362_v38  ;;  %6330 = vst [vmem:[#allocation37_spill] sm:$0xff] %v5368_v17 }
 0x71b   :  { %2134 = vmatpush1.bf16.msra.mxu0 %v5350_v58  ;;  %2175 = vmatpush1.bf16.msra.mxu1 %v5356_v56  ;;  %v5374_v58 = vld [vmem:[%s5679_s2 + $0x120] ss:$16 sps:$4 sm:$0xff]   ;;  %v5380_v56 = vld [vmem:[%s5679_s2 + $0x128] ss:$16 sps:$4 sm:$0xff]  }
 0x71c   :  { %2135 = vmatprep.subr.bf16.mxu0 %v5362_v38  ;;  %2176 = vmatprep.subr.bf16.mxu1 %v5368_v17  ;;  %6331 = vst [vmem:[#allocation38_spill] sm:$0xff] %v5374_v58  ;;  %6332 = vst [vmem:[#allocation39_spill] sm:$0xff] %v5380_v56  ;;  %v5386_v38 = vld [vmem:[%s5679_s2 + $0x144] ss:$16 sps:$4 sm:$0xff]   ;;  %v5392_v17 = vld [vmem:[%s5679_s2 + $0x14c] ss:$16 sps:$4 sm:$0xff]  }
 0x71d   :  { %6333 = vst [vmem:[#allocation40_spill] sm:$0xff] %v5386_v38  ;;  %6334 = vst [vmem:[#allocation41_spill] sm:$0xff] %v5392_v17 }
 0x71f   :  { %2136 = vmatpush1.bf16.msra.mxu0 %v5374_v58  ;;  %2177 = vmatpush1.bf16.msra.mxu1 %v5380_v56  ;;  %v5398_v58 = vld [vmem:[%s5679_s2 + $0x140] ss:$16 sps:$4 sm:$0xff]   ;;  %v5404_v56 = vld [vmem:[%s5679_s2 + $0x148] ss:$16 sps:$4 sm:$0xff]  }
 0x720   :  { %2137 = vmatprep.subr.bf16.mxu0 %v5386_v38  ;;  %2178 = vmatprep.subr.bf16.mxu1 %v5392_v17  ;;  %6335 = vst [vmem:[#allocation42_spill] sm:$0xff] %v5398_v58  ;;  %6336 = vst [vmem:[#allocation43_spill] sm:$0xff] %v5404_v56  ;;  %v5410_v38 = vld [vmem:[%s5679_s2 + $0x164] ss:$16 sps:$4 sm:$0xff]   ;;  %v5416_v17 = vld [vmem:[%s5679_s2 + $0x16c] ss:$16 sps:$4 sm:$0xff]  }
 0x721   :  { %6337 = vst [vmem:[#allocation44_spill] sm:$0xff] %v5410_v38  ;;  %6338 = vst [vmem:[#allocation45_spill] sm:$0xff] %v5416_v17 }
 0x723   :  { %2138 = vmatpush1.bf16.msra.mxu0 %v5398_v58  ;;  %2179 = vmatpush1.bf16.msra.mxu1 %v5404_v56  ;;  %v5422_v58 = vld [vmem:[%s5679_s2 + $0x160] ss:$16 sps:$4 sm:$0xff]   ;;  %v5428_v56 = vld [vmem:[%s5679_s2 + $0x168] ss:$16 sps:$4 sm:$0xff]  }
 0x724   :  { %2139 = vmatprep.subr.bf16.mxu0 %v5410_v38  ;;  %2180 = vmatprep.subr.bf16.mxu1 %v5416_v17  ;;  %6339 = vst [vmem:[#allocation46_spill] sm:$0xff] %v5422_v58  ;;  %6340 = vst [vmem:[#allocation47_spill] sm:$0xff] %v5428_v56  ;;  %v5434_v38 = vld [vmem:[%s5679_s2 + $0x184] ss:$16 sps:$4 sm:$0xff]   ;;  %v5440_v17 = vld [vmem:[%s5679_s2 + $0x18c] ss:$16 sps:$4 sm:$0xff]  }
 0x725   :  { %6341 = vst [vmem:[#allocation48_spill] sm:$0xff] %v5434_v38  ;;  %6342 = vst [vmem:[#allocation49_spill] sm:$0xff] %v5440_v17 }
 0x727   :  { %2140 = vmatpush1.bf16.msra.mxu0 %v5422_v58  ;;  %2181 = vmatpush1.bf16.msra.mxu1 %v5428_v56  ;;  %v5446_v58 = vld [vmem:[%s5679_s2 + $0x180] ss:$16 sps:$4 sm:$0xff]   ;;  %v5452_v56 = vld [vmem:[%s5679_s2 + $0x188] ss:$16 sps:$4 sm:$0xff]  }
 0x728   :  { %2141 = vmatprep.subr.bf16.mxu0 %v5434_v38  ;;  %2182 = vmatprep.subr.bf16.mxu1 %v5440_v17  ;;  %6343 = vst [vmem:[#allocation50_spill] sm:$0xff] %v5446_v58  ;;  %6344 = vst [vmem:[#allocation51_spill] sm:$0xff] %v5452_v56  ;;  %v5458_v38 = vld [vmem:[%s5679_s2 + $0x1a4] ss:$16 sps:$4 sm:$0xff]   ;;  %v5464_v17 = vld [vmem:[%s5679_s2 + $0x1ac] ss:$16 sps:$4 sm:$0xff]  }
 0x729   :  { %6345 = vst [vmem:[#allocation52_spill] sm:$0xff] %v5458_v38  ;;  %6346 = vst [vmem:[#allocation53_spill] sm:$0xff] %v5464_v17 }
 0x72b   :  { %2142 = vmatpush1.bf16.msra.mxu0 %v5446_v58  ;;  %2183 = vmatpush1.bf16.msra.mxu1 %v5452_v56  ;;  %v5470_v58 = vld [vmem:[%s5679_s2 + $0x1a0] ss:$16 sps:$4 sm:$0xff]   ;;  %v5476_v56 = vld [vmem:[%s5679_s2 + $0x1a8] ss:$16 sps:$4 sm:$0xff]  }
 0x72c   :  { %2143 = vmatprep.subr.bf16.mxu0 %v5458_v38  ;;  %2184 = vmatprep.subr.bf16.mxu1 %v5464_v17  ;;  %6347 = vst [vmem:[#allocation54_spill] sm:$0xff] %v5470_v58  ;;  %6348 = vst [vmem:[#allocation55_spill] sm:$0xff] %v5476_v56  ;;  %v5482_v38 = vld [vmem:[%s5679_s2 + $0x1c4] ss:$16 sps:$4 sm:$0xff]   ;;  %v5488_v17 = vld [vmem:[%s5679_s2 + $0x1cc] ss:$16 sps:$4 sm:$0xff]  }
 0x72d   :  { %6349 = vst [vmem:[#allocation9_spill] sm:$0xff] %v5482_v38  ;;  %6350 = vst [vmem:[#allocation56_spill] sm:$0xff] %v5488_v17 }
 0x72f   :  { %2144 = vmatpush1.bf16.msra.mxu0 %v5470_v58  ;;  %2185 = vmatpush1.bf16.msra.mxu1 %v5476_v56  ;;  %v5494_v58 = vld [vmem:[%s5679_s2 + $0x1c0] ss:$16 sps:$4 sm:$0xff]   ;;  %v5500_v56 = vld [vmem:[%s5679_s2 + $0x1c8] ss:$16 sps:$4 sm:$0xff]  }
 0x730   :  { %2145 = vmatprep.subr.bf16.mxu0 %v5482_v38  ;;  %2186 = vmatprep.subr.bf16.mxu1 %v5488_v17  ;;  %6351 = vst [vmem:[#allocation57_spill] sm:$0xff] %v5494_v58  ;;  %6352 = vst [vmem:[#allocation58_spill] sm:$0xff] %v5500_v56  ;;  %v5506_v38 = vld [vmem:[%s5679_s2 + $0x1e4] ss:$16 sps:$4 sm:$0xff]   ;;  %v5512_v17 = vld [vmem:[%s5679_s2 + $0x1ec] ss:$16 sps:$4 sm:$0xff]  }
 0x731   :  { %6353 = vst [vmem:[#allocation59_spill] sm:$0xff] %v5506_v38  ;;  %6354 = vst [vmem:[#allocation60_spill] sm:$0xff] %v5512_v17 }
 0x733   :  { %2146 = vmatpush1.bf16.msra.mxu0 %v5494_v58  ;;  %2187 = vmatpush1.bf16.msra.mxu1 %v5500_v56  ;;  %v5518_v58 = vld [vmem:[%s5679_s2 + $0x1e0] ss:$16 sps:$4 sm:$0xff]   ;;  %v5524_v56 = vld [vmem:[%s5679_s2 + $0x1e8] ss:$16 sps:$4 sm:$0xff]  }
 0x734   :  { %2147 = vmatprep.subr.bf16.mxu0 %v5506_v38  ;;  %2188 = vmatprep.subr.bf16.mxu1 %v5512_v17  ;;  %6355 = vst [vmem:[#allocation61_spill] sm:$0xff] %v5518_v58  ;;  %6356 = vst [vmem:[#allocation62_spill] sm:$0xff] %v5524_v56 }
 0x737   :  { %2148 = vmatpush1.bf16.msra.mxu0 %v5518_v58  ;;  %2189 = vmatpush1.bf16.msra.mxu1 %v5524_v56 }
 0x738   :  { %2233 = vmatprep.subr.bf16.mxu0 %v4996_v49  ;;  %2274 = vmatprep.subr.bf16.mxu1 %v5002_v29 }
 0x7ad   :  { %v1923_v38 = vpop.f32.mrb[44].mxu0  ;;  %v1964_v17 = vpop.f32.mrb[44].mxu1 }
 0x7ae   :  { %v1924_v41 = vadd.f32 %v1923_v38, %v6297_v3  ;;  %v1925_v27 = vpop.f32.mrb[45].mxu0  ;;  %v1966_v26 = vpop.f32.mrb[45].mxu1  ;;  %v1965_v29 = vadd.f32 %v1964_v17, %v6300_v19 }
 0x7af   :  { %v1926_v25 = vadd.f32 %v1925_v27, %v6298_v9  ;;  %v1927_v58 = vpop.f32.mrb[46].mxu0  ;;  %v1968_v24 = vpop.f32.mrb[46].mxu1  ;;  %v1967_v49 = vadd.f32 %v1966_v26, %v6299_v14 }
 0x7b0   :  { %v2605_v23 = vmul.f32 -1.442695, %v1924_v41  ;;  %v1928_v22 = vpop.f32.mrb[47].mxu0  ;;  %v1969_v20 = vpop.f32.mrb[47].mxu1 }
 0x7b1   :  { %v2606_v18 = vmul.f32 -1.442695, %v1926_v25  ;;  %v2607_v56 = vmul.f32 -1.442695, %v1967_v49  ;;  %v2609_v20 = vld [vmem:[%s5680_s0 + $0x60] sm:$0xff] }
 0x7b2   :  { %2949 = vpow2.f32 %v2605_v23  ;;  %v2001_v27 = vunpack.c.l.bf16 %v2609_v20  ;;  %v2002_v17 = vunpack.c.h.bf16 %v2609_v20 }
 0x7b3   :  { %2951 = vpow2.f32 %v2606_v18 }
 0x7b4   :  { %2953 = vpow2.f32 %v2607_v56  ;;  %v2610_v56 = vld [vmem:[%s5680_s0 + $0x68] sm:$0xff] }
 0x7b5   :  { %2955 = vtanh.f32 %v1965_v29 }
 0x7bc   :  { %v2950_v15 = vpop.eup %2949 }
 0x7bd   :  { %v2952_v52 = vpop.eup %2951  ;;  %v1974_v38 = vadd.f32 1.0, %v2950_v15 }
 0x7be   :  { %v1980_v3 = vadd.f32 1.0, %v2952_v52  ;;  %v2954_v24 = vpop.eup %2953 }
 0x7bf   :  { %2957 = vrcp.f32 %v1974_v38  ;;  %v2956_v22 = vpop.eup %2955  ;;  %v1987_v26 = vadd.f32 1.0, %v2954_v24 }
 0x7c0   :  { %2959 = vrcp.f32 %v1980_v3 }
 0x7c1   :  { %2961 = vrcp.f32 %v1987_v26  ;;  %v2003_v26 = vunpack.c.l.bf16 %v2610_v56 }
 0x7c9   :  { %v2958_v18 = vpop.eup %2957 }
 0x7ca   :  { %v2960_v23 = vpop.eup %2959  ;;  %v1991_v25 = vmul.f32 %v2958_v18, %v2956_v22 }
 0x7cb   :  { %v1990_v41 = vmul.f32 %v2960_v23, %v5013_v13  ;;  %v2004_v23 = vunpack.c.h.bf16 %v2610_v56 }
 0x7cd   :  { %v5537_v15 = vadd.f32 %v1991_v25, %v1990_v41  ;;  %v2039_v58 = vpop.f32.mrb[48].mxu0  ;;  %v2080_v52 = vpop.f32.mrb[48].mxu1 }
 0x7ce   :  { %v2087_v3 = vadd.f32 %v2039_v58, %v2001_v27  ;;  %v2041_v49 = vpop.f32.mrb[49].mxu0  ;;  %v2082_v29 = vpop.f32.mrb[49].mxu1  ;;  %v2089_v14 = vadd.f32 %v2080_v52, %v2003_v26  ;;  %v6399_v26 = vld [vmem:[#allocation50_spill] sm:$0xff] }
 0x7cf   :  { %v2088_v38 = vadd.f32 %v2041_v49, %v2002_v17  ;;  %v2043_v19 = vpop.f32.mrb[50].mxu0  ;;  %v2084_v22 = vpop.f32.mrb[50].mxu1  ;;  %2963 = vtanh.f32 %v5537_v15  ;;  %v2090_v25 = vadd.f32 %v2082_v29, %v2004_v23  ;;  %v6397_v23 = vld [vmem:[#allocation48_spill] sm:$0xff] }
 0x7d0   :  { %v2611_v24 = vmul.f32 -1.442695, %v2087_v3  ;;  %v2044_v13 = vpop.f32.mrb[51].mxu0  ;;  %v2085_v20 = vpop.f32.mrb[51].mxu1 }
 0x7d1   :  { %v2612_v18 = vmul.f32 -1.442695, %v2088_v38  ;;  %v2962_v27 = vpop.eup %2961  ;;  %v2613_v58 = vmul.f32 -1.442695, %v2090_v25  ;;  %v6398_v25 = vld [vmem:[#allocation49_spill] sm:$0xff] }
 0x7d2   :  { %2965 = vpow2.f32 %v2611_v24 }
 0x7d3   :  { %2967 = vpow2.f32 %v2612_v18 }
 0x7d4   :  { %2969 = vpow2.f32 %v2613_v58  ;;  %v6402_v58 = vld [vmem:[#allocation53_spill] sm:$0xff] }
 0x7d5   :  { %2971 = vtanh.f32 %v2089_v14 }
 0x7d9   :  { %v2964_v41 = vpop.eup %2963 }
 0x7da   :  { %v1994_v9 = vmul.f32 %v2964_v41, %v2962_v27  ;;  %v6400_v27 = vld [vmem:[#allocation51_spill] sm:$0xff]  ;;  %v6401_v41 = vld [vmem:[#allocation52_spill] sm:$0xff] }
 0x7dc   :  { %v2966_v46 = vpop.eup %2965  ;;  %v1995_v19 = vadd.f32 %v1994_v9, %v5027_v1  ;;  %v2116_v17 = vpack.c.bf16 %v1994_v9, %v1994_v9 }
 0x7dd   :  { %v2968_v49 = vpop.eup %2967  ;;  %v2094_v22 = vadd.f32 1.0, %v2966_v46 }
 0x7de   :  { %v2100_v3 = vadd.f32 1.0, %v2968_v49  ;;  %2608 = vst [vmem:[%s5682_s4 + $0x28] sm:$0xff] %v1995_v19  ;;  %2149 = vmatprep.mubr.bf16.mxu0 %v2116_v17  ;;  %2190 = vmatprep.mubr.bf16.mxu1 %v2116_v17  ;;  %v2970_v56 = vpop.eup %2969  ;;  %v6403_v19 = vld [vmem:[#allocation54_spill] sm:$0xff]  ;;  %v6404_v17 = vld [vmem:[#allocation55_spill] sm:$0xff]  ;;  %v6405_v49 = vld [vmem:[#allocation9_spill] sm:$0xff] }
 0x7df   :  { %2973 = vrcp.f32 %v2094_v22  ;;  %v2972_v52 = vpop.eup %2971  ;;  %v2107_v1 = vadd.f32 1.0, %v2970_v56  ;;  %v6406_v22 = vld [vmem:[#allocation56_spill] sm:$0xff]  ;;  %v6408_v56 = vld [vmem:[#allocation58_spill] sm:$0xff] }
 0x7e0   :  { %2975 = vrcp.f32 %v2100_v3  ;;  %v6407_v3 = vld [vmem:[#allocation57_spill] sm:$0xff] }
 0x7e1   :  { %2977 = vrcp.f32 %v2107_v1 }
 0x7e9   :  { %v2974_v29 = vpop.eup %2973 }
 0x7ea   :  { %v2976_v38 = vpop.eup %2975  ;;  %v2111_v24 = vmul.f32 %v2974_v29, %v2972_v52  ;;  %v6409_v52 = vld [vmem:[#allocation59_spill] sm:$0xff]  ;;  %v6410_v29 = vld [vmem:[#allocation60_spill] sm:$0xff] }
 0x7eb   :  { %v2110_v9 = vmul.f32 %v2976_v38, %v5024_v51  ;;  %v2978_v14 = vpop.eup %2977  ;;  %v6372_v51 = vld [vmem:[#allocation11_spill] sm:$0xff]  ;;  %v6411_v38 = vld [vmem:[#allocation61_spill] sm:$0xff] }
 0x7ed   :  { %v5548_v46 = vadd.f32 %v2111_v24, %v2110_v9  ;;  %v6412_v24 = vld [vmem:[#allocation62_spill] sm:$0xff] }
 0x7ef   :  { %2979 = vtanh.f32 %v5548_v46 }
 0x7f9   :  { %v2980_v13 = vpop.eup %2979 }
 0x7fa   :  { %v5551_v20 = vmul.f32 %v2980_v13, %v2978_v14  ;;  %v6413_v14 = vld [vmem:[#allocation6_spill] sm:$0xff] }
 0x7fc   :  { %v2115_v18 = vpack.c.bf16 %v5551_v20, %v5551_v20 }
 0x7fe   :  { %2150 = vmatmul.mubr.bf16.vlgmr.msra.gmra.mrb[52].mxu0 %v2115_v18  ;;  %2191 = vmatmul.mubr.bf16.vlgmr.msra.gmra.mrb[52].mxu1 %v2115_v18 }
 0x7ff   :  { %2234 = vmatpush1.bf16.msra.mxu0 %v4830_v30  ;;  %2275 = vmatpush1.bf16.msra.mxu1 %v4836_v28  ;;  %v6358_v30 = vld [vmem:[#allocation13_spill] sm:$0xff]  ;;  %v6359_v28 = vld [vmem:[#allocation3_spill] sm:$0xff] }
 0x800   :  { %2235 = vmatprep.subr.bf16.mxu0 %v4842_v2  ;;  %2276 = vmatprep.subr.bf16.mxu1 %v4848_v42  ;;  %v6360_v2 = vld [vmem:[#allocation4_spill] sm:$0xff]  ;;  %v6361_v42 = vld [vmem:[#allocation14_spill] sm:$0xff] }
 0x801   :  { %2265 = vmatprep.mubr.bf16.mxu0 %v6029_v48  ;;  %2306 = vmatprep.mubr.bf16.mxu1 %v6029_v48  ;;  %v6357_v48 = vld [vmem:[#allocation12_spill] sm:$0xff] }
 0x803   :  { %2236 = vmatpush1.bf16.msra.mxu0 %v4856_v37  ;;  %2277 = vmatpush1.bf16.msra.mxu1 %v4862_v44  ;;  %v6362_v37 = vld [vmem:[#allocation15_spill] sm:$0xff]  ;;  %v6363_v44 = vld [vmem:[#allocation16_spill] sm:$0xff] }
 0x804   :  { %2237 = vmatprep.subr.bf16.mxu0 %v4868_v50  ;;  %2278 = vmatprep.subr.bf16.mxu1 %v4874_v33  ;;  %v6364_v50 = vld [vmem:[#allocation17_spill] sm:$0xff]  ;;  %v6365_v33 = vld [vmem:[#allocation18_spill] sm:$0xff] }
 0x807   :  { %2238 = vmatpush1.bf16.msra.mxu0 %v4880_v47  ;;  %2279 = vmatpush1.bf16.msra.mxu1 %v4886_v21  ;;  %v6366_v47 = vld [vmem:[#allocation19_spill] sm:$0xff]  ;;  %v6367_v21 = vld [vmem:[#allocation20_spill] sm:$0xff] }
 0x808   :  { %2239 = vmatprep.subr.bf16.mxu0 %v4892_v62  ;;  %2280 = vmatprep.subr.bf16.mxu1 %v5047_v43  ;;  %v6368_v62 = vld [vmem:[#allocation21_spill] sm:$0xff]  ;;  %v6373_v43 = vld [vmem:[#allocation24_spill] sm:$0xff] }
 0x80b   :  { %2240 = vmatpush1.bf16.msra.mxu0 %v4899_v40  ;;  %2281 = vmatpush1.bf16.msra.mxu1 %v5054_v57  ;;  %v6369_v40 = vld [vmem:[#allocation22_spill] sm:$0xff]  ;;  %v6374_v57 = vld [vmem:[#allocation25_spill] sm:$0xff] }
 0x80c   :  { %2241 = vmatprep.subr.bf16.mxu0 %v4906_v35  ;;  %2282 = vmatprep.subr.bf16.mxu1 %v5061_v63  ;;  %v6370_v35 = vld [vmem:[#allocation23_spill] sm:$0xff]  ;;  %v6375_v63 = vld [vmem:[#allocation26_spill] sm:$0xff] }
 0x80f   :  { %2242 = vmatpush1.bf16.msra.mxu0 %v4913_v12  ;;  %2283 = vmatpush1.bf16.msra.mxu1 %v5068_v0  ;;  %v6371_v12 = vld [vmem:[#allocation10_spill] sm:$0xff]  ;;  %v6376_v0 = vld [vmem:[#allocation27_spill] sm:$0xff] }
 0x810   :  { %2243 = vmatprep.subr.bf16.mxu0 %v5074_v54  ;;  %2284 = vmatprep.subr.bf16.mxu1 %v5080_v53  ;;  %v6377_v54 = vld [vmem:[#allocation28_spill] sm:$0xff]  ;;  %v6378_v53 = vld [vmem:[#allocation29_spill] sm:$0xff] }
 0x813   :  { %2244 = vmatpush1.bf16.msra.mxu0 %v5086_v59  ;;  %2285 = vmatpush1.bf16.msra.mxu1 %v5092_v16  ;;  %v6379_v59 = vld [vmem:[#allocation30_spill] sm:$0xff]  ;;  %v6380_v16 = vld [vmem:[#allocation31_spill] sm:$0xff] }
 0x814   :  { %2245 = vmatprep.subr.bf16.mxu0 %v5098_v36  ;;  %2286 = vmatprep.subr.bf16.mxu1 %v5104_v5  ;;  %v6381_v36 = vld [vmem:[#allocation32_spill] sm:$0xff]  ;;  %v6382_v5 = vld [vmem:[#allocation33_spill] sm:$0xff] }
 0x817   :  { %2246 = vmatpush1.bf16.msra.mxu0 %v5110_v61  ;;  %2287 = vmatpush1.bf16.msra.mxu1 %v5116_v32  ;;  %v6383_v61 = vld [vmem:[#allocation34_spill] sm:$0xff]  ;;  %v6384_v32 = vld [vmem:[#allocation35_spill] sm:$0xff] }
 0x818   :  { %2247 = vmatprep.subr.bf16.mxu0 %v5122_v34  ;;  %2288 = vmatprep.subr.bf16.mxu1 %v5128_v39  ;;  %v6385_v34 = vld [vmem:[#allocation36_spill] sm:$0xff]  ;;  %v6386_v39 = vld [vmem:[#allocation37_spill] sm:$0xff] }
 0x81b   :  { %2248 = vmatpush1.bf16.msra.mxu0 %v5134_v31  ;;  %2289 = vmatpush1.bf16.msra.mxu1 %v5140_v45  ;;  %v6387_v31 = vld [vmem:[#allocation38_spill] sm:$0xff]  ;;  %v6388_v45 = vld [vmem:[#allocation39_spill] sm:$0xff] }
 0x81c   :  { %2345 = vmatprep.subr.bf16.mxu0 %v5146_v4  ;;  %2386 = vmatprep.subr.bf16.mxu1 %v5152_v7  ;;  %v6389_v4 = vld [vmem:[#allocation40_spill] sm:$0xff]  ;;  %v6390_v7 = vld [vmem:[#allocation41_spill] sm:$0xff] }
 0x81e   :  { %2266 = vmatmul.mubr.bf16.vlgmr.msra.gmra.mrb[56].mxu0 %v2115_v18  ;;  %2307 = vmatmul.mubr.bf16.vlgmr.msra.gmra.mrb[56].mxu1 %v2115_v18 }
 0x81f   :  { %2346 = vmatpush1.bf16.msra.mxu0 %v5158_v8  ;;  %2387 = vmatpush1.bf16.msra.mxu1 %v5164_v10  ;;  %v6391_v8 = vld [vmem:[#allocation42_spill] sm:$0xff]  ;;  %v6392_v10 = vld [vmem:[#allocation43_spill] sm:$0xff] }
 0x820   :  { %2347 = vmatprep.subr.bf16.mxu0 %v5170_v11  ;;  %2388 = vmatprep.subr.bf16.mxu1 %v5176_v60  ;;  %v6393_v11 = vld [vmem:[#allocation44_spill] sm:$0xff]  ;;  %v6394_v60 = vld [vmem:[#allocation45_spill] sm:$0xff] }
 0x823   :  { %2348 = vmatpush1.bf16.msra.mxu0 %v5182_v55  ;;  %2389 = vmatpush1.bf16.msra.mxu1 %v5188_v6  ;;  %v6395_v55 = vld [vmem:[#allocation46_spill] sm:$0xff]  ;;  %v6396_v6 = vld [vmem:[#allocation47_spill] sm:$0xff] }
 0x824   :  { %2349 = vmatprep.subr.bf16.mxu0 %v6357_v48  ;;  %2390 = vmatprep.subr.bf16.mxu1 %v6358_v30  ;;  %v6414_v30 = vld [vmem:[#allocation5_spill] sm:$0xff] }
 0x827   :  { %2350 = vmatpush1.bf16.msra.mxu0 %v6359_v28  ;;  %2391 = vmatpush1.bf16.msra.mxu1 %v6360_v2 }
 0x828   :  { %2351 = vmatprep.subr.bf16.mxu0 %v6361_v42  ;;  %2392 = vmatprep.subr.bf16.mxu1 %v6362_v37 }
 0x82b   :  { %2352 = vmatpush1.bf16.msra.mxu0 %v6363_v44  ;;  %2393 = vmatpush1.bf16.msra.mxu1 %v6364_v50 }
 0x82c   :  { %2353 = vmatprep.subr.bf16.mxu0 %v6365_v33  ;;  %2394 = vmatprep.subr.bf16.mxu1 %v6366_v47  ;;  %v6415_v47 = vld [vmem:[#allocation7_spill] sm:$0xff] }
 0x82f   :  { %2354 = vmatpush1.bf16.msra.mxu0 %v6367_v21  ;;  %2395 = vmatpush1.bf16.msra.mxu1 %v6368_v62 }
 0x830   :  { %2355 = vmatprep.subr.bf16.mxu0 %v6369_v40  ;;  %2396 = vmatprep.subr.bf16.mxu1 %v6370_v35  ;;  %v6416_v40 = vld [vmem:[#allocation8_spill] sm:$0xff] }
 0x833   :  { %2356 = vmatpush1.bf16.msra.mxu0 %v6371_v12  ;;  %2397 = vmatpush1.bf16.msra.mxu1 %v6372_v51 }
 0x834   :  { %2357 = vmatprep.subr.bf16.mxu0 %v6373_v43  ;;  %2398 = vmatprep.subr.bf16.mxu1 %v6374_v57 }
 0x837   :  { %2358 = vmatpush1.bf16.msra.mxu0 %v6375_v63  ;;  %2399 = vmatpush1.bf16.msra.mxu1 %v6376_v0  ;;  %v2618_v0 = vld [vmem:[%s5680_s0 + $0x70] sm:$0xff] }
 0x838   :  { %2359 = vmatprep.subr.bf16.mxu0 %v6377_v54  ;;  %2400 = vmatprep.subr.bf16.mxu1 %v6378_v53 }
 0x83b   :  { %2360 = vmatpush1.bf16.msra.mxu0 %v6379_v59  ;;  %2401 = vmatpush1.bf16.msra.mxu1 %v6380_v16 }
 0x83c   :  { %2361 = vmatprep.subr.bf16.mxu0 %v6381_v36  ;;  %2402 = vmatprep.subr.bf16.mxu1 %v6382_v5  ;;  %v2229_v5 = vunpack.c.l.bf16 %v2618_v0 }
 0x83f   :  { %2362 = vmatpush1.bf16.msra.mxu0 %v6383_v61  ;;  %2403 = vmatpush1.bf16.msra.mxu1 %v6384_v32  ;;  %v2230_v32 = vunpack.c.h.bf16 %v2618_v0 }
 0x840   :  { %2363 = vmatprep.subr.bf16.mxu0 %v6385_v34  ;;  %2404 = vmatprep.subr.bf16.mxu1 %v6386_v39 }
 0x843   :  { %2364 = vmatpush1.bf16.msra.mxu0 %v6387_v31  ;;  %2405 = vmatpush1.bf16.msra.mxu1 %v6388_v45 }
 0x844   :  { %2365 = vmatprep.subr.bf16.mxu0 %v6389_v4  ;;  %2406 = vmatprep.subr.bf16.mxu1 %v6390_v7  ;;  %v2619_v4 = vld [vmem:[%s5680_s0 + $0x78] sm:$0xff] }
 0x847   :  { %2366 = vmatpush1.bf16.msra.mxu0 %v6391_v8  ;;  %2407 = vmatpush1.bf16.msra.mxu1 %v6392_v10 }
 0x848   :  { %2367 = vmatprep.subr.bf16.mxu0 %v6393_v11  ;;  %2408 = vmatprep.subr.bf16.mxu1 %v6394_v60 }
 0x84b   :  { %2368 = vmatpush1.bf16.msra.mxu0 %v6395_v55  ;;  %2409 = vmatpush1.bf16.msra.mxu1 %v6396_v6 }
 0x84c   :  { %2369 = vmatprep.subr.bf16.mxu0 %v6397_v23  ;;  %2410 = vmatprep.subr.bf16.mxu1 %v6398_v25  ;;  %v2232_v25 = vunpack.c.h.bf16 %v2619_v4 }
 0x84f   :  { %2370 = vmatpush1.bf16.msra.mxu0 %v6399_v26  ;;  %2411 = vmatpush1.bf16.msra.mxu1 %v6400_v27  ;;  %v2231_v27 = vunpack.c.l.bf16 %v2619_v4 }
 0x850   :  { %2371 = vmatprep.subr.bf16.mxu0 %v6401_v41  ;;  %2412 = vmatprep.subr.bf16.mxu1 %v6402_v58 }
 0x853   :  { %2372 = vmatpush1.bf16.msra.mxu0 %v6403_v19  ;;  %2413 = vmatpush1.bf16.msra.mxu1 %v6404_v17 }
 0x854   :  { %2373 = vmatprep.subr.bf16.mxu0 %v6405_v49  ;;  %2414 = vmatprep.subr.bf16.mxu1 %v6406_v22 }
 0x857   :  { %2374 = vmatpush1.bf16.msra.mxu0 %v6407_v3  ;;  %2415 = vmatpush1.bf16.msra.mxu1 %v6408_v56 }
 0x858   :  { %2375 = vmatprep.subr.bf16.mxu0 %v6409_v52  ;;  %2416 = vmatprep.subr.bf16.mxu1 %v6410_v29 }
 0x85b   :  { %2376 = vmatpush1.bf16.msra.mxu0 %v6411_v38  ;;  %2417 = vmatpush1.bf16.msra.mxu1 %v6412_v24 }
 0x8d1   :  { %v2151_v1 = vpop.f32.mrb[52].mxu0  ;;  %v2192_v9 = vpop.f32.mrb[52].mxu1 }
 0x8d2   :  { %v2152_v13 = vadd.f32 %v2151_v1, %v6413_v14  ;;  %v2153_v18 = vpop.f32.mrb[53].mxu0  ;;  %v2194_v48 = vpop.f32.mrb[53].mxu1  ;;  %v2193_v35 = vadd.f32 %v2192_v9, %v6416_v40 }
 0x8d3   :  { %v2154_v28 = vadd.f32 %v2153_v18, %v6414_v30  ;;  %v2155_v2 = vpop.f32.mrb[54].mxu0  ;;  %v2196_v42 = vpop.f32.mrb[54].mxu1  ;;  %v2195_v21 = vadd.f32 %v2194_v48, %v6415_v47 }
 0x8d4   :  { %v2614_v37 = vmul.f32 -1.442695, %v2152_v13  ;;  %v2156_v44 = vpop.f32.mrb[55].mxu0  ;;  %v2197_v50 = vpop.f32.mrb[55].mxu1 }
 0x8d5   :  { %v2615_v33 = vmul.f32 -1.442695, %v2154_v28  ;;  %v2616_v62 = vmul.f32 -1.442695, %v2195_v21 }
 0x8d6   :  { %2981 = vpow2.f32 %v2614_v37 }
 0x8d7   :  { %2983 = vpow2.f32 %v2615_v33 }
 0x8d8   :  { %2985 = vpow2.f32 %v2616_v62 }
 0x8d9   :  { %2987 = vtanh.f32 %v2193_v35 }
 0x8e0   :  { %v2982_v12 = vpop.eup %2981 }
 0x8e1   :  { %v2984_v51 = vpop.eup %2983  ;;  %v2202_v43 = vadd.f32 1.0, %v2982_v12 }
 0x8e2   :  { %v2208_v57 = vadd.f32 1.0, %v2984_v51  ;;  %v2986_v63 = vpop.eup %2985 }
 0x8e3   :  { %2989 = vrcp.f32 %v2202_v43  ;;  %v2988_v54 = vpop.eup %2987  ;;  %v2215_v36 = vadd.f32 1.0, %v2986_v63 }
 0x8e4   :  { %2991 = vrcp.f32 %v2208_v57 }
 0x8e5   :  { %2993 = vrcp.f32 %v2215_v36 }
 0x8ed   :  { %v2990_v53 = vpop.eup %2989 }
 0x8ee   :  { %v2992_v59 = vpop.eup %2991  ;;  %v2219_v16 = vmul.f32 %v2990_v53, %v2988_v54 }
 0x8ef   :  { %v2218_v61 = vmul.f32 %v2992_v59, %v5537_v15  ;;  %v2994_v41 = vpop.eup %2993 }
 0x8f1   :  { %v5659_v34 = vadd.f32 %v2219_v16, %v2218_v61  ;;  %v2267_v39 = vpop.f32.mrb[56].mxu0  ;;  %v2308_v31 = vpop.f32.mrb[56].mxu1 }
 0x8f2   :  { %v2315_v45 = vadd.f32 %v2267_v39, %v2229_v5  ;;  %v2269_v7 = vpop.f32.mrb[57].mxu0  ;;  %v2310_v8 = vpop.f32.mrb[57].mxu1  ;;  %v2317_v17 = vadd.f32 %v2308_v31, %v2231_v27 }
 0x8f3   :  { %v2316_v10 = vadd.f32 %v2269_v7, %v2230_v32  ;;  %v2271_v11 = vpop.f32.mrb[58].mxu0  ;;  %v2312_v60 = vpop.f32.mrb[58].mxu1  ;;  %2995 = vtanh.f32 %v5659_v34  ;;  %v2318_v26 = vadd.f32 %v2310_v8, %v2232_v25 }
 0x8f4   :  { %v2620_v55 = vmul.f32 -1.442695, %v2315_v45  ;;  %v2272_v15 = vpop.f32.mrb[59].mxu0  ;;  %v2313_v6 = vpop.f32.mrb[59].mxu1 }
 0x8f5   :  { %v2621_v23 = vmul.f32 -1.442695, %v2316_v10  ;;  %v2622_v19 = vmul.f32 -1.442695, %v2318_v26 }
 0x8f6   :  { %2997 = vpow2.f32 %v2620_v55 }
 0x8f7   :  { %2999 = vpow2.f32 %v2621_v23 }
 0x8f8   :  { %3001 = vpow2.f32 %v2622_v19 }
 0x8f9   :  { %3003 = vtanh.f32 %v2317_v17 }
 0x8fd   :  { %v2996_v58 = vpop.eup %2995 }
 0x8fe   :  { %v2222_v49 = vmul.f32 %v2996_v58, %v2994_v41 }
 0x900   :  { %v2998_v22 = vpop.eup %2997  ;;  %v2223_v3 = vadd.f32 %v2222_v49, %v5551_v20  ;;  %v2344_v56 = vpack.c.bf16 %v2222_v49, %v2222_v49 }
 0x901   :  { %v3000_v52 = vpop.eup %2999  ;;  %v2322_v29 = vadd.f32 1.0, %v2998_v22 }
 0x902   :  { %v2328_v38 = vadd.f32 1.0, %v3000_v52  ;;  %2617 = vst [vmem:[%s5682_s4 + $0x30] sm:$0xff] %v2223_v3  ;;  %2377 = vmatprep.mubr.bf16.mxu0 %v2344_v56  ;;  %2418 = vmatprep.mubr.bf16.mxu1 %v2344_v56  ;;  %v3002_v24 = vpop.eup %3001 }
 0x903   :  { %3005 = vrcp.f32 %v2322_v29  ;;  %v3004_v1 = vpop.eup %3003  ;;  %v2335_v20 = vadd.f32 1.0, %v3002_v24 }
 0x904   :  { %3007 = vrcp.f32 %v2328_v38 }
 0x905   :  { %3009 = vrcp.f32 %v2335_v20 }
 0x90d   :  { %v3006_v9 = vpop.eup %3005 }
 0x90e   :  { %v3008_v13 = vpop.eup %3007  ;;  %v2339_v18 = vmul.f32 %v3006_v9, %v3004_v1 }
 0x90f   :  { %v2338_v48 = vmul.f32 %v3008_v13, %v5548_v46  ;;  %v3010_v2 = vpop.eup %3009 }
 0x911   :  { %v2340_v28 = vadd.f32 %v2339_v18, %v2338_v48 }
 0x913   :  { %3011 = vtanh.f32 %v2340_v28 }
 0x91d   :  { %v3012_v42 = vpop.eup %3011 }
 0x91e   :  { %v2342_v37 = vmul.f32 %v3012_v42, %v3010_v2 }
 0x920   :  { %v2343_v44 = vpack.c.bf16 %v2342_v37, %v2342_v37 }
 0x922   :  { %2378 = vmatmul.mubr.bf16.vlgmr.msra.gmra.mrb[60].mxu0 %v2343_v44  ;;  %2419 = vmatmul.mubr.bf16.vlgmr.msra.gmra.mrb[60].mxu1 %v2343_v44 }
 0x9f5   :  { %v2379_v50 = vpop.f32.mrb[60].mxu0  ;;  %v2420_v33 = vpop.f32.mrb[60].mxu1 }
 0x9f6   :  { %v2380_v21 = vadd.f32 %v2379_v50, %v6413_v14  ;;  %v2381_v62 = vpop.f32.mrb[61].mxu0  ;;  %v2422_v35 = vpop.f32.mrb[61].mxu1  ;;  %v2421_v59 = vadd.f32 %v2420_v33, %v6416_v40 }
 0x9f7   :  { %v2382_v12 = vadd.f32 %v2381_v62, %v6414_v30  ;;  %v2383_v51 = vpop.f32.mrb[62].mxu0  ;;  %v2424_v43 = vpop.f32.mrb[62].mxu1  ;;  %v2423_v54 = vadd.f32 %v2422_v35, %v6415_v47 }
 0x9f8   :  { %v2623_v46 = vmul.f32 -1.442695, %v2380_v21  ;;  %v2384_v57 = vpop.f32.mrb[63].mxu0  ;;  %v2425_v63 = vpop.f32.mrb[63].mxu1 }
 0x9f9   :  { %v2624_v0 = vmul.f32 -1.442695, %v2382_v12  ;;  %v2625_v53 = vmul.f32 -1.442695, %v2423_v54 }
 0x9fa   :  { %3013 = vpow2.f32 %v2623_v46 }
 0x9fb   :  { %3015 = vpow2.f32 %v2624_v0 }
 0x9fc   :  { %3017 = vpow2.f32 %v2625_v53 }
 0x9fd   :  { %3019 = vtanh.f32 %v2421_v59 }
 0xa04   :  { %v3014_v16 = vpop.eup %3013 }
 0xa05   :  { %v3016_v36 = vpop.eup %3015  ;;  %v2430_v14 = vadd.f32 1.0, %v3014_v16 }
 0xa06   :  { %v2436_v5 = vadd.f32 1.0, %v3016_v36  ;;  %v3018_v30 = vpop.eup %3017 }
 0xa07   :  { %3021 = vrcp.f32 %v2430_v14  ;;  %v3020_v61 = vpop.eup %3019  ;;  %v2443_v45 = vadd.f32 1.0, %v3018_v30 }
 0xa08   :  { %3023 = vrcp.f32 %v2436_v5 }
 0xa09   :  { %3025 = vrcp.f32 %v2443_v45 }
 0xa11   :  { %v3022_v32 = vpop.eup %3021 }
 0xa12   :  { %v3024_v39 = vpop.eup %3023  ;;  %v2447_v31 = vmul.f32 %v3022_v32, %v3020_v61 }
 0xa13   :  { %v2446_v4 = vmul.f32 %v3024_v39, %v5659_v34  ;;  %v3026_v40 = vpop.eup %3025 }
 0xa15   :  { %v2448_v47 = vadd.f32 %v2447_v31, %v2446_v4 }
 0xa17   :  { %3027 = vtanh.f32 %v2448_v47 }
 0xa21   :  { %v3028_v7 = vpop.eup %3027 }
 0xa22   :  { %v2450_v8 = vmul.f32 %v3028_v7, %v3026_v40 }
 0xa24   :  { %v2451_v10 = vadd.f32 %v2450_v8, %v2342_v37 }
 0xa26   :  { %2626 = vst [vmem:[%s5682_s4 + $0x38] sm:$0xff] %v2451_v10 }

</bundles_post_ra>
